<compile_context>
chip_gen: v7x
topology: tpu7x:2x2x1
jax: 0.10.0
libtpu: 0.0.40
codegen_flags: <defaults>
</compile_context>

<pallas_src>
import functools

import jax
import jax.numpy as jnp
from jax.experimental import pallas as pl
from jax.experimental.pallas import tpu as pltpu


def _round_up(x: int, m: int) -> int:
    return ((x + m - 1) // m) * m


def _default_ncores() -> int:
    # Only v7x has 2 TensorCores per chip; on v5e/v6e a 2-way core axis only
    # inflates padding, so default to 1 there.
    try:
        kind = jax.devices()[0].device_kind.lower()
        if "v7" in kind:
            return 2
    except Exception:
        pass
    return 1


def _dfl_loss_kernel(*refs, reg_max: int, use_dfl: bool):
    """geom_ref: (11, tg, 128) f32; reg_ref: (4, reg_max+1, tg, 128) (only if use_dfl)
    iou_out/dfl_out: (1,1,1) per-core partial sums (written only on the last tile)
    acc_iou/acc_dfl: (tg, 128) f32 resident accumulators."""
    if use_dfl:
        geom_ref, reg_ref, iou_out, dfl_out, acc_iou, acc_dfl = refs
    else:
        geom_ref, iou_out, dfl_out, acc_iou, acc_dfl = refs
        reg_ref = None

    i = pl.program_id(1)

    # NOTE: the tile axis (grid axis 1) must stay "arbitrary": the scratch
    # accumulators carry across tiles and the per-core outputs are written
    # only at the last tile (same output block index across the whole axis).
    @pl.when(i == 0)
    def _():
        acc_iou[...] = jnp.zeros_like(acc_iou)
        acc_dfl[...] = jnp.zeros_like(acc_dfl)

    px1 = geom_ref[0]
    py1 = geom_ref[1]
    px2 = geom_ref[2]
    py2 = geom_ref[3]
    tx1 = geom_ref[4]
    ty1 = geom_ref[5]
    tx2 = geom_ref[6]
    ty2 = geom_ref[7]
    w = geom_ref[10]                                      # 0 on padded anchors

    # ---- GIoU loss (1 - GIoU), mask-weighted ---------------------------------
    eps = 1e-9
    inter_w = jnp.maximum(jnp.minimum(px2, tx2) - jnp.maximum(px1, tx1), 0.0)
    inter_h = jnp.maximum(jnp.minimum(py2, ty2) - jnp.maximum(py1, ty1), 0.0)
    inter = inter_w * inter_h
    union = (px2 - px1) * (py2 - py1) + (tx2 - tx1) * (ty2 - ty1) - inter + eps
    # approx reciprocal -> EUP slot, off the VALU critical path (~2^-12 rel err)
    iou = inter * pl.reciprocal(union, approx=True)
    enc_w = jnp.maximum(px2, tx2) - jnp.minimum(px1, tx1)
    enc_h = jnp.maximum(py2, ty2) - jnp.minimum(py1, ty1)
    c_area = enc_w * enc_h + eps
    giou = iou - (c_area - union) * pl.reciprocal(c_area, approx=True)
    acc_iou[...] += (1.0 - giou) * w

    # ---- DFL: folded left/right CE, per-bin running reduction ---------------
    if use_dfl:
        nbin = reg_max + 1
        # bbox2dist sides as (minuend-row, subtrahend-row) into geom:
        #   l = ax - tx1, t = ay - ty1, r = tx2 - ax, b = ty2 - ay
        side_rows = ((8, 4), (9, 5), (6, 8), (7, 9))
        for s in range(4):
            a_row, b_row = side_rows[s]
            dist_s = jnp.clip(geom_ref[a_row] - geom_ref[b_row],
                              0.0, reg_max - 0.01)
            # pass 1: running max over the bin axis ((tg,128) slices only)
            m = reg_ref[s, 0].astype(jnp.float32)
            for j in range(1, nbin):
                m = jnp.maximum(m, reg_ref[s, j].astype(jnp.float32))
            # pass 2: running exp-sum (logsumexp) + folded-CE selected-logit sum.
            # The bin index j is a trace-time constant, so no iota tensor.
            esum = jnp.zeros_like(m)
            ssum = jnp.zeros_like(m)
            for j in range(nbin):
                lj = reg_ref[s, j].astype(jnp.float32)
                esum = esum + jnp.exp(lj - m)
                ssum = ssum + jnp.maximum(1.0 - jnp.abs(dist_s - float(j)), 0.0) * lj
            acc_dfl[...] += (m + jnp.log(esum) - ssum) * w

    @pl.when(i == pl.num_programs(1) - 1)
    def _():
        iou_out[...] = jnp.broadcast_to(jnp.sum(acc_iou[...]), (1, 1, 1))
        # mean over the 4 sides folded into the single final scale (saves a
        # per-anchor multiply in the hot path)
        dfl_out[...] = jnp.broadcast_to(0.25 * jnp.sum(acc_dfl[...]), (1, 1, 1))


def dfl_loss(reg_distribute, scale_predict_xy_xy, scale_anchor_points_x_y,
             scale_ground_true_xx_yy, target_scores, target_scores_sum, fg_mask,
             *, reg_max: int, use_dfl: bool = True, tile_n: int = 8192,
             ncores=None, reg_in_bf16: bool = False):
    """JAX/Pallas equivalent of DflLoss.forward. Returns (loss_iou, loss_dfl)."""
    B, A = fg_mask.shape
    N = B * A
    nbin = reg_max + 1

    # Per-anchor weight precomputed in XLA (replaces target_scores+fg_mask DMAs).
    w = (jnp.sum(target_scores.astype(jnp.float32), axis=-1)
         * fg_mask.astype(jnp.float32)).reshape(1, N)
    anc = jnp.broadcast_to(scale_anchor_points_x_y, (B, A, 2)).reshape(N, 2)
    pred = scale_predict_xy_xy.reshape(N, 4)
    gt = scale_ground_true_xx_yy.reshape(N, 4)

    # ---- anchor (lane) axis tiling -------------------------------------------
    # gran=2048 keeps tg a multiple of 16 so bf16 blocks stay sublane-aligned;
    # Np rounds to the minimal multiple (no ncores*tile over-rounding on 1-TC).
    gran = 2048
    if ncores is None:
        ncores = _default_ncores()
    ncores = max(1, int(ncores))
    tile_req = max(gran, _round_up(int(tile_n), gran))
    n_g = _round_up(max(N, 1), gran)
    per_core = _round_up(-(-n_g // ncores), gran)
    tiles_per_core = -(-per_core // tile_req)
    tile = _round_up(-(-per_core // tiles_per_core), gran)   # <= tile_req
    Np = ncores * tiles_per_core * tile
    tg = tile // 128
    pad = Np - N

    # Pack the small per-anchor tensors into one lane-dense (11, Np) array.
    geom = jnp.concatenate(
        [pred.astype(jnp.float32).T,        # 4 rows
         gt.astype(jnp.float32).T,          # 4 rows
         anc.astype(jnp.float32).T,         # 2 rows
         w],                                # 1 row (pads with 0 -> masked)
        axis=0)                             # (11, N)
    if pad:
        geom = jnp.pad(geom, ((0, 0), (0, pad)))
    geom = geom.reshape(11, Np // 128, 128)

    kernel = functools.partial(_dfl_loss_kernel, reg_max=reg_max, use_dfl=use_dfl)

    geom_spec = pl.BlockSpec((11, tg, 128),
                             lambda c, i: (0, c * tiles_per_core + i, 0))
    out_spec = pl.BlockSpec((1, 1, 1), lambda c, i: (c, 0, 0))
    in_specs = [geom_spec]
    operands = [geom]
    reg_itemsize = 0

    if use_dfl:
        # Pad fused into the single transpose copy (no extra full-size copy);
        # optional bf16 halves the dominant reg traffic (v5e/v6e HBM roofline).
        reg_dtype = jnp.bfloat16 if reg_in_bf16 else jnp.float32
        reg3 = reg_distribute.reshape(N, 4, nbin).astype(reg_dtype)
        if pad:
            reg3 = jnp.pad(reg3, ((0, pad), (0, 0), (0, 0)))
        reg = jnp.transpose(reg3, (1, 2, 0)).reshape(4, nbin, Np // 128, 128)
        reg_itemsize = reg.dtype.itemsize
        in_specs.append(pl.BlockSpec((4, nbin, tg, 128),
                                     lambda c, i: (0, 0, c * tiles_per_core + i, 0)))
        operands.append(reg)

    # Double-buffered block footprint; only raise the scoped-VMEM limit when a
    # user-requested tile pushes past the conservative defaults (v5e: 16 MiB).
    blk_bytes = 11 * tg * 128 * 4 + 4 * nbin * tg * 128 * reg_itemsize
    vmem_bytes = 2 * blk_bytes + 2 * tg * 128 * 4 + (1 << 20)
    cparams = dict(dimension_semantics=("parallel", "arbitrary"))
    if vmem_bytes > 12 * (1 << 20):
        cparams["vmem_limit_bytes"] = int(min(vmem_bytes + (8 << 20), 100 << 20))

    iou_parts, dfl_parts = pl.pallas_call(
        kernel,
        out_shape=(jax.ShapeDtypeStruct((ncores, 1, 1), jnp.float32),
                   jax.ShapeDtypeStruct((ncores, 1, 1), jnp.float32)),
        grid_spec=pltpu.PrefetchScalarGridSpec(
            num_scalar_prefetch=0,
            grid=(ncores, tiles_per_core),
            in_specs=in_specs,
            out_specs=[out_spec, out_spec],
            scratch_shapes=[pltpu.VMEM((tg, 128), jnp.float32),
                            pltpu.VMEM((tg, 128), jnp.float32)]),
        compiler_params=pltpu.CompilerParams(**cparams),
    )(*operands)

    tss = jnp.asarray(target_scores_sum, jnp.float32)
    denom = jnp.where(tss > 1.0, tss, 1.0)
    loss_iou = jnp.sum(iou_parts) / denom
    loss_dfl = (jnp.sum(dfl_parts) / denom) if use_dfl else jnp.float32(0.0)
    return loss_iou, loss_dfl


# ----------------------------- pure-JAX reference ------------------------------
def _dfl_loss_reference(reg_distribute, pred, anchor_points, gt, target_scores,
                        target_scores_sum, fg_mask, *, reg_max, use_dfl=True):
    B, A = fg_mask.shape
    fg = fg_mask.astype(jnp.float32)
    w = jnp.sum(target_scores, -1) * fg                          # (B,A)
    px1, py1, px2, py2 = [pred[..., k] for k in range(4)]
    tx1, ty1, tx2, ty2 = [gt[..., k] for k in range(4)]
    eps = 1e-9
    inter = (jnp.maximum(jnp.minimum(px2, tx2) - jnp.maximum(px1, tx1), 0.0) *
             jnp.maximum(jnp.minimum(py2, ty2) - jnp.maximum(py1, ty1), 0.0))
    union = (px2 - px1) * (py2 - py1) + (tx2 - tx1) * (ty2 - ty1) - inter + eps
    iou = inter / union
    c_area = ((jnp.maximum(px2, tx2) - jnp.minimum(px1, tx1)) *
              (jnp.maximum(py2, ty2) - jnp.minimum(py1, ty1)) + eps)
    giou = iou - (c_area - union) / c_area
    loss_iou = jnp.sum((1.0 - giou) * w)

    anc = jnp.broadcast_to(anchor_points, (B, A, 2))
    dist = jnp.clip(jnp.concatenate([anc - gt[..., :2], gt[..., 2:] - anc], -1),
                    0.0, reg_max - 0.01)                         # (B,A,4)
    tl = dist.astype(jnp.int32)
    wl = (tl + 1).astype(jnp.float32) - dist
    wr = 1.0 - wl
    logits = reg_distribute.reshape(B, A, 4, reg_max + 1)
    logp = jax.nn.log_softmax(logits, axis=-1)
    ce_l = -jnp.take_along_axis(logp, tl[..., None], axis=-1)[..., 0]
    ce_r = -jnp.take_along_axis(logp, (tl + 1)[..., None], axis=-1)[..., 0]
    dfl = jnp.mean(ce_l * wl + ce_r * wr, axis=-1)               # (B,A)
    loss_dfl = jnp.sum(dfl * w)

    tss = jnp.asarray(target_scores_sum, jnp.float32)
    denom = jnp.where(tss > 1.0, tss, 1.0)
    return loss_iou / denom, (loss_dfl / denom if use_dfl else jnp.float32(0.0))


def _make_inputs(key, B, A, C, reg_max):
    k = jax.random.split(key, 8)
    reg_distribute = jax.random.normal(k[0], (B, A, 4 * (reg_max + 1)), jnp.float32)
    anchor_points = jax.random.uniform(k[1], (B, A, 2), jnp.float32, 2.0, 14.0)
    lt = jax.random.uniform(k[2], (B, A, 2), jnp.float32, 0.5, 6.0)
    rb = jax.random.uniform(k[3], (B, A, 2), jnp.float32, 0.5, 6.0)
    gt_xyxy = jnp.concatenate([anchor_points - lt, anchor_points + rb], axis=-1)
    noise = jax.random.uniform(k[4], (B, A, 4), jnp.float32, -0.5, 0.5)
    pred_xyxy = gt_xyxy + noise
    target_scores = jax.random.uniform(k[5], (B, A, C), jnp.float32)
    fg_mask = jax.random.bernoulli(k[6], 0.5, (B, A))
    tss = jnp.sum(target_scores * fg_mask[..., None])
    return reg_distribute, pred_xyxy, anchor_points, gt_xyxy, target_scores, tss, fg_mask


if __name__ == "__main__":
    reg_max = 16
    key = jax.random.PRNGKey(0)
    k1, k2, k3 = jax.random.split(key, 3)

    cases = [
        # (key, (B, A, C), kwargs, tol)
        (k1, (2, 64, 4), dict(), 1e-3),                     # single small tile
        (k2, (2, 2112, 4), dict(tile_n=2048), 1e-3),        # multi-tile accumulation
        (k2, (2, 2112, 4), dict(ncores=2), 1e-3),           # forced 2-core split path
        (k3, (2, 2112, 4), dict(reg_in_bf16=True), 2e-2),   # bf16-reg fast path
    ]
    for cfg_key, (B, A, C), kwargs, tol in cases:
        inputs = _make_inputs(cfg_key, B, A, C, reg_max)
        loss_iou, loss_dfl = dfl_loss(*inputs, reg_max=reg_max, use_dfl=True, **kwargs)
        ref_iou, ref_dfl = _dfl_loss_reference(*inputs, reg_max=reg_max, use_dfl=True)
        jax.block_until_ready((loss_iou, loss_dfl, ref_iou, ref_dfl))
        assert jnp.isfinite(loss_iou) and jnp.isfinite(loss_dfl)
        assert jnp.allclose(loss_iou, ref_iou, rtol=tol, atol=tol), (kwargs, loss_iou, ref_iou)
        assert jnp.allclose(loss_dfl, ref_dfl, rtol=tol, atol=tol), (kwargs, loss_dfl, ref_dfl)

    print("KERNEL_OK")
</pallas_src>

<mosaic_0001>
module attributes {stable_mosaic.version = 11 : i64} {
  func.func @_dfl_loss_kernel(%arg0: i32, %arg1: i32, %arg2: memref<11x16x128xf32, #tpu.memory_space<vmem>>, %arg3: memref<4x17x16x128xf32, #tpu.memory_space<vmem>>, %arg4: memref<1x1x1xf32, #tpu.memory_space<vmem>>, %arg5: memref<1x1x1xf32, #tpu.memory_space<vmem>>, %arg6: memref<16x128xf32, #tpu.memory_space<vmem>>, %arg7: memref<16x128xf32, #tpu.memory_space<vmem>>) attributes {dimension_semantics = [#tpu.dimension_semantics<parallel>, #tpu.dimension_semantics<arbitrary>], iteration_bounds = array<i64: 1, 1>, scalar_prefetch = 0 : i64, scratch_operands = 2 : i64, tpu.core_type = #tpu.core_type<tc>, window_params = [{transform_indices = @transform_0, window_bounds = array<i64: 11, 16, 128>}, {transform_indices = @transform_1, window_bounds = array<i64: 4, 17, 16, 128>}, {transform_indices = @transform_2, window_bounds = array<i64: 1, 1, 1>}, {transform_indices = @transform_3, window_bounds = array<i64: 1, 1, 1>}]} {
    %c0_i32 = arith.constant 0 : i32
    %0 = arith.cmpi eq, %arg1, %c0_i32 : i32
    %1 = arith.extui %0 : i1 to i32
    %c0_i32_0 = arith.constant 0 : i32
    %2 = arith.cmpi ne, %1, %c0_i32_0 : i32
    scf.if %2 {
      %cst_825 = arith.constant 0.000000e+00 : f32
      %1290 = vector.broadcast %cst_825 : f32 to vector<16x128xf32>
      %c0_826 = arith.constant 0 : index
      %c0_827 = arith.constant 0 : index
      %1291 = vector.load %arg6[%c0_826, %c0_827] : memref<16x128xf32, #tpu.memory_space<vmem>>, vector<16x128xf32>
      tpu.vector_store %arg6[%c0_826, %c0_827], %1290 {strides = array<i32>} : memref<16x128xf32, #tpu.memory_space<vmem>>, vector<16x128xf32>,
      %cst_828 = arith.constant 0.000000e+00 : f32
      %1292 = vector.broadcast %cst_828 : f32 to vector<16x128xf32>
      %c0_829 = arith.constant 0 : index
      %c0_830 = arith.constant 0 : index
      %1293 = vector.load %arg7[%c0_829, %c0_830] : memref<16x128xf32, #tpu.memory_space<vmem>>, vector<16x128xf32>
      tpu.vector_store %arg7[%c0_829, %c0_830], %1292 {strides = array<i32>} : memref<16x128xf32, #tpu.memory_space<vmem>>, vector<16x128xf32>,
    } else {
    }
    %c0 = arith.constant 0 : index
    %c0_1 = arith.constant 0 : index
    %c0_2 = arith.constant 0 : index
    %3 = vector.load %arg2[%c0, %c0_1, %c0_2] : memref<11x16x128xf32, #tpu.memory_space<vmem>>, vector<1x16x128xf32>
    %4 = vector.shape_cast %3 : vector<1x16x128xf32> to vector<16x128xf32>
    %c1 = arith.constant 1 : index
    %c0_3 = arith.constant 0 : index
    %c0_4 = arith.constant 0 : index
    %5 = vector.load %arg2[%c1, %c0_3, %c0_4] : memref<11x16x128xf32, #tpu.memory_space<vmem>>, vector<1x16x128xf32>
    %6 = vector.shape_cast %5 : vector<1x16x128xf32> to vector<16x128xf32>
    %c2 = arith.constant 2 : index
    %c0_5 = arith.constant 0 : index
    %c0_6 = arith.constant 0 : index
    %7 = vector.load %arg2[%c2, %c0_5, %c0_6] : memref<11x16x128xf32, #tpu.memory_space<vmem>>, vector<1x16x128xf32>
    %8 = vector.shape_cast %7 : vector<1x16x128xf32> to vector<16x128xf32>
    %c3 = arith.constant 3 : index
    %c0_7 = arith.constant 0 : index
    %c0_8 = arith.constant 0 : index
    %9 = vector.load %arg2[%c3, %c0_7, %c0_8] : memref<11x16x128xf32, #tpu.memory_space<vmem>>, vector<1x16x128xf32>
    %10 = vector.shape_cast %9 : vector<1x16x128xf32> to vector<16x128xf32>
    %c4 = arith.constant 4 : index
    %c0_9 = arith.constant 0 : index
    %c0_10 = arith.constant 0 : index
    %11 = vector.load %arg2[%c4, %c0_9, %c0_10] : memref<11x16x128xf32, #tpu.memory_space<vmem>>, vector<1x16x128xf32>
    %12 = vector.shape_cast %11 : vector<1x16x128xf32> to vector<16x128xf32>
    %c5 = arith.constant 5 : index
    %c0_11 = arith.constant 0 : index
    %c0_12 = arith.constant 0 : index
    %13 = vector.load %arg2[%c5, %c0_11, %c0_12] : memref<11x16x128xf32, #tpu.memory_space<vmem>>, vector<1x16x128xf32>
    %14 = vector.shape_cast %13 : vector<1x16x128xf32> to vector<16x128xf32>
    %c6 = arith.constant 6 : index
    %c0_13 = arith.constant 0 : index
    %c0_14 = arith.constant 0 : index
    %15 = vector.load %arg2[%c6, %c0_13, %c0_14] : memref<11x16x128xf32, #tpu.memory_space<vmem>>, vector<1x16x128xf32>
    %16 = vector.shape_cast %15 : vector<1x16x128xf32> to vector<16x128xf32>
    %c7 = arith.constant 7 : index
    %c0_15 = arith.constant 0 : index
    %c0_16 = arith.constant 0 : index
    %17 = vector.load %arg2[%c7, %c0_15, %c0_16] : memref<11x16x128xf32, #tpu.memory_space<vmem>>, vector<1x16x128xf32>
    %18 = vector.shape_cast %17 : vector<1x16x128xf32> to vector<16x128xf32>
    %c10 = arith.constant 10 : index
    %c0_17 = arith.constant 0 : index
    %c0_18 = arith.constant 0 : index
    %19 = vector.load %arg2[%c10, %c0_17, %c0_18] : memref<11x16x128xf32, #tpu.memory_space<vmem>>, vector<1x16x128xf32>
    %20 = vector.shape_cast %19 : vector<1x16x128xf32> to vector<16x128xf32>
    %21 = arith.minimumf %8, %16 : vector<16x128xf32>
    %22 = arith.maximumf %4, %12 : vector<16x128xf32>
    %23 = arith.subf %21, %22 : vector<16x128xf32>
    %cst = arith.constant 0.000000e+00 : f32
    %24 = vector.broadcast %cst : f32 to vector<16x128xf32>
    %25 = arith.maximumf %23, %24 : vector<16x128xf32>
    %26 = arith.minimumf %10, %18 : vector<16x128xf32>
    %27 = arith.maximumf %6, %14 : vector<16x128xf32>
    %28 = arith.subf %26, %27 : vector<16x128xf32>
    %cst_19 = arith.constant 0.000000e+00 : f32
    %29 = vector.broadcast %cst_19 : f32 to vector<16x128xf32>
    %30 = arith.maximumf %28, %29 : vector<16x128xf32>
    %31 = arith.mulf %25, %30 : vector<16x128xf32>
    %32 = arith.subf %8, %4 : vector<16x128xf32>
    %33 = arith.subf %10, %6 : vector<16x128xf32>
    %34 = arith.mulf %32, %33 : vector<16x128xf32>
    %35 = arith.subf %16, %12 : vector<16x128xf32>
    %36 = arith.subf %18, %14 : vector<16x128xf32>
    %37 = arith.mulf %35, %36 : vector<16x128xf32>
    %38 = arith.addf %34, %37 : vector<16x128xf32>
    %39 = arith.subf %38, %31 : vector<16x128xf32>
    %cst_20 = arith.constant 9.99999971E-10 : f32
    %40 = vector.broadcast %cst_20 : f32 to vector<16x128xf32>
    %41 = arith.addf %39, %40 : vector<16x128xf32>
    %42 = tpu.reciprocal %41 {approx = true} : vector<16x128xf32> -> vector<16x128xf32>
    %43 = arith.mulf %31, %42 : vector<16x128xf32>
    %44 = arith.maximumf %8, %16 : vector<16x128xf32>
    %45 = arith.minimumf %4, %12 : vector<16x128xf32>
    %46 = arith.subf %44, %45 : vector<16x128xf32>
    %47 = arith.maximumf %10, %18 : vector<16x128xf32>
    %48 = arith.minimumf %6, %14 : vector<16x128xf32>
    %49 = arith.subf %47, %48 : vector<16x128xf32>
    %50 = arith.mulf %46, %49 : vector<16x128xf32>
    %cst_21 = arith.constant 9.99999971E-10 : f32
    %51 = vector.broadcast %cst_21 : f32 to vector<16x128xf32>
    %52 = arith.addf %50, %51 : vector<16x128xf32>
    %53 = arith.subf %52, %41 : vector<16x128xf32>
    %54 = tpu.reciprocal %52 {approx = true} : vector<16x128xf32> -> vector<16x128xf32>
    %55 = arith.mulf %53, %54 : vector<16x128xf32>
    %56 = arith.subf %43, %55 : vector<16x128xf32>
    %c0_22 = arith.constant 0 : index
    %c0_23 = arith.constant 0 : index
    %57 = vector.load %arg6[%c0_22, %c0_23] : memref<16x128xf32, #tpu.memory_space<vmem>>, vector<16x128xf32>
    %cst_24 = arith.constant 1.000000e+00 : f32
    %58 = vector.broadcast %cst_24 : f32 to vector<16x128xf32>
    %59 = arith.subf %58, %56 : vector<16x128xf32>
    %60 = arith.mulf %59, %20 : vector<16x128xf32>
    %61 = arith.addf %57, %60 : vector<16x128xf32>
    %c0_25 = arith.constant 0 : index
    %c0_26 = arith.constant 0 : index
    %62 = vector.load %arg6[%c0_25, %c0_26] : memref<16x128xf32, #tpu.memory_space<vmem>>, vector<16x128xf32>
    tpu.vector_store %arg6[%c0_25, %c0_26], %61 {strides = array<i32>} : memref<16x128xf32, #tpu.memory_space<vmem>>, vector<16x128xf32>,
    %c8 = arith.constant 8 : index
    %c0_27 = arith.constant 0 : index
    %c0_28 = arith.constant 0 : index
    %63 = vector.load %arg2[%c8, %c0_27, %c0_28] : memref<11x16x128xf32, #tpu.memory_space<vmem>>, vector<1x16x128xf32>
    %64 = vector.shape_cast %63 : vector<1x16x128xf32> to vector<16x128xf32>
    %c4_29 = arith.constant 4 : index
    %c0_30 = arith.constant 0 : index
    %c0_31 = arith.constant 0 : index
    %65 = vector.load %arg2[%c4_29, %c0_30, %c0_31] : memref<11x16x128xf32, #tpu.memory_space<vmem>>, vector<1x16x128xf32>
    %66 = vector.shape_cast %65 : vector<1x16x128xf32> to vector<16x128xf32>
    %67 = arith.subf %64, %66 : vector<16x128xf32>
    %cst_32 = arith.constant 0.000000e+00 : f32
    %cst_33 = arith.constant 1.599000e+01 : f32
    %68 = vector.broadcast %cst_32 : f32 to vector<16x128xf32>
    %69 = arith.maximumf %68, %67 : vector<16x128xf32>
    %70 = vector.broadcast %cst_33 : f32 to vector<16x128xf32>
    %71 = arith.minimumf %70, %69 : vector<16x128xf32>
    %c0_34 = arith.constant 0 : index
    %c0_35 = arith.constant 0 : index
    %c0_36 = arith.constant 0 : index
    %c0_37 = arith.constant 0 : index
    %72 = vector.load %arg3[%c0_34, %c0_35, %c0_36, %c0_37] : memref<4x17x16x128xf32, #tpu.memory_space<vmem>>, vector<1x1x16x128xf32>
    %73 = vector.shape_cast %72 : vector<1x1x16x128xf32> to vector<16x128xf32>
    %c0_38 = arith.constant 0 : index
    %c1_39 = arith.constant 1 : index
    %c0_40 = arith.constant 0 : index
    %c0_41 = arith.constant 0 : index
    %74 = vector.load %arg3[%c0_38, %c1_39, %c0_40, %c0_41] : memref<4x17x16x128xf32, #tpu.memory_space<vmem>>, vector<1x1x16x128xf32>
    %75 = vector.shape_cast %74 : vector<1x1x16x128xf32> to vector<16x128xf32>
    %76 = arith.maximumf %73, %75 : vector<16x128xf32>
    %c0_42 = arith.constant 0 : index
    %c2_43 = arith.constant 2 : index
    %c0_44 = arith.constant 0 : index
    %c0_45 = arith.constant 0 : index
    %77 = vector.load %arg3[%c0_42, %c2_43, %c0_44, %c0_45] : memref<4x17x16x128xf32, #tpu.memory_space<vmem>>, vector<1x1x16x128xf32>
    %78 = vector.shape_cast %77 : vector<1x1x16x128xf32> to vector<16x128xf32>
    %79 = arith.maximumf %76, %78 : vector<16x128xf32>
    %c0_46 = arith.constant 0 : index
    %c3_47 = arith.constant 3 : index
    %c0_48 = arith.constant 0 : index
    %c0_49 = arith.constant 0 : index
    %80 = vector.load %arg3[%c0_46, %c3_47, %c0_48, %c0_49] : memref<4x17x16x128xf32, #tpu.memory_space<vmem>>, vector<1x1x16x128xf32>
    %81 = vector.shape_cast %80 : vector<1x1x16x128xf32> to vector<16x128xf32>
    %82 = arith.maximumf %79, %81 : vector<16x128xf32>
    %c0_50 = arith.constant 0 : index
    %c4_51 = arith.constant 4 : index
    %c0_52 = arith.constant 0 : index
    %c0_53 = arith.constant 0 : index
    %83 = vector.load %arg3[%c0_50, %c4_51, %c0_52, %c0_53] : memref<4x17x16x128xf32, #tpu.memory_space<vmem>>, vector<1x1x16x128xf32>
    %84 = vector.shape_cast %83 : vector<1x1x16x128xf32> to vector<16x128xf32>
    %85 = arith.maximumf %82, %84 : vector<16x128xf32>
    %c0_54 = arith.constant 0 : index
    %c5_55 = arith.constant 5 : index
    %c0_56 = arith.constant 0 : index
    %c0_57 = arith.constant 0 : index
    %86 = vector.load %arg3[%c0_54, %c5_55, %c0_56, %c0_57] : memref<4x17x16x128xf32, #tpu.memory_space<vmem>>, vector<1x1x16x128xf32>
    %87 = vector.shape_cast %86 : vector<1x1x16x128xf32> to vector<16x128xf32>
    %88 = arith.maximumf %85, %87 : vector<16x128xf32>
    %c0_58 = arith.constant 0 : index
    %c6_59 = arith.constant 6 : index
    %c0_60 = arith.constant 0 : index
    %c0_61 = arith.constant 0 : index
    %89 = vector.load %arg3[%c0_58, %c6_59, %c0_60, %c0_61] : memref<4x17x16x128xf32, #tpu.memory_space<vmem>>, vector<1x1x16x128xf32>
    %90 = vector.shape_cast %89 : vector<1x1x16x128xf32> to vector<16x128xf32>
    %91 = arith.maximumf %88, %90 : vector<16x128xf32>
    %c0_62 = arith.constant 0 : index
    %c7_63 = arith.constant 7 : index
    %c0_64 = arith.constant 0 : index
    %c0_65 = arith.constant 0 : index
    %92 = vector.load %arg3[%c0_62, %c7_63, %c0_64, %c0_65] : memref<4x17x16x128xf32, #tpu.memory_space<vmem>>, vector<1x1x16x128xf32>
    %93 = vector.shape_cast %92 : vector<1x1x16x128xf32> to vector<16x128xf32>
    %94 = arith.maximumf %91, %93 : vector<16x128xf32>
    %c0_66 = arith.constant 0 : index
    %c8_67 = arith.constant 8 : index
    %c0_68 = arith.constant 0 : index
    %c0_69 = arith.constant 0 : index
    %95 = vector.load %arg3[%c0_66, %c8_67, %c0_68, %c0_69] : memref<4x17x16x128xf32, #tpu.memory_space<vmem>>, vector<1x1x16x128xf32>
    %96 = vector.shape_cast %95 : vector<1x1x16x128xf32> to vector<16x128xf32>
    %97 = arith.maximumf %94, %96 : vector<16x128xf32>
    %c0_70 = arith.constant 0 : index
    %c9 = arith.constant 9 : index
    %c0_71 = arith.constant 0 : index
    %c0_72 = arith.constant 0 : index
    %98 = vector.load %arg3[%c0_70, %c9, %c0_71, %c0_72] : memref<4x17x16x128xf32, #tpu.memory_space<vmem>>, vector<1x1x16x128xf32>
    %99 = vector.shape_cast %98 : vector<1x1x16x128xf32> to vector<16x128xf32>
    %100 = arith.maximumf %97, %99 : vector<16x128xf32>
    %c0_73 = arith.constant 0 : index
    %c10_74 = arith.constant 10 : index
    %c0_75 = arith.constant 0 : index
    %c0_76 = arith.constant 0 : index
    %101 = vector.load %arg3[%c0_73, %c10_74, %c0_75, %c0_76] : memref<4x17x16x128xf32, #tpu.memory_space<vmem>>, vector<1x1x16x128xf32>
    %102 = vector.shape_cast %101 : vector<1x1x16x128xf32> to vector<16x128xf32>
    %103 = arith.maximumf %100, %102 : vector<16x128xf32>
    %c0_77 = arith.constant 0 : index
    %c11 = arith.constant 11 : index
    %c0_78 = arith.constant 0 : index
    %c0_79 = arith.constant 0 : index
    %104 = vector.load %arg3[%c0_77, %c11, %c0_78, %c0_79] : memref<4x17x16x128xf32, #tpu.memory_space<vmem>>, vector<1x1x16x128xf32>
    %105 = vector.shape_cast %104 : vector<1x1x16x128xf32> to vector<16x128xf32>
    %106 = arith.maximumf %103, %105 : vector<16x128xf32>
    %c0_80 = arith.constant 0 : index
    %c12 = arith.constant 12 : index
    %c0_81 = arith.constant 0 : index
    %c0_82 = arith.constant 0 : index
    %107 = vector.load %arg3[%c0_80, %c12, %c0_81, %c0_82] : memref<4x17x16x128xf32, #tpu.memory_space<vmem>>, vector<1x1x16x128xf32>
    %108 = vector.shape_cast %107 : vector<1x1x16x128xf32> to vector<16x128xf32>
    %109 = arith.maximumf %106, %108 : vector<16x128xf32>
    %c0_83 = arith.constant 0 : index
    %c13 = arith.constant 13 : index
    %c0_84 = arith.constant 0 : index
    %c0_85 = arith.constant 0 : index
    %110 = vector.load %arg3[%c0_83, %c13, %c0_84, %c0_85] : memref<4x17x16x128xf32, #tpu.memory_space<vmem>>, vector<1x1x16x128xf32>
    %111 = vector.shape_cast %110 : vector<1x1x16x128xf32> to vector<16x128xf32>
    %112 = arith.maximumf %109, %111 : vector<16x128xf32>
    %c0_86 = arith.constant 0 : index
    %c14 = arith.constant 14 : index
    %c0_87 = arith.constant 0 : index
    %c0_88 = arith.constant 0 : index
    %113 = vector.load %arg3[%c0_86, %c14, %c0_87, %c0_88] : memref<4x17x16x128xf32, #tpu.memory_space<vmem>>, vector<1x1x16x128xf32>
    %114 = vector.shape_cast %113 : vector<1x1x16x128xf32> to vector<16x128xf32>
    %115 = arith.maximumf %112, %114 : vector<16x128xf32>
    %c0_89 = arith.constant 0 : index
    %c15 = arith.constant 15 : index
    %c0_90 = arith.constant 0 : index
    %c0_91 = arith.constant 0 : index
    %116 = vector.load %arg3[%c0_89, %c15, %c0_90, %c0_91] : memref<4x17x16x128xf32, #tpu.memory_space<vmem>>, vector<1x1x16x128xf32>
    %117 = vector.shape_cast %116 : vector<1x1x16x128xf32> to vector<16x128xf32>
    %118 = arith.maximumf %115, %117 : vector<16x128xf32>
    %c0_92 = arith.constant 0 : index
    %c16 = arith.constant 16 : index
    %c0_93 = arith.constant 0 : index
    %c0_94 = arith.constant 0 : index
    %119 = vector.load %arg3[%c0_92, %c16, %c0_93, %c0_94] : memref<4x17x16x128xf32, #tpu.memory_space<vmem>>, vector<1x1x16x128xf32>
    %120 = vector.shape_cast %119 : vector<1x1x16x128xf32> to vector<16x128xf32>
    %121 = arith.maximumf %118, %120 : vector<16x128xf32>
    %cst_95 = arith.constant 0.000000e+00 : f32
    %122 = vector.broadcast %cst_95 : f32 to vector<16x128xf32>
    %cst_96 = arith.constant 0.000000e+00 : f32
    %123 = vector.broadcast %cst_96 : f32 to vector<16x128xf32>
    %c0_97 = arith.constant 0 : index
    %c0_98 = arith.constant 0 : index
    %c0_99 = arith.constant 0 : index
    %c0_100 = arith.constant 0 : index
    %124 = vector.load %arg3[%c0_97, %c0_98, %c0_99, %c0_100] : memref<4x17x16x128xf32, #tpu.memory_space<vmem>>, vector<1x1x16x128xf32>
    %125 = vector.shape_cast %124 : vector<1x1x16x128xf32> to vector<16x128xf32>
    %126 = arith.subf %125, %121 : vector<16x128xf32>
    %127 = math.exp %126 : vector<16x128xf32>
    %128 = arith.addf %122, %127 : vector<16x128xf32>
    %cst_101 = arith.constant 0.000000e+00 : f32
    %129 = vector.broadcast %cst_101 : f32 to vector<16x128xf32>
    %130 = arith.subf %71, %129 : vector<16x128xf32>
    %131 = math.absf %130 : vector<16x128xf32>
    %cst_102 = arith.constant 1.000000e+00 : f32
    %132 = vector.broadcast %cst_102 : f32 to vector<16x128xf32>
    %133 = arith.subf %132, %131 : vector<16x128xf32>
    %cst_103 = arith.constant 0.000000e+00 : f32
    %134 = vector.broadcast %cst_103 : f32 to vector<16x128xf32>
    %135 = arith.maximumf %133, %134 : vector<16x128xf32>
    %136 = arith.mulf %135, %125 : vector<16x128xf32>
    %137 = arith.addf %123, %136 : vector<16x128xf32>
    %c0_104 = arith.constant 0 : index
    %c1_105 = arith.constant 1 : index
    %c0_106 = arith.constant 0 : index
    %c0_107 = arith.constant 0 : index
    %138 = vector.load %arg3[%c0_104, %c1_105, %c0_106, %c0_107] : memref<4x17x16x128xf32, #tpu.memory_space<vmem>>, vector<1x1x16x128xf32>
    %139 = vector.shape_cast %138 : vector<1x1x16x128xf32> to vector<16x128xf32>
    %140 = arith.subf %139, %121 : vector<16x128xf32>
    %141 = math.exp %140 : vector<16x128xf32>
    %142 = arith.addf %128, %141 : vector<16x128xf32>
    %cst_108 = arith.constant 1.000000e+00 : f32
    %143 = vector.broadcast %cst_108 : f32 to vector<16x128xf32>
    %144 = arith.subf %71, %143 : vector<16x128xf32>
    %145 = math.absf %144 : vector<16x128xf32>
    %cst_109 = arith.constant 1.000000e+00 : f32
    %146 = vector.broadcast %cst_109 : f32 to vector<16x128xf32>
    %147 = arith.subf %146, %145 : vector<16x128xf32>
    %cst_110 = arith.constant 0.000000e+00 : f32
    %148 = vector.broadcast %cst_110 : f32 to vector<16x128xf32>
    %149 = arith.maximumf %147, %148 : vector<16x128xf32>
    %150 = arith.mulf %149, %139 : vector<16x128xf32>
    %151 = arith.addf %137, %150 : vector<16x128xf32>
    %c0_111 = arith.constant 0 : index
    %c2_112 = arith.constant 2 : index
    %c0_113 = arith.constant 0 : index
    %c0_114 = arith.constant 0 : index
    %152 = vector.load %arg3[%c0_111, %c2_112, %c0_113, %c0_114] : memref<4x17x16x128xf32, #tpu.memory_space<vmem>>, vector<1x1x16x128xf32>
    %153 = vector.shape_cast %152 : vector<1x1x16x128xf32> to vector<16x128xf32>
    %154 = arith.subf %153, %121 : vector<16x128xf32>
    %155 = math.exp %154 : vector<16x128xf32>
    %156 = arith.addf %142, %155 : vector<16x128xf32>
    %cst_115 = arith.constant 2.000000e+00 : f32
    %157 = vector.broadcast %cst_115 : f32 to vector<16x128xf32>
    %158 = arith.subf %71, %157 : vector<16x128xf32>
    %159 = math.absf %158 : vector<16x128xf32>
    %cst_116 = arith.constant 1.000000e+00 : f32
    %160 = vector.broadcast %cst_116 : f32 to vector<16x128xf32>
    %161 = arith.subf %160, %159 : vector<16x128xf32>
    %cst_117 = arith.constant 0.000000e+00 : f32
    %162 = vector.broadcast %cst_117 : f32 to vector<16x128xf32>
    %163 = arith.maximumf %161, %162 : vector<16x128xf32>
    %164 = arith.mulf %163, %153 : vector<16x128xf32>
    %165 = arith.addf %151, %164 : vector<16x128xf32>
    %c0_118 = arith.constant 0 : index
    %c3_119 = arith.constant 3 : index
    %c0_120 = arith.constant 0 : index
    %c0_121 = arith.constant 0 : index
    %166 = vector.load %arg3[%c0_118, %c3_119, %c0_120, %c0_121] : memref<4x17x16x128xf32, #tpu.memory_space<vmem>>, vector<1x1x16x128xf32>
    %167 = vector.shape_cast %166 : vector<1x1x16x128xf32> to vector<16x128xf32>
    %168 = arith.subf %167, %121 : vector<16x128xf32>
    %169 = math.exp %168 : vector<16x128xf32>
    %170 = arith.addf %156, %169 : vector<16x128xf32>
    %cst_122 = arith.constant 3.000000e+00 : f32
    %171 = vector.broadcast %cst_122 : f32 to vector<16x128xf32>
    %172 = arith.subf %71, %171 : vector<16x128xf32>
    %173 = math.absf %172 : vector<16x128xf32>
    %cst_123 = arith.constant 1.000000e+00 : f32
    %174 = vector.broadcast %cst_123 : f32 to vector<16x128xf32>
    %175 = arith.subf %174, %173 : vector<16x128xf32>
    %cst_124 = arith.constant 0.000000e+00 : f32
    %176 = vector.broadcast %cst_124 : f32 to vector<16x128xf32>
    %177 = arith.maximumf %175, %176 : vector<16x128xf32>
    %178 = arith.mulf %177, %167 : vector<16x128xf32>
    %179 = arith.addf %165, %178 : vector<16x128xf32>
    %c0_125 = arith.constant 0 : index
    %c4_126 = arith.constant 4 : index
    %c0_127 = arith.constant 0 : index
    %c0_128 = arith.constant 0 : index
    %180 = vector.load %arg3[%c0_125, %c4_126, %c0_127, %c0_128] : memref<4x17x16x128xf32, #tpu.memory_space<vmem>>, vector<1x1x16x128xf32>
    %181 = vector.shape_cast %180 : vector<1x1x16x128xf32> to vector<16x128xf32>
    %182 = arith.subf %181, %121 : vector<16x128xf32>
    %183 = math.exp %182 : vector<16x128xf32>
    %184 = arith.addf %170, %183 : vector<16x128xf32>
    %cst_129 = arith.constant 4.000000e+00 : f32
    %185 = vector.broadcast %cst_129 : f32 to vector<16x128xf32>
    %186 = arith.subf %71, %185 : vector<16x128xf32>
    %187 = math.absf %186 : vector<16x128xf32>
    %cst_130 = arith.constant 1.000000e+00 : f32
    %188 = vector.broadcast %cst_130 : f32 to vector<16x128xf32>
    %189 = arith.subf %188, %187 : vector<16x128xf32>
    %cst_131 = arith.constant 0.000000e+00 : f32
    %190 = vector.broadcast %cst_131 : f32 to vector<16x128xf32>
    %191 = arith.maximumf %189, %190 : vector<16x128xf32>
    %192 = arith.mulf %191, %181 : vector<16x128xf32>
    %193 = arith.addf %179, %192 : vector<16x128xf32>
    %c0_132 = arith.constant 0 : index
    %c5_133 = arith.constant 5 : index
    %c0_134 = arith.constant 0 : index
    %c0_135 = arith.constant 0 : index
    %194 = vector.load %arg3[%c0_132, %c5_133, %c0_134, %c0_135] : memref<4x17x16x128xf32, #tpu.memory_space<vmem>>, vector<1x1x16x128xf32>
    %195 = vector.shape_cast %194 : vector<1x1x16x128xf32> to vector<16x128xf32>
    %196 = arith.subf %195, %121 : vector<16x128xf32>
    %197 = math.exp %196 : vector<16x128xf32>
    %198 = arith.addf %184, %197 : vector<16x128xf32>
    %cst_136 = arith.constant 5.000000e+00 : f32
    %199 = vector.broadcast %cst_136 : f32 to vector<16x128xf32>
    %200 = arith.subf %71, %199 : vector<16x128xf32>
    %201 = math.absf %200 : vector<16x128xf32>
    %cst_137 = arith.constant 1.000000e+00 : f32
    %202 = vector.broadcast %cst_137 : f32 to vector<16x128xf32>
    %203 = arith.subf %202, %201 : vector<16x128xf32>
    %cst_138 = arith.constant 0.000000e+00 : f32
    %204 = vector.broadcast %cst_138 : f32 to vector<16x128xf32>
    %205 = arith.maximumf %203, %204 : vector<16x128xf32>
    %206 = arith.mulf %205, %195 : vector<16x128xf32>
    %207 = arith.addf %193, %206 : vector<16x128xf32>
    %c0_139 = arith.constant 0 : index
    %c6_140 = arith.constant 6 : index
    %c0_141 = arith.constant 0 : index
    %c0_142 = arith.constant 0 : index
    %208 = vector.load %arg3[%c0_139, %c6_140, %c0_141, %c0_142] : memref<4x17x16x128xf32, #tpu.memory_space<vmem>>, vector<1x1x16x128xf32>
    %209 = vector.shape_cast %208 : vector<1x1x16x128xf32> to vector<16x128xf32>
    %210 = arith.subf %209, %121 : vector<16x128xf32>
    %211 = math.exp %210 : vector<16x128xf32>
    %212 = arith.addf %198, %211 : vector<16x128xf32>
    %cst_143 = arith.constant 6.000000e+00 : f32
    %213 = vector.broadcast %cst_143 : f32 to vector<16x128xf32>
    %214 = arith.subf %71, %213 : vector<16x128xf32>
    %215 = math.absf %214 : vector<16x128xf32>
    %cst_144 = arith.constant 1.000000e+00 : f32
    %216 = vector.broadcast %cst_144 : f32 to vector<16x128xf32>
    %217 = arith.subf %216, %215 : vector<16x128xf32>
    %cst_145 = arith.constant 0.000000e+00 : f32
    %218 = vector.broadcast %cst_145 : f32 to vector<16x128xf32>
    %219 = arith.maximumf %217, %218 : vector<16x128xf32>
    %220 = arith.mulf %219, %209 : vector<16x128xf32>
    %221 = arith.addf %207, %220 : vector<16x128xf32>
    %c0_146 = arith.constant 0 : index
    %c7_147 = arith.constant 7 : index
    %c0_148 = arith.constant 0 : index
    %c0_149 = arith.constant 0 : index
    %222 = vector.load %arg3[%c0_146, %c7_147, %c0_148, %c0_149] : memref<4x17x16x128xf32, #tpu.memory_space<vmem>>, vector<1x1x16x128xf32>
    %223 = vector.shape_cast %222 : vector<1x1x16x128xf32> to vector<16x128xf32>
    %224 = arith.subf %223, %121 : vector<16x128xf32>
    %225 = math.exp %224 : vector<16x128xf32>
    %226 = arith.addf %212, %225 : vector<16x128xf32>
    %cst_150 = arith.constant 7.000000e+00 : f32
    %227 = vector.broadcast %cst_150 : f32 to vector<16x128xf32>
    %228 = arith.subf %71, %227 : vector<16x128xf32>
    %229 = math.absf %228 : vector<16x128xf32>
    %cst_151 = arith.constant 1.000000e+00 : f32
    %230 = vector.broadcast %cst_151 : f32 to vector<16x128xf32>
    %231 = arith.subf %230, %229 : vector<16x128xf32>
    %cst_152 = arith.constant 0.000000e+00 : f32
    %232 = vector.broadcast %cst_152 : f32 to vector<16x128xf32>
    %233 = arith.maximumf %231, %232 : vector<16x128xf32>
    %234 = arith.mulf %233, %223 : vector<16x128xf32>
    %235 = arith.addf %221, %234 : vector<16x128xf32>
    %c0_153 = arith.constant 0 : index
    %c8_154 = arith.constant 8 : index
    %c0_155 = arith.constant 0 : index
    %c0_156 = arith.constant 0 : index
    %236 = vector.load %arg3[%c0_153, %c8_154, %c0_155, %c0_156] : memref<4x17x16x128xf32, #tpu.memory_space<vmem>>, vector<1x1x16x128xf32>
    %237 = vector.shape_cast %236 : vector<1x1x16x128xf32> to vector<16x128xf32>
    %238 = arith.subf %237, %121 : vector<16x128xf32>
    %239 = math.exp %238 : vector<16x128xf32>
    %240 = arith.addf %226, %239 : vector<16x128xf32>
    %cst_157 = arith.constant 8.000000e+00 : f32
    %241 = vector.broadcast %cst_157 : f32 to vector<16x128xf32>
    %242 = arith.subf %71, %241 : vector<16x128xf32>
    %243 = math.absf %242 : vector<16x128xf32>
    %cst_158 = arith.constant 1.000000e+00 : f32
    %244 = vector.broadcast %cst_158 : f32 to vector<16x128xf32>
    %245 = arith.subf %244, %243 : vector<16x128xf32>
    %cst_159 = arith.constant 0.000000e+00 : f32
    %246 = vector.broadcast %cst_159 : f32 to vector<16x128xf32>
    %247 = arith.maximumf %245, %246 : vector<16x128xf32>
    %248 = arith.mulf %247, %237 : vector<16x128xf32>
    %249 = arith.addf %235, %248 : vector<16x128xf32>
    %c0_160 = arith.constant 0 : index
    %c9_161 = arith.constant 9 : index
    %c0_162 = arith.constant 0 : index
    %c0_163 = arith.constant 0 : index
    %250 = vector.load %arg3[%c0_160, %c9_161, %c0_162, %c0_163] : memref<4x17x16x128xf32, #tpu.memory_space<vmem>>, vector<1x1x16x128xf32>
    %251 = vector.shape_cast %250 : vector<1x1x16x128xf32> to vector<16x128xf32>
    %252 = arith.subf %251, %121 : vector<16x128xf32>
    %253 = math.exp %252 : vector<16x128xf32>
    %254 = arith.addf %240, %253 : vector<16x128xf32>
    %cst_164 = arith.constant 9.000000e+00 : f32
    %255 = vector.broadcast %cst_164 : f32 to vector<16x128xf32>
    %256 = arith.subf %71, %255 : vector<16x128xf32>
    %257 = math.absf %256 : vector<16x128xf32>
    %cst_165 = arith.constant 1.000000e+00 : f32
    %258 = vector.broadcast %cst_165 : f32 to vector<16x128xf32>
    %259 = arith.subf %258, %257 : vector<16x128xf32>
    %cst_166 = arith.constant 0.000000e+00 : f32
    %260 = vector.broadcast %cst_166 : f32 to vector<16x128xf32>
    %261 = arith.maximumf %259, %260 : vector<16x128xf32>
    %262 = arith.mulf %261, %251 : vector<16x128xf32>
    %263 = arith.addf %249, %262 : vector<16x128xf32>
    %c0_167 = arith.constant 0 : index
    %c10_168 = arith.constant 10 : index
    %c0_169 = arith.constant 0 : index
    %c0_170 = arith.constant 0 : index
    %264 = vector.load %arg3[%c0_167, %c10_168, %c0_169, %c0_170] : memref<4x17x16x128xf32, #tpu.memory_space<vmem>>, vector<1x1x16x128xf32>
    %265 = vector.shape_cast %264 : vector<1x1x16x128xf32> to vector<16x128xf32>
    %266 = arith.subf %265, %121 : vector<16x128xf32>
    %267 = math.exp %266 : vector<16x128xf32>
    %268 = arith.addf %254, %267 : vector<16x128xf32>
    %cst_171 = arith.constant 1.000000e+01 : f32
    %269 = vector.broadcast %cst_171 : f32 to vector<16x128xf32>
    %270 = arith.subf %71, %269 : vector<16x128xf32>
    %271 = math.absf %270 : vector<16x128xf32>
    %cst_172 = arith.constant 1.000000e+00 : f32
    %272 = vector.broadcast %cst_172 : f32 to vector<16x128xf32>
    %273 = arith.subf %272, %271 : vector<16x128xf32>
    %cst_173 = arith.constant 0.000000e+00 : f32
    %274 = vector.broadcast %cst_173 : f32 to vector<16x128xf32>
    %275 = arith.maximumf %273, %274 : vector<16x128xf32>
    %276 = arith.mulf %275, %265 : vector<16x128xf32>
    %277 = arith.addf %263, %276 : vector<16x128xf32>
    %c0_174 = arith.constant 0 : index
    %c11_175 = arith.constant 11 : index
    %c0_176 = arith.constant 0 : index
    %c0_177 = arith.constant 0 : index
    %278 = vector.load %arg3[%c0_174, %c11_175, %c0_176, %c0_177] : memref<4x17x16x128xf32, #tpu.memory_space<vmem>>, vector<1x1x16x128xf32>
    %279 = vector.shape_cast %278 : vector<1x1x16x128xf32> to vector<16x128xf32>
    %280 = arith.subf %279, %121 : vector<16x128xf32>
    %281 = math.exp %280 : vector<16x128xf32>
    %282 = arith.addf %268, %281 : vector<16x128xf32>
    %cst_178 = arith.constant 1.100000e+01 : f32
    %283 = vector.broadcast %cst_178 : f32 to vector<16x128xf32>
    %284 = arith.subf %71, %283 : vector<16x128xf32>
    %285 = math.absf %284 : vector<16x128xf32>
    %cst_179 = arith.constant 1.000000e+00 : f32
    %286 = vector.broadcast %cst_179 : f32 to vector<16x128xf32>
    %287 = arith.subf %286, %285 : vector<16x128xf32>
    %cst_180 = arith.constant 0.000000e+00 : f32
    %288 = vector.broadcast %cst_180 : f32 to vector<16x128xf32>
    %289 = arith.maximumf %287, %288 : vector<16x128xf32>
    %290 = arith.mulf %289, %279 : vector<16x128xf32>
    %291 = arith.addf %277, %290 : vector<16x128xf32>
    %c0_181 = arith.constant 0 : index
    %c12_182 = arith.constant 12 : index
    %c0_183 = arith.constant 0 : index
    %c0_184 = arith.constant 0 : index
    %292 = vector.load %arg3[%c0_181, %c12_182, %c0_183, %c0_184] : memref<4x17x16x128xf32, #tpu.memory_space<vmem>>, vector<1x1x16x128xf32>
    %293 = vector.shape_cast %292 : vector<1x1x16x128xf32> to vector<16x128xf32>
    %294 = arith.subf %293, %121 : vector<16x128xf32>
    %295 = math.exp %294 : vector<16x128xf32>
    %296 = arith.addf %282, %295 : vector<16x128xf32>
    %cst_185 = arith.constant 1.200000e+01 : f32
    %297 = vector.broadcast %cst_185 : f32 to vector<16x128xf32>
    %298 = arith.subf %71, %297 : vector<16x128xf32>
    %299 = math.absf %298 : vector<16x128xf32>
    %cst_186 = arith.constant 1.000000e+00 : f32
    %300 = vector.broadcast %cst_186 : f32 to vector<16x128xf32>
    %301 = arith.subf %300, %299 : vector<16x128xf32>
    %cst_187 = arith.constant 0.000000e+00 : f32
    %302 = vector.broadcast %cst_187 : f32 to vector<16x128xf32>
    %303 = arith.maximumf %301, %302 : vector<16x128xf32>
    %304 = arith.mulf %303, %293 : vector<16x128xf32>
    %305 = arith.addf %291, %304 : vector<16x128xf32>
    %c0_188 = arith.constant 0 : index
    %c13_189 = arith.constant 13 : index
    %c0_190 = arith.constant 0 : index
    %c0_191 = arith.constant 0 : index
    %306 = vector.load %arg3[%c0_188, %c13_189, %c0_190, %c0_191] : memref<4x17x16x128xf32, #tpu.memory_space<vmem>>, vector<1x1x16x128xf32>
    %307 = vector.shape_cast %306 : vector<1x1x16x128xf32> to vector<16x128xf32>
    %308 = arith.subf %307, %121 : vector<16x128xf32>
    %309 = math.exp %308 : vector<16x128xf32>
    %310 = arith.addf %296, %309 : vector<16x128xf32>
    %cst_192 = arith.constant 1.300000e+01 : f32
    %311 = vector.broadcast %cst_192 : f32 to vector<16x128xf32>
    %312 = arith.subf %71, %311 : vector<16x128xf32>
    %313 = math.absf %312 : vector<16x128xf32>
    %cst_193 = arith.constant 1.000000e+00 : f32
    %314 = vector.broadcast %cst_193 : f32 to vector<16x128xf32>
    %315 = arith.subf %314, %313 : vector<16x128xf32>
    %cst_194 = arith.constant 0.000000e+00 : f32
    %316 = vector.broadcast %cst_194 : f32 to vector<16x128xf32>
    %317 = arith.maximumf %315, %316 : vector<16x128xf32>
    %318 = arith.mulf %317, %307 : vector<16x128xf32>
    %319 = arith.addf %305, %318 : vector<16x128xf32>
    %c0_195 = arith.constant 0 : index
    %c14_196 = arith.constant 14 : index
    %c0_197 = arith.constant 0 : index
    %c0_198 = arith.constant 0 : index
    %320 = vector.load %arg3[%c0_195, %c14_196, %c0_197, %c0_198] : memref<4x17x16x128xf32, #tpu.memory_space<vmem>>, vector<1x1x16x128xf32>
    %321 = vector.shape_cast %320 : vector<1x1x16x128xf32> to vector<16x128xf32>
    %322 = arith.subf %321, %121 : vector<16x128xf32>
    %323 = math.exp %322 : vector<16x128xf32>
    %324 = arith.addf %310, %323 : vector<16x128xf32>
    %cst_199 = arith.constant 1.400000e+01 : f32
    %325 = vector.broadcast %cst_199 : f32 to vector<16x128xf32>
    %326 = arith.subf %71, %325 : vector<16x128xf32>
    %327 = math.absf %326 : vector<16x128xf32>
    %cst_200 = arith.constant 1.000000e+00 : f32
    %328 = vector.broadcast %cst_200 : f32 to vector<16x128xf32>
    %329 = arith.subf %328, %327 : vector<16x128xf32>
    %cst_201 = arith.constant 0.000000e+00 : f32
    %330 = vector.broadcast %cst_201 : f32 to vector<16x128xf32>
    %331 = arith.maximumf %329, %330 : vector<16x128xf32>
    %332 = arith.mulf %331, %321 : vector<16x128xf32>
    %333 = arith.addf %319, %332 : vector<16x128xf32>
    %c0_202 = arith.constant 0 : index
    %c15_203 = arith.constant 15 : index
    %c0_204 = arith.constant 0 : index
    %c0_205 = arith.constant 0 : index
    %334 = vector.load %arg3[%c0_202, %c15_203, %c0_204, %c0_205] : memref<4x17x16x128xf32, #tpu.memory_space<vmem>>, vector<1x1x16x128xf32>
    %335 = vector.shape_cast %334 : vector<1x1x16x128xf32> to vector<16x128xf32>
    %336 = arith.subf %335, %121 : vector<16x128xf32>
    %337 = math.exp %336 : vector<16x128xf32>
    %338 = arith.addf %324, %337 : vector<16x128xf32>
    %cst_206 = arith.constant 1.500000e+01 : f32
    %339 = vector.broadcast %cst_206 : f32 to vector<16x128xf32>
    %340 = arith.subf %71, %339 : vector<16x128xf32>
    %341 = math.absf %340 : vector<16x128xf32>
    %cst_207 = arith.constant 1.000000e+00 : f32
    %342 = vector.broadcast %cst_207 : f32 to vector<16x128xf32>
    %343 = arith.subf %342, %341 : vector<16x128xf32>
    %cst_208 = arith.constant 0.000000e+00 : f32
    %344 = vector.broadcast %cst_208 : f32 to vector<16x128xf32>
    %345 = arith.maximumf %343, %344 : vector<16x128xf32>
    %346 = arith.mulf %345, %335 : vector<16x128xf32>
    %347 = arith.addf %333, %346 : vector<16x128xf32>
    %c0_209 = arith.constant 0 : index
    %c16_210 = arith.constant 16 : index
    %c0_211 = arith.constant 0 : index
    %c0_212 = arith.constant 0 : index
    %348 = vector.load %arg3[%c0_209, %c16_210, %c0_211, %c0_212] : memref<4x17x16x128xf32, #tpu.memory_space<vmem>>, vector<1x1x16x128xf32>
    %349 = vector.shape_cast %348 : vector<1x1x16x128xf32> to vector<16x128xf32>
    %350 = arith.subf %349, %121 : vector<16x128xf32>
    %351 = math.exp %350 : vector<16x128xf32>
    %352 = arith.addf %338, %351 : vector<16x128xf32>
    %cst_213 = arith.constant 1.600000e+01 : f32
    %353 = vector.broadcast %cst_213 : f32 to vector<16x128xf32>
    %354 = arith.subf %71, %353 : vector<16x128xf32>
    %355 = math.absf %354 : vector<16x128xf32>
    %cst_214 = arith.constant 1.000000e+00 : f32
    %356 = vector.broadcast %cst_214 : f32 to vector<16x128xf32>
    %357 = arith.subf %356, %355 : vector<16x128xf32>
    %cst_215 = arith.constant 0.000000e+00 : f32
    %358 = vector.broadcast %cst_215 : f32 to vector<16x128xf32>
    %359 = arith.maximumf %357, %358 : vector<16x128xf32>
    %360 = arith.mulf %359, %349 : vector<16x128xf32>
    %361 = arith.addf %347, %360 : vector<16x128xf32>
    %c0_216 = arith.constant 0 : index
    %c0_217 = arith.constant 0 : index
    %362 = vector.load %arg7[%c0_216, %c0_217] : memref<16x128xf32, #tpu.memory_space<vmem>>, vector<16x128xf32>
    %363 = math.log %352 : vector<16x128xf32>
    %364 = arith.addf %121, %363 : vector<16x128xf32>
    %365 = arith.subf %364, %361 : vector<16x128xf32>
    %366 = arith.mulf %365, %20 : vector<16x128xf32>
    %367 = arith.addf %362, %366 : vector<16x128xf32>
    %c0_218 = arith.constant 0 : index
    %c0_219 = arith.constant 0 : index
    %368 = vector.load %arg7[%c0_218, %c0_219] : memref<16x128xf32, #tpu.memory_space<vmem>>, vector<16x128xf32>
    tpu.vector_store %arg7[%c0_218, %c0_219], %367 {strides = array<i32>} : memref<16x128xf32, #tpu.memory_space<vmem>>, vector<16x128xf32>,
    %c9_220 = arith.constant 9 : index
    %c0_221 = arith.constant 0 : index
    %c0_222 = arith.constant 0 : index
    %369 = vector.load %arg2[%c9_220, %c0_221, %c0_222] : memref<11x16x128xf32, #tpu.memory_space<vmem>>, vector<1x16x128xf32>
    %370 = vector.shape_cast %369 : vector<1x16x128xf32> to vector<16x128xf32>
    %c5_223 = arith.constant 5 : index
    %c0_224 = arith.constant 0 : index
    %c0_225 = arith.constant 0 : index
    %371 = vector.load %arg2[%c5_223, %c0_224, %c0_225] : memref<11x16x128xf32, #tpu.memory_space<vmem>>, vector<1x16x128xf32>
    %372 = vector.shape_cast %371 : vector<1x16x128xf32> to vector<16x128xf32>
    %373 = arith.subf %370, %372 : vector<16x128xf32>
    %cst_226 = arith.constant 0.000000e+00 : f32
    %cst_227 = arith.constant 1.599000e+01 : f32
    %374 = vector.broadcast %cst_226 : f32 to vector<16x128xf32>
    %375 = arith.maximumf %374, %373 : vector<16x128xf32>
    %376 = vector.broadcast %cst_227 : f32 to vector<16x128xf32>
    %377 = arith.minimumf %376, %375 : vector<16x128xf32>
    %c1_228 = arith.constant 1 : index
    %c0_229 = arith.constant 0 : index
    %c0_230 = arith.constant 0 : index
    %c0_231 = arith.constant 0 : index
    %378 = vector.load %arg3[%c1_228, %c0_229, %c0_230, %c0_231] : memref<4x17x16x128xf32, #tpu.memory_space<vmem>>, vector<1x1x16x128xf32>
    %379 = vector.shape_cast %378 : vector<1x1x16x128xf32> to vector<16x128xf32>
    %c1_232 = arith.constant 1 : index
    %c1_233 = arith.constant 1 : index
    %c0_234 = arith.constant 0 : index
    %c0_235 = arith.constant 0 : index
    %380 = vector.load %arg3[%c1_232, %c1_233, %c0_234, %c0_235] : memref<4x17x16x128xf32, #tpu.memory_space<vmem>>, vector<1x1x16x128xf32>
    %381 = vector.shape_cast %380 : vector<1x1x16x128xf32> to vector<16x128xf32>
    %382 = arith.maximumf %379, %381 : vector<16x128xf32>
    %c1_236 = arith.constant 1 : index
    %c2_237 = arith.constant 2 : index
    %c0_238 = arith.constant 0 : index
    %c0_239 = arith.constant 0 : index
    %383 = vector.load %arg3[%c1_236, %c2_237, %c0_238, %c0_239] : memref<4x17x16x128xf32, #tpu.memory_space<vmem>>, vector<1x1x16x128xf32>
    %384 = vector.shape_cast %383 : vector<1x1x16x128xf32> to vector<16x128xf32>
    %385 = arith.maximumf %382, %384 : vector<16x128xf32>
    %c1_240 = arith.constant 1 : index
    %c3_241 = arith.constant 3 : index
    %c0_242 = arith.constant 0 : index
    %c0_243 = arith.constant 0 : index
    %386 = vector.load %arg3[%c1_240, %c3_241, %c0_242, %c0_243] : memref<4x17x16x128xf32, #tpu.memory_space<vmem>>, vector<1x1x16x128xf32>
    %387 = vector.shape_cast %386 : vector<1x1x16x128xf32> to vector<16x128xf32>
    %388 = arith.maximumf %385, %387 : vector<16x128xf32>
    %c1_244 = arith.constant 1 : index
    %c4_245 = arith.constant 4 : index
    %c0_246 = arith.constant 0 : index
    %c0_247 = arith.constant 0 : index
    %389 = vector.load %arg3[%c1_244, %c4_245, %c0_246, %c0_247] : memref<4x17x16x128xf32, #tpu.memory_space<vmem>>, vector<1x1x16x128xf32>
    %390 = vector.shape_cast %389 : vector<1x1x16x128xf32> to vector<16x128xf32>
    %391 = arith.maximumf %388, %390 : vector<16x128xf32>
    %c1_248 = arith.constant 1 : index
    %c5_249 = arith.constant 5 : index
    %c0_250 = arith.constant 0 : index
    %c0_251 = arith.constant 0 : index
    %392 = vector.load %arg3[%c1_248, %c5_249, %c0_250, %c0_251] : memref<4x17x16x128xf32, #tpu.memory_space<vmem>>, vector<1x1x16x128xf32>
    %393 = vector.shape_cast %392 : vector<1x1x16x128xf32> to vector<16x128xf32>
    %394 = arith.maximumf %391, %393 : vector<16x128xf32>
    %c1_252 = arith.constant 1 : index
    %c6_253 = arith.constant 6 : index
    %c0_254 = arith.constant 0 : index
    %c0_255 = arith.constant 0 : index
    %395 = vector.load %arg3[%c1_252, %c6_253, %c0_254, %c0_255] : memref<4x17x16x128xf32, #tpu.memory_space<vmem>>, vector<1x1x16x128xf32>
    %396 = vector.shape_cast %395 : vector<1x1x16x128xf32> to vector<16x128xf32>
    %397 = arith.maximumf %394, %396 : vector<16x128xf32>
    %c1_256 = arith.constant 1 : index
    %c7_257 = arith.constant 7 : index
    %c0_258 = arith.constant 0 : index
    %c0_259 = arith.constant 0 : index
    %398 = vector.load %arg3[%c1_256, %c7_257, %c0_258, %c0_259] : memref<4x17x16x128xf32, #tpu.memory_space<vmem>>, vector<1x1x16x128xf32>
    %399 = vector.shape_cast %398 : vector<1x1x16x128xf32> to vector<16x128xf32>
    %400 = arith.maximumf %397, %399 : vector<16x128xf32>
    %c1_260 = arith.constant 1 : index
    %c8_261 = arith.constant 8 : index
    %c0_262 = arith.constant 0 : index
    %c0_263 = arith.constant 0 : index
    %401 = vector.load %arg3[%c1_260, %c8_261, %c0_262, %c0_263] : memref<4x17x16x128xf32, #tpu.memory_space<vmem>>, vector<1x1x16x128xf32>
    %402 = vector.shape_cast %401 : vector<1x1x16x128xf32> to vector<16x128xf32>
    %403 = arith.maximumf %400, %402 : vector<16x128xf32>
    %c1_264 = arith.constant 1 : index
    %c9_265 = arith.constant 9 : index
    %c0_266 = arith.constant 0 : index
    %c0_267 = arith.constant 0 : index
    %404 = vector.load %arg3[%c1_264, %c9_265, %c0_266, %c0_267] : memref<4x17x16x128xf32, #tpu.memory_space<vmem>>, vector<1x1x16x128xf32>
    %405 = vector.shape_cast %404 : vector<1x1x16x128xf32> to vector<16x128xf32>
    %406 = arith.maximumf %403, %405 : vector<16x128xf32>
    %c1_268 = arith.constant 1 : index
    %c10_269 = arith.constant 10 : index
    %c0_270 = arith.constant 0 : index
    %c0_271 = arith.constant 0 : index
    %407 = vector.load %arg3[%c1_268, %c10_269, %c0_270, %c0_271] : memref<4x17x16x128xf32, #tpu.memory_space<vmem>>, vector<1x1x16x128xf32>
    %408 = vector.shape_cast %407 : vector<1x1x16x128xf32> to vector<16x128xf32>
    %409 = arith.maximumf %406, %408 : vector<16x128xf32>
    %c1_272 = arith.constant 1 : index
    %c11_273 = arith.constant 11 : index
    %c0_274 = arith.constant 0 : index
    %c0_275 = arith.constant 0 : index
    %410 = vector.load %arg3[%c1_272, %c11_273, %c0_274, %c0_275] : memref<4x17x16x128xf32, #tpu.memory_space<vmem>>, vector<1x1x16x128xf32>
    %411 = vector.shape_cast %410 : vector<1x1x16x128xf32> to vector<16x128xf32>
    %412 = arith.maximumf %409, %411 : vector<16x128xf32>
    %c1_276 = arith.constant 1 : index
    %c12_277 = arith.constant 12 : index
    %c0_278 = arith.constant 0 : index
    %c0_279 = arith.constant 0 : index
    %413 = vector.load %arg3[%c1_276, %c12_277, %c0_278, %c0_279] : memref<4x17x16x128xf32, #tpu.memory_space<vmem>>, vector<1x1x16x128xf32>
    %414 = vector.shape_cast %413 : vector<1x1x16x128xf32> to vector<16x128xf32>
    %415 = arith.maximumf %412, %414 : vector<16x128xf32>
    %c1_280 = arith.constant 1 : index
    %c13_281 = arith.constant 13 : index
    %c0_282 = arith.constant 0 : index
    %c0_283 = arith.constant 0 : index
    %416 = vector.load %arg3[%c1_280, %c13_281, %c0_282, %c0_283] : memref<4x17x16x128xf32, #tpu.memory_space<vmem>>, vector<1x1x16x128xf32>
    %417 = vector.shape_cast %416 : vector<1x1x16x128xf32> to vector<16x128xf32>
    %418 = arith.maximumf %415, %417 : vector<16x128xf32>
    %c1_284 = arith.constant 1 : index
    %c14_285 = arith.constant 14 : index
    %c0_286 = arith.constant 0 : index
    %c0_287 = arith.constant 0 : index
    %419 = vector.load %arg3[%c1_284, %c14_285, %c0_286, %c0_287] : memref<4x17x16x128xf32, #tpu.memory_space<vmem>>, vector<1x1x16x128xf32>
    %420 = vector.shape_cast %419 : vector<1x1x16x128xf32> to vector<16x128xf32>
    %421 = arith.maximumf %418, %420 : vector<16x128xf32>
    %c1_288 = arith.constant 1 : index
    %c15_289 = arith.constant 15 : index
    %c0_290 = arith.constant 0 : index
    %c0_291 = arith.constant 0 : index
    %422 = vector.load %arg3[%c1_288, %c15_289, %c0_290, %c0_291] : memref<4x17x16x128xf32, #tpu.memory_space<vmem>>, vector<1x1x16x128xf32>
    %423 = vector.shape_cast %422 : vector<1x1x16x128xf32> to vector<16x128xf32>
    %424 = arith.maximumf %421, %423 : vector<16x128xf32>
    %c1_292 = arith.constant 1 : index
    %c16_293 = arith.constant 16 : index
    %c0_294 = arith.constant 0 : index
    %c0_295 = arith.constant 0 : index
    %425 = vector.load %arg3[%c1_292, %c16_293, %c0_294, %c0_295] : memref<4x17x16x128xf32, #tpu.memory_space<vmem>>, vector<1x1x16x128xf32>
    %426 = vector.shape_cast %425 : vector<1x1x16x128xf32> to vector<16x128xf32>
    %427 = arith.maximumf %424, %426 : vector<16x128xf32>
    %cst_296 = arith.constant 0.000000e+00 : f32
    %428 = vector.broadcast %cst_296 : f32 to vector<16x128xf32>
    %cst_297 = arith.constant 0.000000e+00 : f32
    %429 = vector.broadcast %cst_297 : f32 to vector<16x128xf32>
    %c1_298 = arith.constant 1 : index
    %c0_299 = arith.constant 0 : index
    %c0_300 = arith.constant 0 : index
    %c0_301 = arith.constant 0 : index
    %430 = vector.load %arg3[%c1_298, %c0_299, %c0_300, %c0_301] : memref<4x17x16x128xf32, #tpu.memory_space<vmem>>, vector<1x1x16x128xf32>
    %431 = vector.shape_cast %430 : vector<1x1x16x128xf32> to vector<16x128xf32>
    %432 = arith.subf %431, %427 : vector<16x128xf32>
    %433 = math.exp %432 : vector<16x128xf32>
    %434 = arith.addf %428, %433 : vector<16x128xf32>
    %cst_302 = arith.constant 0.000000e+00 : f32
    %435 = vector.broadcast %cst_302 : f32 to vector<16x128xf32>
    %436 = arith.subf %377, %435 : vector<16x128xf32>
    %437 = math.absf %436 : vector<16x128xf32>
    %cst_303 = arith.constant 1.000000e+00 : f32
    %438 = vector.broadcast %cst_303 : f32 to vector<16x128xf32>
    %439 = arith.subf %438, %437 : vector<16x128xf32>
    %cst_304 = arith.constant 0.000000e+00 : f32
    %440 = vector.broadcast %cst_304 : f32 to vector<16x128xf32>
    %441 = arith.maximumf %439, %440 : vector<16x128xf32>
    %442 = arith.mulf %441, %431 : vector<16x128xf32>
    %443 = arith.addf %429, %442 : vector<16x128xf32>
    %c1_305 = arith.constant 1 : index
    %c1_306 = arith.constant 1 : index
    %c0_307 = arith.constant 0 : index
    %c0_308 = arith.constant 0 : index
    %444 = vector.load %arg3[%c1_305, %c1_306, %c0_307, %c0_308] : memref<4x17x16x128xf32, #tpu.memory_space<vmem>>, vector<1x1x16x128xf32>
    %445 = vector.shape_cast %444 : vector<1x1x16x128xf32> to vector<16x128xf32>
    %446 = arith.subf %445, %427 : vector<16x128xf32>
    %447 = math.exp %446 : vector<16x128xf32>
    %448 = arith.addf %434, %447 : vector<16x128xf32>
    %cst_309 = arith.constant 1.000000e+00 : f32
    %449 = vector.broadcast %cst_309 : f32 to vector<16x128xf32>
    %450 = arith.subf %377, %449 : vector<16x128xf32>
    %451 = math.absf %450 : vector<16x128xf32>
    %cst_310 = arith.constant 1.000000e+00 : f32
    %452 = vector.broadcast %cst_310 : f32 to vector<16x128xf32>
    %453 = arith.subf %452, %451 : vector<16x128xf32>
    %cst_311 = arith.constant 0.000000e+00 : f32
    %454 = vector.broadcast %cst_311 : f32 to vector<16x128xf32>
    %455 = arith.maximumf %453, %454 : vector<16x128xf32>
    %456 = arith.mulf %455, %445 : vector<16x128xf32>
    %457 = arith.addf %443, %456 : vector<16x128xf32>
    %c1_312 = arith.constant 1 : index
    %c2_313 = arith.constant 2 : index
    %c0_314 = arith.constant 0 : index
    %c0_315 = arith.constant 0 : index
    %458 = vector.load %arg3[%c1_312, %c2_313, %c0_314, %c0_315] : memref<4x17x16x128xf32, #tpu.memory_space<vmem>>, vector<1x1x16x128xf32>
    %459 = vector.shape_cast %458 : vector<1x1x16x128xf32> to vector<16x128xf32>
    %460 = arith.subf %459, %427 : vector<16x128xf32>
    %461 = math.exp %460 : vector<16x128xf32>
    %462 = arith.addf %448, %461 : vector<16x128xf32>
    %cst_316 = arith.constant 2.000000e+00 : f32
    %463 = vector.broadcast %cst_316 : f32 to vector<16x128xf32>
    %464 = arith.subf %377, %463 : vector<16x128xf32>
    %465 = math.absf %464 : vector<16x128xf32>
    %cst_317 = arith.constant 1.000000e+00 : f32
    %466 = vector.broadcast %cst_317 : f32 to vector<16x128xf32>
    %467 = arith.subf %466, %465 : vector<16x128xf32>
    %cst_318 = arith.constant 0.000000e+00 : f32
    %468 = vector.broadcast %cst_318 : f32 to vector<16x128xf32>
    %469 = arith.maximumf %467, %468 : vector<16x128xf32>
    %470 = arith.mulf %469, %459 : vector<16x128xf32>
    %471 = arith.addf %457, %470 : vector<16x128xf32>
    %c1_319 = arith.constant 1 : index
    %c3_320 = arith.constant 3 : index
    %c0_321 = arith.constant 0 : index
    %c0_322 = arith.constant 0 : index
    %472 = vector.load %arg3[%c1_319, %c3_320, %c0_321, %c0_322] : memref<4x17x16x128xf32, #tpu.memory_space<vmem>>, vector<1x1x16x128xf32>
    %473 = vector.shape_cast %472 : vector<1x1x16x128xf32> to vector<16x128xf32>
    %474 = arith.subf %473, %427 : vector<16x128xf32>
    %475 = math.exp %474 : vector<16x128xf32>
    %476 = arith.addf %462, %475 : vector<16x128xf32>
    %cst_323 = arith.constant 3.000000e+00 : f32
    %477 = vector.broadcast %cst_323 : f32 to vector<16x128xf32>
    %478 = arith.subf %377, %477 : vector<16x128xf32>
    %479 = math.absf %478 : vector<16x128xf32>
    %cst_324 = arith.constant 1.000000e+00 : f32
    %480 = vector.broadcast %cst_324 : f32 to vector<16x128xf32>
    %481 = arith.subf %480, %479 : vector<16x128xf32>
    %cst_325 = arith.constant 0.000000e+00 : f32
    %482 = vector.broadcast %cst_325 : f32 to vector<16x128xf32>
    %483 = arith.maximumf %481, %482 : vector<16x128xf32>
    %484 = arith.mulf %483, %473 : vector<16x128xf32>
    %485 = arith.addf %471, %484 : vector<16x128xf32>
    %c1_326 = arith.constant 1 : index
    %c4_327 = arith.constant 4 : index
    %c0_328 = arith.constant 0 : index
    %c0_329 = arith.constant 0 : index
    %486 = vector.load %arg3[%c1_326, %c4_327, %c0_328, %c0_329] : memref<4x17x16x128xf32, #tpu.memory_space<vmem>>, vector<1x1x16x128xf32>
    %487 = vector.shape_cast %486 : vector<1x1x16x128xf32> to vector<16x128xf32>
    %488 = arith.subf %487, %427 : vector<16x128xf32>
    %489 = math.exp %488 : vector<16x128xf32>
    %490 = arith.addf %476, %489 : vector<16x128xf32>
    %cst_330 = arith.constant 4.000000e+00 : f32
    %491 = vector.broadcast %cst_330 : f32 to vector<16x128xf32>
    %492 = arith.subf %377, %491 : vector<16x128xf32>
    %493 = math.absf %492 : vector<16x128xf32>
    %cst_331 = arith.constant 1.000000e+00 : f32
    %494 = vector.broadcast %cst_331 : f32 to vector<16x128xf32>
    %495 = arith.subf %494, %493 : vector<16x128xf32>
    %cst_332 = arith.constant 0.000000e+00 : f32
    %496 = vector.broadcast %cst_332 : f32 to vector<16x128xf32>
    %497 = arith.maximumf %495, %496 : vector<16x128xf32>
    %498 = arith.mulf %497, %487 : vector<16x128xf32>
    %499 = arith.addf %485, %498 : vector<16x128xf32>
    %c1_333 = arith.constant 1 : index
    %c5_334 = arith.constant 5 : index
    %c0_335 = arith.constant 0 : index
    %c0_336 = arith.constant 0 : index
    %500 = vector.load %arg3[%c1_333, %c5_334, %c0_335, %c0_336] : memref<4x17x16x128xf32, #tpu.memory_space<vmem>>, vector<1x1x16x128xf32>
    %501 = vector.shape_cast %500 : vector<1x1x16x128xf32> to vector<16x128xf32>
    %502 = arith.subf %501, %427 : vector<16x128xf32>
    %503 = math.exp %502 : vector<16x128xf32>
    %504 = arith.addf %490, %503 : vector<16x128xf32>
    %cst_337 = arith.constant 5.000000e+00 : f32
    %505 = vector.broadcast %cst_337 : f32 to vector<16x128xf32>
    %506 = arith.subf %377, %505 : vector<16x128xf32>
    %507 = math.absf %506 : vector<16x128xf32>
    %cst_338 = arith.constant 1.000000e+00 : f32
    %508 = vector.broadcast %cst_338 : f32 to vector<16x128xf32>
    %509 = arith.subf %508, %507 : vector<16x128xf32>
    %cst_339 = arith.constant 0.000000e+00 : f32
    %510 = vector.broadcast %cst_339 : f32 to vector<16x128xf32>
    %511 = arith.maximumf %509, %510 : vector<16x128xf32>
    %512 = arith.mulf %511, %501 : vector<16x128xf32>
    %513 = arith.addf %499, %512 : vector<16x128xf32>
    %c1_340 = arith.constant 1 : index
    %c6_341 = arith.constant 6 : index
    %c0_342 = arith.constant 0 : index
    %c0_343 = arith.constant 0 : index
    %514 = vector.load %arg3[%c1_340, %c6_341, %c0_342, %c0_343] : memref<4x17x16x128xf32, #tpu.memory_space<vmem>>, vector<1x1x16x128xf32>
    %515 = vector.shape_cast %514 : vector<1x1x16x128xf32> to vector<16x128xf32>
    %516 = arith.subf %515, %427 : vector<16x128xf32>
    %517 = math.exp %516 : vector<16x128xf32>
    %518 = arith.addf %504, %517 : vector<16x128xf32>
    %cst_344 = arith.constant 6.000000e+00 : f32
    %519 = vector.broadcast %cst_344 : f32 to vector<16x128xf32>
    %520 = arith.subf %377, %519 : vector<16x128xf32>
    %521 = math.absf %520 : vector<16x128xf32>
    %cst_345 = arith.constant 1.000000e+00 : f32
    %522 = vector.broadcast %cst_345 : f32 to vector<16x128xf32>
    %523 = arith.subf %522, %521 : vector<16x128xf32>
    %cst_346 = arith.constant 0.000000e+00 : f32
    %524 = vector.broadcast %cst_346 : f32 to vector<16x128xf32>
    %525 = arith.maximumf %523, %524 : vector<16x128xf32>
    %526 = arith.mulf %525, %515 : vector<16x128xf32>
    %527 = arith.addf %513, %526 : vector<16x128xf32>
    %c1_347 = arith.constant 1 : index
    %c7_348 = arith.constant 7 : index
    %c0_349 = arith.constant 0 : index
    %c0_350 = arith.constant 0 : index
    %528 = vector.load %arg3[%c1_347, %c7_348, %c0_349, %c0_350] : memref<4x17x16x128xf32, #tpu.memory_space<vmem>>, vector<1x1x16x128xf32>
    %529 = vector.shape_cast %528 : vector<1x1x16x128xf32> to vector<16x128xf32>
    %530 = arith.subf %529, %427 : vector<16x128xf32>
    %531 = math.exp %530 : vector<16x128xf32>
    %532 = arith.addf %518, %531 : vector<16x128xf32>
    %cst_351 = arith.constant 7.000000e+00 : f32
    %533 = vector.broadcast %cst_351 : f32 to vector<16x128xf32>
    %534 = arith.subf %377, %533 : vector<16x128xf32>
    %535 = math.absf %534 : vector<16x128xf32>
    %cst_352 = arith.constant 1.000000e+00 : f32
    %536 = vector.broadcast %cst_352 : f32 to vector<16x128xf32>
    %537 = arith.subf %536, %535 : vector<16x128xf32>
    %cst_353 = arith.constant 0.000000e+00 : f32
    %538 = vector.broadcast %cst_353 : f32 to vector<16x128xf32>
    %539 = arith.maximumf %537, %538 : vector<16x128xf32>
    %540 = arith.mulf %539, %529 : vector<16x128xf32>
    %541 = arith.addf %527, %540 : vector<16x128xf32>
    %c1_354 = arith.constant 1 : index
    %c8_355 = arith.constant 8 : index
    %c0_356 = arith.constant 0 : index
    %c0_357 = arith.constant 0 : index
    %542 = vector.load %arg3[%c1_354, %c8_355, %c0_356, %c0_357] : memref<4x17x16x128xf32, #tpu.memory_space<vmem>>, vector<1x1x16x128xf32>
    %543 = vector.shape_cast %542 : vector<1x1x16x128xf32> to vector<16x128xf32>
    %544 = arith.subf %543, %427 : vector<16x128xf32>
    %545 = math.exp %544 : vector<16x128xf32>
    %546 = arith.addf %532, %545 : vector<16x128xf32>
    %cst_358 = arith.constant 8.000000e+00 : f32
    %547 = vector.broadcast %cst_358 : f32 to vector<16x128xf32>
    %548 = arith.subf %377, %547 : vector<16x128xf32>
    %549 = math.absf %548 : vector<16x128xf32>
    %cst_359 = arith.constant 1.000000e+00 : f32
    %550 = vector.broadcast %cst_359 : f32 to vector<16x128xf32>
    %551 = arith.subf %550, %549 : vector<16x128xf32>
    %cst_360 = arith.constant 0.000000e+00 : f32
    %552 = vector.broadcast %cst_360 : f32 to vector<16x128xf32>
    %553 = arith.maximumf %551, %552 : vector<16x128xf32>
    %554 = arith.mulf %553, %543 : vector<16x128xf32>
    %555 = arith.addf %541, %554 : vector<16x128xf32>
    %c1_361 = arith.constant 1 : index
    %c9_362 = arith.constant 9 : index
    %c0_363 = arith.constant 0 : index
    %c0_364 = arith.constant 0 : index
    %556 = vector.load %arg3[%c1_361, %c9_362, %c0_363, %c0_364] : memref<4x17x16x128xf32, #tpu.memory_space<vmem>>, vector<1x1x16x128xf32>
    %557 = vector.shape_cast %556 : vector<1x1x16x128xf32> to vector<16x128xf32>
    %558 = arith.subf %557, %427 : vector<16x128xf32>
    %559 = math.exp %558 : vector<16x128xf32>
    %560 = arith.addf %546, %559 : vector<16x128xf32>
    %cst_365 = arith.constant 9.000000e+00 : f32
    %561 = vector.broadcast %cst_365 : f32 to vector<16x128xf32>
    %562 = arith.subf %377, %561 : vector<16x128xf32>
    %563 = math.absf %562 : vector<16x128xf32>
    %cst_366 = arith.constant 1.000000e+00 : f32
    %564 = vector.broadcast %cst_366 : f32 to vector<16x128xf32>
    %565 = arith.subf %564, %563 : vector<16x128xf32>
    %cst_367 = arith.constant 0.000000e+00 : f32
    %566 = vector.broadcast %cst_367 : f32 to vector<16x128xf32>
    %567 = arith.maximumf %565, %566 : vector<16x128xf32>
    %568 = arith.mulf %567, %557 : vector<16x128xf32>
    %569 = arith.addf %555, %568 : vector<16x128xf32>
    %c1_368 = arith.constant 1 : index
    %c10_369 = arith.constant 10 : index
    %c0_370 = arith.constant 0 : index
    %c0_371 = arith.constant 0 : index
    %570 = vector.load %arg3[%c1_368, %c10_369, %c0_370, %c0_371] : memref<4x17x16x128xf32, #tpu.memory_space<vmem>>, vector<1x1x16x128xf32>
    %571 = vector.shape_cast %570 : vector<1x1x16x128xf32> to vector<16x128xf32>
    %572 = arith.subf %571, %427 : vector<16x128xf32>
    %573 = math.exp %572 : vector<16x128xf32>
    %574 = arith.addf %560, %573 : vector<16x128xf32>
    %cst_372 = arith.constant 1.000000e+01 : f32
    %575 = vector.broadcast %cst_372 : f32 to vector<16x128xf32>
    %576 = arith.subf %377, %575 : vector<16x128xf32>
    %577 = math.absf %576 : vector<16x128xf32>
    %cst_373 = arith.constant 1.000000e+00 : f32
    %578 = vector.broadcast %cst_373 : f32 to vector<16x128xf32>
    %579 = arith.subf %578, %577 : vector<16x128xf32>
    %cst_374 = arith.constant 0.000000e+00 : f32
    %580 = vector.broadcast %cst_374 : f32 to vector<16x128xf32>
    %581 = arith.maximumf %579, %580 : vector<16x128xf32>
    %582 = arith.mulf %581, %571 : vector<16x128xf32>
    %583 = arith.addf %569, %582 : vector<16x128xf32>
    %c1_375 = arith.constant 1 : index
    %c11_376 = arith.constant 11 : index
    %c0_377 = arith.constant 0 : index
    %c0_378 = arith.constant 0 : index
    %584 = vector.load %arg3[%c1_375, %c11_376, %c0_377, %c0_378] : memref<4x17x16x128xf32, #tpu.memory_space<vmem>>, vector<1x1x16x128xf32>
    %585 = vector.shape_cast %584 : vector<1x1x16x128xf32> to vector<16x128xf32>
    %586 = arith.subf %585, %427 : vector<16x128xf32>
    %587 = math.exp %586 : vector<16x128xf32>
    %588 = arith.addf %574, %587 : vector<16x128xf32>
    %cst_379 = arith.constant 1.100000e+01 : f32
    %589 = vector.broadcast %cst_379 : f32 to vector<16x128xf32>
    %590 = arith.subf %377, %589 : vector<16x128xf32>
    %591 = math.absf %590 : vector<16x128xf32>
    %cst_380 = arith.constant 1.000000e+00 : f32
    %592 = vector.broadcast %cst_380 : f32 to vector<16x128xf32>
    %593 = arith.subf %592, %591 : vector<16x128xf32>
    %cst_381 = arith.constant 0.000000e+00 : f32
    %594 = vector.broadcast %cst_381 : f32 to vector<16x128xf32>
    %595 = arith.maximumf %593, %594 : vector<16x128xf32>
    %596 = arith.mulf %595, %585 : vector<16x128xf32>
    %597 = arith.addf %583, %596 : vector<16x128xf32>
    %c1_382 = arith.constant 1 : index
    %c12_383 = arith.constant 12 : index
    %c0_384 = arith.constant 0 : index
    %c0_385 = arith.constant 0 : index
    %598 = vector.load %arg3[%c1_382, %c12_383, %c0_384, %c0_385] : memref<4x17x16x128xf32, #tpu.memory_space<vmem>>, vector<1x1x16x128xf32>
    %599 = vector.shape_cast %598 : vector<1x1x16x128xf32> to vector<16x128xf32>
    %600 = arith.subf %599, %427 : vector<16x128xf32>
    %601 = math.exp %600 : vector<16x128xf32>
    %602 = arith.addf %588, %601 : vector<16x128xf32>
    %cst_386 = arith.constant 1.200000e+01 : f32
    %603 = vector.broadcast %cst_386 : f32 to vector<16x128xf32>
    %604 = arith.subf %377, %603 : vector<16x128xf32>
    %605 = math.absf %604 : vector<16x128xf32>
    %cst_387 = arith.constant 1.000000e+00 : f32
    %606 = vector.broadcast %cst_387 : f32 to vector<16x128xf32>
    %607 = arith.subf %606, %605 : vector<16x128xf32>
    %cst_388 = arith.constant 0.000000e+00 : f32
    %608 = vector.broadcast %cst_388 : f32 to vector<16x128xf32>
    %609 = arith.maximumf %607, %608 : vector<16x128xf32>
    %610 = arith.mulf %609, %599 : vector<16x128xf32>
    %611 = arith.addf %597, %610 : vector<16x128xf32>
    %c1_389 = arith.constant 1 : index
    %c13_390 = arith.constant 13 : index
    %c0_391 = arith.constant 0 : index
    %c0_392 = arith.constant 0 : index
    %612 = vector.load %arg3[%c1_389, %c13_390, %c0_391, %c0_392] : memref<4x17x16x128xf32, #tpu.memory_space<vmem>>, vector<1x1x16x128xf32>
    %613 = vector.shape_cast %612 : vector<1x1x16x128xf32> to vector<16x128xf32>
    %614 = arith.subf %613, %427 : vector<16x128xf32>
    %615 = math.exp %614 : vector<16x128xf32>
    %616 = arith.addf %602, %615 : vector<16x128xf32>
    %cst_393 = arith.constant 1.300000e+01 : f32
    %617 = vector.broadcast %cst_393 : f32 to vector<16x128xf32>
    %618 = arith.subf %377, %617 : vector<16x128xf32>
    %619 = math.absf %618 : vector<16x128xf32>
    %cst_394 = arith.constant 1.000000e+00 : f32
    %620 = vector.broadcast %cst_394 : f32 to vector<16x128xf32>
    %621 = arith.subf %620, %619 : vector<16x128xf32>
    %cst_395 = arith.constant 0.000000e+00 : f32
    %622 = vector.broadcast %cst_395 : f32 to vector<16x128xf32>
    %623 = arith.maximumf %621, %622 : vector<16x128xf32>
    %624 = arith.mulf %623, %613 : vector<16x128xf32>
    %625 = arith.addf %611, %624 : vector<16x128xf32>
    %c1_396 = arith.constant 1 : index
    %c14_397 = arith.constant 14 : index
    %c0_398 = arith.constant 0 : index
    %c0_399 = arith.constant 0 : index
    %626 = vector.load %arg3[%c1_396, %c14_397, %c0_398, %c0_399] : memref<4x17x16x128xf32, #tpu.memory_space<vmem>>, vector<1x1x16x128xf32>
    %627 = vector.shape_cast %626 : vector<1x1x16x128xf32> to vector<16x128xf32>
    %628 = arith.subf %627, %427 : vector<16x128xf32>
    %629 = math.exp %628 : vector<16x128xf32>
    %630 = arith.addf %616, %629 : vector<16x128xf32>
    %cst_400 = arith.constant 1.400000e+01 : f32
    %631 = vector.broadcast %cst_400 : f32 to vector<16x128xf32>
    %632 = arith.subf %377, %631 : vector<16x128xf32>
    %633 = math.absf %632 : vector<16x128xf32>
    %cst_401 = arith.constant 1.000000e+00 : f32
    %634 = vector.broadcast %cst_401 : f32 to vector<16x128xf32>
    %635 = arith.subf %634, %633 : vector<16x128xf32>
    %cst_402 = arith.constant 0.000000e+00 : f32
    %636 = vector.broadcast %cst_402 : f32 to vector<16x128xf32>
    %637 = arith.maximumf %635, %636 : vector<16x128xf32>
    %638 = arith.mulf %637, %627 : vector<16x128xf32>
    %639 = arith.addf %625, %638 : vector<16x128xf32>
    %c1_403 = arith.constant 1 : index
    %c15_404 = arith.constant 15 : index
    %c0_405 = arith.constant 0 : index
    %c0_406 = arith.constant 0 : index
    %640 = vector.load %arg3[%c1_403, %c15_404, %c0_405, %c0_406] : memref<4x17x16x128xf32, #tpu.memory_space<vmem>>, vector<1x1x16x128xf32>
    %641 = vector.shape_cast %640 : vector<1x1x16x128xf32> to vector<16x128xf32>
    %642 = arith.subf %641, %427 : vector<16x128xf32>
    %643 = math.exp %642 : vector<16x128xf32>
    %644 = arith.addf %630, %643 : vector<16x128xf32>
    %cst_407 = arith.constant 1.500000e+01 : f32
    %645 = vector.broadcast %cst_407 : f32 to vector<16x128xf32>
    %646 = arith.subf %377, %645 : vector<16x128xf32>
    %647 = math.absf %646 : vector<16x128xf32>
    %cst_408 = arith.constant 1.000000e+00 : f32
    %648 = vector.broadcast %cst_408 : f32 to vector<16x128xf32>
    %649 = arith.subf %648, %647 : vector<16x128xf32>
    %cst_409 = arith.constant 0.000000e+00 : f32
    %650 = vector.broadcast %cst_409 : f32 to vector<16x128xf32>
    %651 = arith.maximumf %649, %650 : vector<16x128xf32>
    %652 = arith.mulf %651, %641 : vector<16x128xf32>
    %653 = arith.addf %639, %652 : vector<16x128xf32>
    %c1_410 = arith.constant 1 : index
    %c16_411 = arith.constant 16 : index
    %c0_412 = arith.constant 0 : index
    %c0_413 = arith.constant 0 : index
    %654 = vector.load %arg3[%c1_410, %c16_411, %c0_412, %c0_413] : memref<4x17x16x128xf32, #tpu.memory_space<vmem>>, vector<1x1x16x128xf32>
    %655 = vector.shape_cast %654 : vector<1x1x16x128xf32> to vector<16x128xf32>
    %656 = arith.subf %655, %427 : vector<16x128xf32>
    %657 = math.exp %656 : vector<16x128xf32>
    %658 = arith.addf %644, %657 : vector<16x128xf32>
    %cst_414 = arith.constant 1.600000e+01 : f32
    %659 = vector.broadcast %cst_414 : f32 to vector<16x128xf32>
    %660 = arith.subf %377, %659 : vector<16x128xf32>
    %661 = math.absf %660 : vector<16x128xf32>
    %cst_415 = arith.constant 1.000000e+00 : f32
    %662 = vector.broadcast %cst_415 : f32 to vector<16x128xf32>
    %663 = arith.subf %662, %661 : vector<16x128xf32>
    %cst_416 = arith.constant 0.000000e+00 : f32
    %664 = vector.broadcast %cst_416 : f32 to vector<16x128xf32>
    %665 = arith.maximumf %663, %664 : vector<16x128xf32>
    %666 = arith.mulf %665, %655 : vector<16x128xf32>
    %667 = arith.addf %653, %666 : vector<16x128xf32>
    %c0_417 = arith.constant 0 : index
    %c0_418 = arith.constant 0 : index
    %668 = vector.load %arg7[%c0_417, %c0_418] : memref<16x128xf32, #tpu.memory_space<vmem>>, vector<16x128xf32>
    %669 = math.log %658 : vector<16x128xf32>
    %670 = arith.addf %427, %669 : vector<16x128xf32>
    %671 = arith.subf %670, %667 : vector<16x128xf32>
    %672 = arith.mulf %671, %20 : vector<16x128xf32>
    %673 = arith.addf %668, %672 : vector<16x128xf32>
    %c0_419 = arith.constant 0 : index
    %c0_420 = arith.constant 0 : index
    %674 = vector.load %arg7[%c0_419, %c0_420] : memref<16x128xf32, #tpu.memory_space<vmem>>, vector<16x128xf32>
    tpu.vector_store %arg7[%c0_419, %c0_420], %673 {strides = array<i32>} : memref<16x128xf32, #tpu.memory_space<vmem>>, vector<16x128xf32>,
    %c6_421 = arith.constant 6 : index
    %c0_422 = arith.constant 0 : index
    %c0_423 = arith.constant 0 : index
    %675 = vector.load %arg2[%c6_421, %c0_422, %c0_423] : memref<11x16x128xf32, #tpu.memory_space<vmem>>, vector<1x16x128xf32>
    %676 = vector.shape_cast %675 : vector<1x16x128xf32> to vector<16x128xf32>
    %c8_424 = arith.constant 8 : index
    %c0_425 = arith.constant 0 : index
    %c0_426 = arith.constant 0 : index
    %677 = vector.load %arg2[%c8_424, %c0_425, %c0_426] : memref<11x16x128xf32, #tpu.memory_space<vmem>>, vector<1x16x128xf32>
    %678 = vector.shape_cast %677 : vector<1x16x128xf32> to vector<16x128xf32>
    %679 = arith.subf %676, %678 : vector<16x128xf32>
    %cst_427 = arith.constant 0.000000e+00 : f32
    %cst_428 = arith.constant 1.599000e+01 : f32
    %680 = vector.broadcast %cst_427 : f32 to vector<16x128xf32>
    %681 = arith.maximumf %680, %679 : vector<16x128xf32>
    %682 = vector.broadcast %cst_428 : f32 to vector<16x128xf32>
    %683 = arith.minimumf %682, %681 : vector<16x128xf32>
    %c2_429 = arith.constant 2 : index
    %c0_430 = arith.constant 0 : index
    %c0_431 = arith.constant 0 : index
    %c0_432 = arith.constant 0 : index
    %684 = vector.load %arg3[%c2_429, %c0_430, %c0_431, %c0_432] : memref<4x17x16x128xf32, #tpu.memory_space<vmem>>, vector<1x1x16x128xf32>
    %685 = vector.shape_cast %684 : vector<1x1x16x128xf32> to vector<16x128xf32>
    %c2_433 = arith.constant 2 : index
    %c1_434 = arith.constant 1 : index
    %c0_435 = arith.constant 0 : index
    %c0_436 = arith.constant 0 : index
    %686 = vector.load %arg3[%c2_433, %c1_434, %c0_435, %c0_436] : memref<4x17x16x128xf32, #tpu.memory_space<vmem>>, vector<1x1x16x128xf32>
    %687 = vector.shape_cast %686 : vector<1x1x16x128xf32> to vector<16x128xf32>
    %688 = arith.maximumf %685, %687 : vector<16x128xf32>
    %c2_437 = arith.constant 2 : index
    %c2_438 = arith.constant 2 : index
    %c0_439 = arith.constant 0 : index
    %c0_440 = arith.constant 0 : index
    %689 = vector.load %arg3[%c2_437, %c2_438, %c0_439, %c0_440] : memref<4x17x16x128xf32, #tpu.memory_space<vmem>>, vector<1x1x16x128xf32>
    %690 = vector.shape_cast %689 : vector<1x1x16x128xf32> to vector<16x128xf32>
    %691 = arith.maximumf %688, %690 : vector<16x128xf32>
    %c2_441 = arith.constant 2 : index
    %c3_442 = arith.constant 3 : index
    %c0_443 = arith.constant 0 : index
    %c0_444 = arith.constant 0 : index
    %692 = vector.load %arg3[%c2_441, %c3_442, %c0_443, %c0_444] : memref<4x17x16x128xf32, #tpu.memory_space<vmem>>, vector<1x1x16x128xf32>
    %693 = vector.shape_cast %692 : vector<1x1x16x128xf32> to vector<16x128xf32>
    %694 = arith.maximumf %691, %693 : vector<16x128xf32>
    %c2_445 = arith.constant 2 : index
    %c4_446 = arith.constant 4 : index
    %c0_447 = arith.constant 0 : index
    %c0_448 = arith.constant 0 : index
    %695 = vector.load %arg3[%c2_445, %c4_446, %c0_447, %c0_448] : memref<4x17x16x128xf32, #tpu.memory_space<vmem>>, vector<1x1x16x128xf32>
    %696 = vector.shape_cast %695 : vector<1x1x16x128xf32> to vector<16x128xf32>
    %697 = arith.maximumf %694, %696 : vector<16x128xf32>
    %c2_449 = arith.constant 2 : index
    %c5_450 = arith.constant 5 : index
    %c0_451 = arith.constant 0 : index
    %c0_452 = arith.constant 0 : index
    %698 = vector.load %arg3[%c2_449, %c5_450, %c0_451, %c0_452] : memref<4x17x16x128xf32, #tpu.memory_space<vmem>>, vector<1x1x16x128xf32>
    %699 = vector.shape_cast %698 : vector<1x1x16x128xf32> to vector<16x128xf32>
    %700 = arith.maximumf %697, %699 : vector<16x128xf32>
    %c2_453 = arith.constant 2 : index
    %c6_454 = arith.constant 6 : index
    %c0_455 = arith.constant 0 : index
    %c0_456 = arith.constant 0 : index
    %701 = vector.load %arg3[%c2_453, %c6_454, %c0_455, %c0_456] : memref<4x17x16x128xf32, #tpu.memory_space<vmem>>, vector<1x1x16x128xf32>
    %702 = vector.shape_cast %701 : vector<1x1x16x128xf32> to vector<16x128xf32>
    %703 = arith.maximumf %700, %702 : vector<16x128xf32>
    %c2_457 = arith.constant 2 : index
    %c7_458 = arith.constant 7 : index
    %c0_459 = arith.constant 0 : index
    %c0_460 = arith.constant 0 : index
    %704 = vector.load %arg3[%c2_457, %c7_458, %c0_459, %c0_460] : memref<4x17x16x128xf32, #tpu.memory_space<vmem>>, vector<1x1x16x128xf32>
    %705 = vector.shape_cast %704 : vector<1x1x16x128xf32> to vector<16x128xf32>
    %706 = arith.maximumf %703, %705 : vector<16x128xf32>
    %c2_461 = arith.constant 2 : index
    %c8_462 = arith.constant 8 : index
    %c0_463 = arith.constant 0 : index
    %c0_464 = arith.constant 0 : index
    %707 = vector.load %arg3[%c2_461, %c8_462, %c0_463, %c0_464] : memref<4x17x16x128xf32, #tpu.memory_space<vmem>>, vector<1x1x16x128xf32>
    %708 = vector.shape_cast %707 : vector<1x1x16x128xf32> to vector<16x128xf32>
    %709 = arith.maximumf %706, %708 : vector<16x128xf32>
    %c2_465 = arith.constant 2 : index
    %c9_466 = arith.constant 9 : index
    %c0_467 = arith.constant 0 : index
    %c0_468 = arith.constant 0 : index
    %710 = vector.load %arg3[%c2_465, %c9_466, %c0_467, %c0_468] : memref<4x17x16x128xf32, #tpu.memory_space<vmem>>, vector<1x1x16x128xf32>
    %711 = vector.shape_cast %710 : vector<1x1x16x128xf32> to vector<16x128xf32>
    %712 = arith.maximumf %709, %711 : vector<16x128xf32>
    %c2_469 = arith.constant 2 : index
    %c10_470 = arith.constant 10 : index
    %c0_471 = arith.constant 0 : index
    %c0_472 = arith.constant 0 : index
    %713 = vector.load %arg3[%c2_469, %c10_470, %c0_471, %c0_472] : memref<4x17x16x128xf32, #tpu.memory_space<vmem>>, vector<1x1x16x128xf32>
    %714 = vector.shape_cast %713 : vector<1x1x16x128xf32> to vector<16x128xf32>
    %715 = arith.maximumf %712, %714 : vector<16x128xf32>
    %c2_473 = arith.constant 2 : index
    %c11_474 = arith.constant 11 : index
    %c0_475 = arith.constant 0 : index
    %c0_476 = arith.constant 0 : index
    %716 = vector.load %arg3[%c2_473, %c11_474, %c0_475, %c0_476] : memref<4x17x16x128xf32, #tpu.memory_space<vmem>>, vector<1x1x16x128xf32>
    %717 = vector.shape_cast %716 : vector<1x1x16x128xf32> to vector<16x128xf32>
    %718 = arith.maximumf %715, %717 : vector<16x128xf32>
    %c2_477 = arith.constant 2 : index
    %c12_478 = arith.constant 12 : index
    %c0_479 = arith.constant 0 : index
    %c0_480 = arith.constant 0 : index
    %719 = vector.load %arg3[%c2_477, %c12_478, %c0_479, %c0_480] : memref<4x17x16x128xf32, #tpu.memory_space<vmem>>, vector<1x1x16x128xf32>
    %720 = vector.shape_cast %719 : vector<1x1x16x128xf32> to vector<16x128xf32>
    %721 = arith.maximumf %718, %720 : vector<16x128xf32>
    %c2_481 = arith.constant 2 : index
    %c13_482 = arith.constant 13 : index
    %c0_483 = arith.constant 0 : index
    %c0_484 = arith.constant 0 : index
    %722 = vector.load %arg3[%c2_481, %c13_482, %c0_483, %c0_484] : memref<4x17x16x128xf32, #tpu.memory_space<vmem>>, vector<1x1x16x128xf32>
    %723 = vector.shape_cast %722 : vector<1x1x16x128xf32> to vector<16x128xf32>
    %724 = arith.maximumf %721, %723 : vector<16x128xf32>
    %c2_485 = arith.constant 2 : index
    %c14_486 = arith.constant 14 : index
    %c0_487 = arith.constant 0 : index
    %c0_488 = arith.constant 0 : index
    %725 = vector.load %arg3[%c2_485, %c14_486, %c0_487, %c0_488] : memref<4x17x16x128xf32, #tpu.memory_space<vmem>>, vector<1x1x16x128xf32>
    %726 = vector.shape_cast %725 : vector<1x1x16x128xf32> to vector<16x128xf32>
    %727 = arith.maximumf %724, %726 : vector<16x128xf32>
    %c2_489 = arith.constant 2 : index
    %c15_490 = arith.constant 15 : index
    %c0_491 = arith.constant 0 : index
    %c0_492 = arith.constant 0 : index
    %728 = vector.load %arg3[%c2_489, %c15_490, %c0_491, %c0_492] : memref<4x17x16x128xf32, #tpu.memory_space<vmem>>, vector<1x1x16x128xf32>
    %729 = vector.shape_cast %728 : vector<1x1x16x128xf32> to vector<16x128xf32>
    %730 = arith.maximumf %727, %729 : vector<16x128xf32>
    %c2_493 = arith.constant 2 : index
    %c16_494 = arith.constant 16 : index
    %c0_495 = arith.constant 0 : index
    %c0_496 = arith.constant 0 : index
    %731 = vector.load %arg3[%c2_493, %c16_494, %c0_495, %c0_496] : memref<4x17x16x128xf32, #tpu.memory_space<vmem>>, vector<1x1x16x128xf32>
    %732 = vector.shape_cast %731 : vector<1x1x16x128xf32> to vector<16x128xf32>
    %733 = arith.maximumf %730, %732 : vector<16x128xf32>
    %cst_497 = arith.constant 0.000000e+00 : f32
    %734 = vector.broadcast %cst_497 : f32 to vector<16x128xf32>
    %cst_498 = arith.constant 0.000000e+00 : f32
    %735 = vector.broadcast %cst_498 : f32 to vector<16x128xf32>
    %c2_499 = arith.constant 2 : index
    %c0_500 = arith.constant 0 : index
    %c0_501 = arith.constant 0 : index
    %c0_502 = arith.constant 0 : index
    %736 = vector.load %arg3[%c2_499, %c0_500, %c0_501, %c0_502] : memref<4x17x16x128xf32, #tpu.memory_space<vmem>>, vector<1x1x16x128xf32>
    %737 = vector.shape_cast %736 : vector<1x1x16x128xf32> to vector<16x128xf32>
    %738 = arith.subf %737, %733 : vector<16x128xf32>
    %739 = math.exp %738 : vector<16x128xf32>
    %740 = arith.addf %734, %739 : vector<16x128xf32>
    %cst_503 = arith.constant 0.000000e+00 : f32
    %741 = vector.broadcast %cst_503 : f32 to vector<16x128xf32>
    %742 = arith.subf %683, %741 : vector<16x128xf32>
    %743 = math.absf %742 : vector<16x128xf32>
    %cst_504 = arith.constant 1.000000e+00 : f32
    %744 = vector.broadcast %cst_504 : f32 to vector<16x128xf32>
    %745 = arith.subf %744, %743 : vector<16x128xf32>
    %cst_505 = arith.constant 0.000000e+00 : f32
    %746 = vector.broadcast %cst_505 : f32 to vector<16x128xf32>
    %747 = arith.maximumf %745, %746 : vector<16x128xf32>
    %748 = arith.mulf %747, %737 : vector<16x128xf32>
    %749 = arith.addf %735, %748 : vector<16x128xf32>
    %c2_506 = arith.constant 2 : index
    %c1_507 = arith.constant 1 : index
    %c0_508 = arith.constant 0 : index
    %c0_509 = arith.constant 0 : index
    %750 = vector.load %arg3[%c2_506, %c1_507, %c0_508, %c0_509] : memref<4x17x16x128xf32, #tpu.memory_space<vmem>>, vector<1x1x16x128xf32>
    %751 = vector.shape_cast %750 : vector<1x1x16x128xf32> to vector<16x128xf32>
    %752 = arith.subf %751, %733 : vector<16x128xf32>
    %753 = math.exp %752 : vector<16x128xf32>
    %754 = arith.addf %740, %753 : vector<16x128xf32>
    %cst_510 = arith.constant 1.000000e+00 : f32
    %755 = vector.broadcast %cst_510 : f32 to vector<16x128xf32>
    %756 = arith.subf %683, %755 : vector<16x128xf32>
    %757 = math.absf %756 : vector<16x128xf32>
    %cst_511 = arith.constant 1.000000e+00 : f32
    %758 = vector.broadcast %cst_511 : f32 to vector<16x128xf32>
    %759 = arith.subf %758, %757 : vector<16x128xf32>
    %cst_512 = arith.constant 0.000000e+00 : f32
    %760 = vector.broadcast %cst_512 : f32 to vector<16x128xf32>
    %761 = arith.maximumf %759, %760 : vector<16x128xf32>
    %762 = arith.mulf %761, %751 : vector<16x128xf32>
    %763 = arith.addf %749, %762 : vector<16x128xf32>
    %c2_513 = arith.constant 2 : index
    %c2_514 = arith.constant 2 : index
    %c0_515 = arith.constant 0 : index
    %c0_516 = arith.constant 0 : index
    %764 = vector.load %arg3[%c2_513, %c2_514, %c0_515, %c0_516] : memref<4x17x16x128xf32, #tpu.memory_space<vmem>>, vector<1x1x16x128xf32>
    %765 = vector.shape_cast %764 : vector<1x1x16x128xf32> to vector<16x128xf32>
    %766 = arith.subf %765, %733 : vector<16x128xf32>
    %767 = math.exp %766 : vector<16x128xf32>
    %768 = arith.addf %754, %767 : vector<16x128xf32>
    %cst_517 = arith.constant 2.000000e+00 : f32
    %769 = vector.broadcast %cst_517 : f32 to vector<16x128xf32>
    %770 = arith.subf %683, %769 : vector<16x128xf32>
    %771 = math.absf %770 : vector<16x128xf32>
    %cst_518 = arith.constant 1.000000e+00 : f32
    %772 = vector.broadcast %cst_518 : f32 to vector<16x128xf32>
    %773 = arith.subf %772, %771 : vector<16x128xf32>
    %cst_519 = arith.constant 0.000000e+00 : f32
    %774 = vector.broadcast %cst_519 : f32 to vector<16x128xf32>
    %775 = arith.maximumf %773, %774 : vector<16x128xf32>
    %776 = arith.mulf %775, %765 : vector<16x128xf32>
    %777 = arith.addf %763, %776 : vector<16x128xf32>
    %c2_520 = arith.constant 2 : index
    %c3_521 = arith.constant 3 : index
    %c0_522 = arith.constant 0 : index
    %c0_523 = arith.constant 0 : index
    %778 = vector.load %arg3[%c2_520, %c3_521, %c0_522, %c0_523] : memref<4x17x16x128xf32, #tpu.memory_space<vmem>>, vector<1x1x16x128xf32>
    %779 = vector.shape_cast %778 : vector<1x1x16x128xf32> to vector<16x128xf32>
    %780 = arith.subf %779, %733 : vector<16x128xf32>
    %781 = math.exp %780 : vector<16x128xf32>
    %782 = arith.addf %768, %781 : vector<16x128xf32>
    %cst_524 = arith.constant 3.000000e+00 : f32
    %783 = vector.broadcast %cst_524 : f32 to vector<16x128xf32>
    %784 = arith.subf %683, %783 : vector<16x128xf32>
    %785 = math.absf %784 : vector<16x128xf32>
    %cst_525 = arith.constant 1.000000e+00 : f32
    %786 = vector.broadcast %cst_525 : f32 to vector<16x128xf32>
    %787 = arith.subf %786, %785 : vector<16x128xf32>
    %cst_526 = arith.constant 0.000000e+00 : f32
    %788 = vector.broadcast %cst_526 : f32 to vector<16x128xf32>
    %789 = arith.maximumf %787, %788 : vector<16x128xf32>
    %790 = arith.mulf %789, %779 : vector<16x128xf32>
    %791 = arith.addf %777, %790 : vector<16x128xf32>
    %c2_527 = arith.constant 2 : index
    %c4_528 = arith.constant 4 : index
    %c0_529 = arith.constant 0 : index
    %c0_530 = arith.constant 0 : index
    %792 = vector.load %arg3[%c2_527, %c4_528, %c0_529, %c0_530] : memref<4x17x16x128xf32, #tpu.memory_space<vmem>>, vector<1x1x16x128xf32>
    %793 = vector.shape_cast %792 : vector<1x1x16x128xf32> to vector<16x128xf32>
    %794 = arith.subf %793, %733 : vector<16x128xf32>
    %795 = math.exp %794 : vector<16x128xf32>
    %796 = arith.addf %782, %795 : vector<16x128xf32>
    %cst_531 = arith.constant 4.000000e+00 : f32
    %797 = vector.broadcast %cst_531 : f32 to vector<16x128xf32>
    %798 = arith.subf %683, %797 : vector<16x128xf32>
    %799 = math.absf %798 : vector<16x128xf32>
    %cst_532 = arith.constant 1.000000e+00 : f32
    %800 = vector.broadcast %cst_532 : f32 to vector<16x128xf32>
    %801 = arith.subf %800, %799 : vector<16x128xf32>
    %cst_533 = arith.constant 0.000000e+00 : f32
    %802 = vector.broadcast %cst_533 : f32 to vector<16x128xf32>
    %803 = arith.maximumf %801, %802 : vector<16x128xf32>
    %804 = arith.mulf %803, %793 : vector<16x128xf32>
    %805 = arith.addf %791, %804 : vector<16x128xf32>
    %c2_534 = arith.constant 2 : index
    %c5_535 = arith.constant 5 : index
    %c0_536 = arith.constant 0 : index
    %c0_537 = arith.constant 0 : index
    %806 = vector.load %arg3[%c2_534, %c5_535, %c0_536, %c0_537] : memref<4x17x16x128xf32, #tpu.memory_space<vmem>>, vector<1x1x16x128xf32>
    %807 = vector.shape_cast %806 : vector<1x1x16x128xf32> to vector<16x128xf32>
    %808 = arith.subf %807, %733 : vector<16x128xf32>
    %809 = math.exp %808 : vector<16x128xf32>
    %810 = arith.addf %796, %809 : vector<16x128xf32>
    %cst_538 = arith.constant 5.000000e+00 : f32
    %811 = vector.broadcast %cst_538 : f32 to vector<16x128xf32>
    %812 = arith.subf %683, %811 : vector<16x128xf32>
    %813 = math.absf %812 : vector<16x128xf32>
    %cst_539 = arith.constant 1.000000e+00 : f32
    %814 = vector.broadcast %cst_539 : f32 to vector<16x128xf32>
    %815 = arith.subf %814, %813 : vector<16x128xf32>
    %cst_540 = arith.constant 0.000000e+00 : f32
    %816 = vector.broadcast %cst_540 : f32 to vector<16x128xf32>
    %817 = arith.maximumf %815, %816 : vector<16x128xf32>
    %818 = arith.mulf %817, %807 : vector<16x128xf32>
    %819 = arith.addf %805, %818 : vector<16x128xf32>
    %c2_541 = arith.constant 2 : index
    %c6_542 = arith.constant 6 : index
    %c0_543 = arith.constant 0 : index
    %c0_544 = arith.constant 0 : index
    %820 = vector.load %arg3[%c2_541, %c6_542, %c0_543, %c0_544] : memref<4x17x16x128xf32, #tpu.memory_space<vmem>>, vector<1x1x16x128xf32>
    %821 = vector.shape_cast %820 : vector<1x1x16x128xf32> to vector<16x128xf32>
    %822 = arith.subf %821, %733 : vector<16x128xf32>
    %823 = math.exp %822 : vector<16x128xf32>
    %824 = arith.addf %810, %823 : vector<16x128xf32>
    %cst_545 = arith.constant 6.000000e+00 : f32
    %825 = vector.broadcast %cst_545 : f32 to vector<16x128xf32>
    %826 = arith.subf %683, %825 : vector<16x128xf32>
    %827 = math.absf %826 : vector<16x128xf32>
    %cst_546 = arith.constant 1.000000e+00 : f32
    %828 = vector.broadcast %cst_546 : f32 to vector<16x128xf32>
    %829 = arith.subf %828, %827 : vector<16x128xf32>
    %cst_547 = arith.constant 0.000000e+00 : f32
    %830 = vector.broadcast %cst_547 : f32 to vector<16x128xf32>
    %831 = arith.maximumf %829, %830 : vector<16x128xf32>
    %832 = arith.mulf %831, %821 : vector<16x128xf32>
    %833 = arith.addf %819, %832 : vector<16x128xf32>
    %c2_548 = arith.constant 2 : index
    %c7_549 = arith.constant 7 : index
    %c0_550 = arith.constant 0 : index
    %c0_551 = arith.constant 0 : index
    %834 = vector.load %arg3[%c2_548, %c7_549, %c0_550, %c0_551] : memref<4x17x16x128xf32, #tpu.memory_space<vmem>>, vector<1x1x16x128xf32>
    %835 = vector.shape_cast %834 : vector<1x1x16x128xf32> to vector<16x128xf32>
    %836 = arith.subf %835, %733 : vector<16x128xf32>
    %837 = math.exp %836 : vector<16x128xf32>
    %838 = arith.addf %824, %837 : vector<16x128xf32>
    %cst_552 = arith.constant 7.000000e+00 : f32
    %839 = vector.broadcast %cst_552 : f32 to vector<16x128xf32>
    %840 = arith.subf %683, %839 : vector<16x128xf32>
    %841 = math.absf %840 : vector<16x128xf32>
    %cst_553 = arith.constant 1.000000e+00 : f32
    %842 = vector.broadcast %cst_553 : f32 to vector<16x128xf32>
    %843 = arith.subf %842, %841 : vector<16x128xf32>
    %cst_554 = arith.constant 0.000000e+00 : f32
    %844 = vector.broadcast %cst_554 : f32 to vector<16x128xf32>
    %845 = arith.maximumf %843, %844 : vector<16x128xf32>
    %846 = arith.mulf %845, %835 : vector<16x128xf32>
    %847 = arith.addf %833, %846 : vector<16x128xf32>
    %c2_555 = arith.constant 2 : index
    %c8_556 = arith.constant 8 : index
    %c0_557 = arith.constant 0 : index
    %c0_558 = arith.constant 0 : index
    %848 = vector.load %arg3[%c2_555, %c8_556, %c0_557, %c0_558] : memref<4x17x16x128xf32, #tpu.memory_space<vmem>>, vector<1x1x16x128xf32>
    %849 = vector.shape_cast %848 : vector<1x1x16x128xf32> to vector<16x128xf32>
    %850 = arith.subf %849, %733 : vector<16x128xf32>
    %851 = math.exp %850 : vector<16x128xf32>
    %852 = arith.addf %838, %851 : vector<16x128xf32>
    %cst_559 = arith.constant 8.000000e+00 : f32
    %853 = vector.broadcast %cst_559 : f32 to vector<16x128xf32>
    %854 = arith.subf %683, %853 : vector<16x128xf32>
    %855 = math.absf %854 : vector<16x128xf32>
    %cst_560 = arith.constant 1.000000e+00 : f32
    %856 = vector.broadcast %cst_560 : f32 to vector<16x128xf32>
    %857 = arith.subf %856, %855 : vector<16x128xf32>
    %cst_561 = arith.constant 0.000000e+00 : f32
    %858 = vector.broadcast %cst_561 : f32 to vector<16x128xf32>
    %859 = arith.maximumf %857, %858 : vector<16x128xf32>
    %860 = arith.mulf %859, %849 : vector<16x128xf32>
    %861 = arith.addf %847, %860 : vector<16x128xf32>
    %c2_562 = arith.constant 2 : index
    %c9_563 = arith.constant 9 : index
    %c0_564 = arith.constant 0 : index
    %c0_565 = arith.constant 0 : index
    %862 = vector.load %arg3[%c2_562, %c9_563, %c0_564, %c0_565] : memref<4x17x16x128xf32, #tpu.memory_space<vmem>>, vector<1x1x16x128xf32>
    %863 = vector.shape_cast %862 : vector<1x1x16x128xf32> to vector<16x128xf32>
    %864 = arith.subf %863, %733 : vector<16x128xf32>
    %865 = math.exp %864 : vector<16x128xf32>
    %866 = arith.addf %852, %865 : vector<16x128xf32>
    %cst_566 = arith.constant 9.000000e+00 : f32
    %867 = vector.broadcast %cst_566 : f32 to vector<16x128xf32>
    %868 = arith.subf %683, %867 : vector<16x128xf32>
    %869 = math.absf %868 : vector<16x128xf32>
    %cst_567 = arith.constant 1.000000e+00 : f32
    %870 = vector.broadcast %cst_567 : f32 to vector<16x128xf32>
    %871 = arith.subf %870, %869 : vector<16x128xf32>
    %cst_568 = arith.constant 0.000000e+00 : f32
    %872 = vector.broadcast %cst_568 : f32 to vector<16x128xf32>
    %873 = arith.maximumf %871, %872 : vector<16x128xf32>
    %874 = arith.mulf %873, %863 : vector<16x128xf32>
    %875 = arith.addf %861, %874 : vector<16x128xf32>
    %c2_569 = arith.constant 2 : index
    %c10_570 = arith.constant 10 : index
    %c0_571 = arith.constant 0 : index
    %c0_572 = arith.constant 0 : index
    %876 = vector.load %arg3[%c2_569, %c10_570, %c0_571, %c0_572] : memref<4x17x16x128xf32, #tpu.memory_space<vmem>>, vector<1x1x16x128xf32>
    %877 = vector.shape_cast %876 : vector<1x1x16x128xf32> to vector<16x128xf32>
    %878 = arith.subf %877, %733 : vector<16x128xf32>
    %879 = math.exp %878 : vector<16x128xf32>
    %880 = arith.addf %866, %879 : vector<16x128xf32>
    %cst_573 = arith.constant 1.000000e+01 : f32
    %881 = vector.broadcast %cst_573 : f32 to vector<16x128xf32>
    %882 = arith.subf %683, %881 : vector<16x128xf32>
    %883 = math.absf %882 : vector<16x128xf32>
    %cst_574 = arith.constant 1.000000e+00 : f32
    %884 = vector.broadcast %cst_574 : f32 to vector<16x128xf32>
    %885 = arith.subf %884, %883 : vector<16x128xf32>
    %cst_575 = arith.constant 0.000000e+00 : f32
    %886 = vector.broadcast %cst_575 : f32 to vector<16x128xf32>
    %887 = arith.maximumf %885, %886 : vector<16x128xf32>
    %888 = arith.mulf %887, %877 : vector<16x128xf32>
    %889 = arith.addf %875, %888 : vector<16x128xf32>
    %c2_576 = arith.constant 2 : index
    %c11_577 = arith.constant 11 : index
    %c0_578 = arith.constant 0 : index
    %c0_579 = arith.constant 0 : index
    %890 = vector.load %arg3[%c2_576, %c11_577, %c0_578, %c0_579] : memref<4x17x16x128xf32, #tpu.memory_space<vmem>>, vector<1x1x16x128xf32>
    %891 = vector.shape_cast %890 : vector<1x1x16x128xf32> to vector<16x128xf32>
    %892 = arith.subf %891, %733 : vector<16x128xf32>
    %893 = math.exp %892 : vector<16x128xf32>
    %894 = arith.addf %880, %893 : vector<16x128xf32>
    %cst_580 = arith.constant 1.100000e+01 : f32
    %895 = vector.broadcast %cst_580 : f32 to vector<16x128xf32>
    %896 = arith.subf %683, %895 : vector<16x128xf32>
    %897 = math.absf %896 : vector<16x128xf32>
    %cst_581 = arith.constant 1.000000e+00 : f32
    %898 = vector.broadcast %cst_581 : f32 to vector<16x128xf32>
    %899 = arith.subf %898, %897 : vector<16x128xf32>
    %cst_582 = arith.constant 0.000000e+00 : f32
    %900 = vector.broadcast %cst_582 : f32 to vector<16x128xf32>
    %901 = arith.maximumf %899, %900 : vector<16x128xf32>
    %902 = arith.mulf %901, %891 : vector<16x128xf32>
    %903 = arith.addf %889, %902 : vector<16x128xf32>
    %c2_583 = arith.constant 2 : index
    %c12_584 = arith.constant 12 : index
    %c0_585 = arith.constant 0 : index
    %c0_586 = arith.constant 0 : index
    %904 = vector.load %arg3[%c2_583, %c12_584, %c0_585, %c0_586] : memref<4x17x16x128xf32, #tpu.memory_space<vmem>>, vector<1x1x16x128xf32>
    %905 = vector.shape_cast %904 : vector<1x1x16x128xf32> to vector<16x128xf32>
    %906 = arith.subf %905, %733 : vector<16x128xf32>
    %907 = math.exp %906 : vector<16x128xf32>
    %908 = arith.addf %894, %907 : vector<16x128xf32>
    %cst_587 = arith.constant 1.200000e+01 : f32
    %909 = vector.broadcast %cst_587 : f32 to vector<16x128xf32>
    %910 = arith.subf %683, %909 : vector<16x128xf32>
    %911 = math.absf %910 : vector<16x128xf32>
    %cst_588 = arith.constant 1.000000e+00 : f32
    %912 = vector.broadcast %cst_588 : f32 to vector<16x128xf32>
    %913 = arith.subf %912, %911 : vector<16x128xf32>
    %cst_589 = arith.constant 0.000000e+00 : f32
    %914 = vector.broadcast %cst_589 : f32 to vector<16x128xf32>
    %915 = arith.maximumf %913, %914 : vector<16x128xf32>
    %916 = arith.mulf %915, %905 : vector<16x128xf32>
    %917 = arith.addf %903, %916 : vector<16x128xf32>
    %c2_590 = arith.constant 2 : index
    %c13_591 = arith.constant 13 : index
    %c0_592 = arith.constant 0 : index
    %c0_593 = arith.constant 0 : index
    %918 = vector.load %arg3[%c2_590, %c13_591, %c0_592, %c0_593] : memref<4x17x16x128xf32, #tpu.memory_space<vmem>>, vector<1x1x16x128xf32>
    %919 = vector.shape_cast %918 : vector<1x1x16x128xf32> to vector<16x128xf32>
    %920 = arith.subf %919, %733 : vector<16x128xf32>
    %921 = math.exp %920 : vector<16x128xf32>
    %922 = arith.addf %908, %921 : vector<16x128xf32>
    %cst_594 = arith.constant 1.300000e+01 : f32
    %923 = vector.broadcast %cst_594 : f32 to vector<16x128xf32>
    %924 = arith.subf %683, %923 : vector<16x128xf32>
    %925 = math.absf %924 : vector<16x128xf32>
    %cst_595 = arith.constant 1.000000e+00 : f32
    %926 = vector.broadcast %cst_595 : f32 to vector<16x128xf32>
    %927 = arith.subf %926, %925 : vector<16x128xf32>
    %cst_596 = arith.constant 0.000000e+00 : f32
    %928 = vector.broadcast %cst_596 : f32 to vector<16x128xf32>
    %929 = arith.maximumf %927, %928 : vector<16x128xf32>
    %930 = arith.mulf %929, %919 : vector<16x128xf32>
    %931 = arith.addf %917, %930 : vector<16x128xf32>
    %c2_597 = arith.constant 2 : index
    %c14_598 = arith.constant 14 : index
    %c0_599 = arith.constant 0 : index
    %c0_600 = arith.constant 0 : index
    %932 = vector.load %arg3[%c2_597, %c14_598, %c0_599, %c0_600] : memref<4x17x16x128xf32, #tpu.memory_space<vmem>>, vector<1x1x16x128xf32>
    %933 = vector.shape_cast %932 : vector<1x1x16x128xf32> to vector<16x128xf32>
    %934 = arith.subf %933, %733 : vector<16x128xf32>
    %935 = math.exp %934 : vector<16x128xf32>
    %936 = arith.addf %922, %935 : vector<16x128xf32>
    %cst_601 = arith.constant 1.400000e+01 : f32
    %937 = vector.broadcast %cst_601 : f32 to vector<16x128xf32>
    %938 = arith.subf %683, %937 : vector<16x128xf32>
    %939 = math.absf %938 : vector<16x128xf32>
    %cst_602 = arith.constant 1.000000e+00 : f32
    %940 = vector.broadcast %cst_602 : f32 to vector<16x128xf32>
    %941 = arith.subf %940, %939 : vector<16x128xf32>
    %cst_603 = arith.constant 0.000000e+00 : f32
    %942 = vector.broadcast %cst_603 : f32 to vector<16x128xf32>
    %943 = arith.maximumf %941, %942 : vector<16x128xf32>
    %944 = arith.mulf %943, %933 : vector<16x128xf32>
    %945 = arith.addf %931, %944 : vector<16x128xf32>
    %c2_604 = arith.constant 2 : index
    %c15_605 = arith.constant 15 : index
    %c0_606 = arith.constant 0 : index
    %c0_607 = arith.constant 0 : index
    %946 = vector.load %arg3[%c2_604, %c15_605, %c0_606, %c0_607] : memref<4x17x16x128xf32, #tpu.memory_space<vmem>>, vector<1x1x16x128xf32>
    %947 = vector.shape_cast %946 : vector<1x1x16x128xf32> to vector<16x128xf32>
    %948 = arith.subf %947, %733 : vector<16x128xf32>
    %949 = math.exp %948 : vector<16x128xf32>
    %950 = arith.addf %936, %949 : vector<16x128xf32>
    %cst_608 = arith.constant 1.500000e+01 : f32
    %951 = vector.broadcast %cst_608 : f32 to vector<16x128xf32>
    %952 = arith.subf %683, %951 : vector<16x128xf32>
    %953 = math.absf %952 : vector<16x128xf32>
    %cst_609 = arith.constant 1.000000e+00 : f32
    %954 = vector.broadcast %cst_609 : f32 to vector<16x128xf32>
    %955 = arith.subf %954, %953 : vector<16x128xf32>
    %cst_610 = arith.constant 0.000000e+00 : f32
    %956 = vector.broadcast %cst_610 : f32 to vector<16x128xf32>
    %957 = arith.maximumf %955, %956 : vector<16x128xf32>
    %958 = arith.mulf %957, %947 : vector<16x128xf32>
    %959 = arith.addf %945, %958 : vector<16x128xf32>
    %c2_611 = arith.constant 2 : index
    %c16_612 = arith.constant 16 : index
    %c0_613 = arith.constant 0 : index
    %c0_614 = arith.constant 0 : index
    %960 = vector.load %arg3[%c2_611, %c16_612, %c0_613, %c0_614] : memref<4x17x16x128xf32, #tpu.memory_space<vmem>>, vector<1x1x16x128xf32>
    %961 = vector.shape_cast %960 : vector<1x1x16x128xf32> to vector<16x128xf32>
    %962 = arith.subf %961, %733 : vector<16x128xf32>
    %963 = math.exp %962 : vector<16x128xf32>
    %964 = arith.addf %950, %963 : vector<16x128xf32>
    %cst_615 = arith.constant 1.600000e+01 : f32
    %965 = vector.broadcast %cst_615 : f32 to vector<16x128xf32>
    %966 = arith.subf %683, %965 : vector<16x128xf32>
    %967 = math.absf %966 : vector<16x128xf32>
    %cst_616 = arith.constant 1.000000e+00 : f32
    %968 = vector.broadcast %cst_616 : f32 to vector<16x128xf32>
    %969 = arith.subf %968, %967 : vector<16x128xf32>
    %cst_617 = arith.constant 0.000000e+00 : f32
    %970 = vector.broadcast %cst_617 : f32 to vector<16x128xf32>
    %971 = arith.maximumf %969, %970 : vector<16x128xf32>
    %972 = arith.mulf %971, %961 : vector<16x128xf32>
    %973 = arith.addf %959, %972 : vector<16x128xf32>
    %c0_618 = arith.constant 0 : index
    %c0_619 = arith.constant 0 : index
    %974 = vector.load %arg7[%c0_618, %c0_619] : memref<16x128xf32, #tpu.memory_space<vmem>>, vector<16x128xf32>
    %975 = math.log %964 : vector<16x128xf32>
    %976 = arith.addf %733, %975 : vector<16x128xf32>
    %977 = arith.subf %976, %973 : vector<16x128xf32>
    %978 = arith.mulf %977, %20 : vector<16x128xf32>
    %979 = arith.addf %974, %978 : vector<16x128xf32>
    %c0_620 = arith.constant 0 : index
    %c0_621 = arith.constant 0 : index
    %980 = vector.load %arg7[%c0_620, %c0_621] : memref<16x128xf32, #tpu.memory_space<vmem>>, vector<16x128xf32>
    tpu.vector_store %arg7[%c0_620, %c0_621], %979 {strides = array<i32>} : memref<16x128xf32, #tpu.memory_space<vmem>>, vector<16x128xf32>,
    %c7_622 = arith.constant 7 : index
    %c0_623 = arith.constant 0 : index
    %c0_624 = arith.constant 0 : index
    %981 = vector.load %arg2[%c7_622, %c0_623, %c0_624] : memref<11x16x128xf32, #tpu.memory_space<vmem>>, vector<1x16x128xf32>
    %982 = vector.shape_cast %981 : vector<1x16x128xf32> to vector<16x128xf32>
    %c9_625 = arith.constant 9 : index
    %c0_626 = arith.constant 0 : index
    %c0_627 = arith.constant 0 : index
    %983 = vector.load %arg2[%c9_625, %c0_626, %c0_627] : memref<11x16x128xf32, #tpu.memory_space<vmem>>, vector<1x16x128xf32>
    %984 = vector.shape_cast %983 : vector<1x16x128xf32> to vector<16x128xf32>
    %985 = arith.subf %982, %984 : vector<16x128xf32>
    %cst_628 = arith.constant 0.000000e+00 : f32
    %cst_629 = arith.constant 1.599000e+01 : f32
    %986 = vector.broadcast %cst_628 : f32 to vector<16x128xf32>
    %987 = arith.maximumf %986, %985 : vector<16x128xf32>
    %988 = vector.broadcast %cst_629 : f32 to vector<16x128xf32>
    %989 = arith.minimumf %988, %987 : vector<16x128xf32>
    %c3_630 = arith.constant 3 : index
    %c0_631 = arith.constant 0 : index
    %c0_632 = arith.constant 0 : index
    %c0_633 = arith.constant 0 : index
    %990 = vector.load %arg3[%c3_630, %c0_631, %c0_632, %c0_633] : memref<4x17x16x128xf32, #tpu.memory_space<vmem>>, vector<1x1x16x128xf32>
    %991 = vector.shape_cast %990 : vector<1x1x16x128xf32> to vector<16x128xf32>
    %c3_634 = arith.constant 3 : index
    %c1_635 = arith.constant 1 : index
    %c0_636 = arith.constant 0 : index
    %c0_637 = arith.constant 0 : index
    %992 = vector.load %arg3[%c3_634, %c1_635, %c0_636, %c0_637] : memref<4x17x16x128xf32, #tpu.memory_space<vmem>>, vector<1x1x16x128xf32>
    %993 = vector.shape_cast %992 : vector<1x1x16x128xf32> to vector<16x128xf32>
    %994 = arith.maximumf %991, %993 : vector<16x128xf32>
    %c3_638 = arith.constant 3 : index
    %c2_639 = arith.constant 2 : index
    %c0_640 = arith.constant 0 : index
    %c0_641 = arith.constant 0 : index
    %995 = vector.load %arg3[%c3_638, %c2_639, %c0_640, %c0_641] : memref<4x17x16x128xf32, #tpu.memory_space<vmem>>, vector<1x1x16x128xf32>
    %996 = vector.shape_cast %995 : vector<1x1x16x128xf32> to vector<16x128xf32>
    %997 = arith.maximumf %994, %996 : vector<16x128xf32>
    %c3_642 = arith.constant 3 : index
    %c3_643 = arith.constant 3 : index
    %c0_644 = arith.constant 0 : index
    %c0_645 = arith.constant 0 : index
    %998 = vector.load %arg3[%c3_642, %c3_643, %c0_644, %c0_645] : memref<4x17x16x128xf32, #tpu.memory_space<vmem>>, vector<1x1x16x128xf32>
    %999 = vector.shape_cast %998 : vector<1x1x16x128xf32> to vector<16x128xf32>
    %1000 = arith.maximumf %997, %999 : vector<16x128xf32>
    %c3_646 = arith.constant 3 : index
    %c4_647 = arith.constant 4 : index
    %c0_648 = arith.constant 0 : index
    %c0_649 = arith.constant 0 : index
    %1001 = vector.load %arg3[%c3_646, %c4_647, %c0_648, %c0_649] : memref<4x17x16x128xf32, #tpu.memory_space<vmem>>, vector<1x1x16x128xf32>
    %1002 = vector.shape_cast %1001 : vector<1x1x16x128xf32> to vector<16x128xf32>
    %1003 = arith.maximumf %1000, %1002 : vector<16x128xf32>
    %c3_650 = arith.constant 3 : index
    %c5_651 = arith.constant 5 : index
    %c0_652 = arith.constant 0 : index
    %c0_653 = arith.constant 0 : index
    %1004 = vector.load %arg3[%c3_650, %c5_651, %c0_652, %c0_653] : memref<4x17x16x128xf32, #tpu.memory_space<vmem>>, vector<1x1x16x128xf32>
    %1005 = vector.shape_cast %1004 : vector<1x1x16x128xf32> to vector<16x128xf32>
    %1006 = arith.maximumf %1003, %1005 : vector<16x128xf32>
    %c3_654 = arith.constant 3 : index
    %c6_655 = arith.constant 6 : index
    %c0_656 = arith.constant 0 : index
    %c0_657 = arith.constant 0 : index
    %1007 = vector.load %arg3[%c3_654, %c6_655, %c0_656, %c0_657] : memref<4x17x16x128xf32, #tpu.memory_space<vmem>>, vector<1x1x16x128xf32>
    %1008 = vector.shape_cast %1007 : vector<1x1x16x128xf32> to vector<16x128xf32>
    %1009 = arith.maximumf %1006, %1008 : vector<16x128xf32>
    %c3_658 = arith.constant 3 : index
    %c7_659 = arith.constant 7 : index
    %c0_660 = arith.constant 0 : index
    %c0_661 = arith.constant 0 : index
    %1010 = vector.load %arg3[%c3_658, %c7_659, %c0_660, %c0_661] : memref<4x17x16x128xf32, #tpu.memory_space<vmem>>, vector<1x1x16x128xf32>
    %1011 = vector.shape_cast %1010 : vector<1x1x16x128xf32> to vector<16x128xf32>
    %1012 = arith.maximumf %1009, %1011 : vector<16x128xf32>
    %c3_662 = arith.constant 3 : index
    %c8_663 = arith.constant 8 : index
    %c0_664 = arith.constant 0 : index
    %c0_665 = arith.constant 0 : index
    %1013 = vector.load %arg3[%c3_662, %c8_663, %c0_664, %c0_665] : memref<4x17x16x128xf32, #tpu.memory_space<vmem>>, vector<1x1x16x128xf32>
    %1014 = vector.shape_cast %1013 : vector<1x1x16x128xf32> to vector<16x128xf32>
    %1015 = arith.maximumf %1012, %1014 : vector<16x128xf32>
    %c3_666 = arith.constant 3 : index
    %c9_667 = arith.constant 9 : index
    %c0_668 = arith.constant 0 : index
    %c0_669 = arith.constant 0 : index
    %1016 = vector.load %arg3[%c3_666, %c9_667, %c0_668, %c0_669] : memref<4x17x16x128xf32, #tpu.memory_space<vmem>>, vector<1x1x16x128xf32>
    %1017 = vector.shape_cast %1016 : vector<1x1x16x128xf32> to vector<16x128xf32>
    %1018 = arith.maximumf %1015, %1017 : vector<16x128xf32>
    %c3_670 = arith.constant 3 : index
    %c10_671 = arith.constant 10 : index
    %c0_672 = arith.constant 0 : index
    %c0_673 = arith.constant 0 : index
    %1019 = vector.load %arg3[%c3_670, %c10_671, %c0_672, %c0_673] : memref<4x17x16x128xf32, #tpu.memory_space<vmem>>, vector<1x1x16x128xf32>
    %1020 = vector.shape_cast %1019 : vector<1x1x16x128xf32> to vector<16x128xf32>
    %1021 = arith.maximumf %1018, %1020 : vector<16x128xf32>
    %c3_674 = arith.constant 3 : index
    %c11_675 = arith.constant 11 : index
    %c0_676 = arith.constant 0 : index
    %c0_677 = arith.constant 0 : index
    %1022 = vector.load %arg3[%c3_674, %c11_675, %c0_676, %c0_677] : memref<4x17x16x128xf32, #tpu.memory_space<vmem>>, vector<1x1x16x128xf32>
    %1023 = vector.shape_cast %1022 : vector<1x1x16x128xf32> to vector<16x128xf32>
    %1024 = arith.maximumf %1021, %1023 : vector<16x128xf32>
    %c3_678 = arith.constant 3 : index
    %c12_679 = arith.constant 12 : index
    %c0_680 = arith.constant 0 : index
    %c0_681 = arith.constant 0 : index
    %1025 = vector.load %arg3[%c3_678, %c12_679, %c0_680, %c0_681] : memref<4x17x16x128xf32, #tpu.memory_space<vmem>>, vector<1x1x16x128xf32>
    %1026 = vector.shape_cast %1025 : vector<1x1x16x128xf32> to vector<16x128xf32>
    %1027 = arith.maximumf %1024, %1026 : vector<16x128xf32>
    %c3_682 = arith.constant 3 : index
    %c13_683 = arith.constant 13 : index
    %c0_684 = arith.constant 0 : index
    %c0_685 = arith.constant 0 : index
    %1028 = vector.load %arg3[%c3_682, %c13_683, %c0_684, %c0_685] : memref<4x17x16x128xf32, #tpu.memory_space<vmem>>, vector<1x1x16x128xf32>
    %1029 = vector.shape_cast %1028 : vector<1x1x16x128xf32> to vector<16x128xf32>
    %1030 = arith.maximumf %1027, %1029 : vector<16x128xf32>
    %c3_686 = arith.constant 3 : index
    %c14_687 = arith.constant 14 : index
    %c0_688 = arith.constant 0 : index
    %c0_689 = arith.constant 0 : index
    %1031 = vector.load %arg3[%c3_686, %c14_687, %c0_688, %c0_689] : memref<4x17x16x128xf32, #tpu.memory_space<vmem>>, vector<1x1x16x128xf32>
    %1032 = vector.shape_cast %1031 : vector<1x1x16x128xf32> to vector<16x128xf32>
    %1033 = arith.maximumf %1030, %1032 : vector<16x128xf32>
    %c3_690 = arith.constant 3 : index
    %c15_691 = arith.constant 15 : index
    %c0_692 = arith.constant 0 : index
    %c0_693 = arith.constant 0 : index
    %1034 = vector.load %arg3[%c3_690, %c15_691, %c0_692, %c0_693] : memref<4x17x16x128xf32, #tpu.memory_space<vmem>>, vector<1x1x16x128xf32>
    %1035 = vector.shape_cast %1034 : vector<1x1x16x128xf32> to vector<16x128xf32>
    %1036 = arith.maximumf %1033, %1035 : vector<16x128xf32>
    %c3_694 = arith.constant 3 : index
    %c16_695 = arith.constant 16 : index
    %c0_696 = arith.constant 0 : index
    %c0_697 = arith.constant 0 : index
    %1037 = vector.load %arg3[%c3_694, %c16_695, %c0_696, %c0_697] : memref<4x17x16x128xf32, #tpu.memory_space<vmem>>, vector<1x1x16x128xf32>
    %1038 = vector.shape_cast %1037 : vector<1x1x16x128xf32> to vector<16x128xf32>
    %1039 = arith.maximumf %1036, %1038 : vector<16x128xf32>
    %cst_698 = arith.constant 0.000000e+00 : f32
    %1040 = vector.broadcast %cst_698 : f32 to vector<16x128xf32>
    %cst_699 = arith.constant 0.000000e+00 : f32
    %1041 = vector.broadcast %cst_699 : f32 to vector<16x128xf32>
    %c3_700 = arith.constant 3 : index
    %c0_701 = arith.constant 0 : index
    %c0_702 = arith.constant 0 : index
    %c0_703 = arith.constant 0 : index
    %1042 = vector.load %arg3[%c3_700, %c0_701, %c0_702, %c0_703] : memref<4x17x16x128xf32, #tpu.memory_space<vmem>>, vector<1x1x16x128xf32>
    %1043 = vector.shape_cast %1042 : vector<1x1x16x128xf32> to vector<16x128xf32>
    %1044 = arith.subf %1043, %1039 : vector<16x128xf32>
    %1045 = math.exp %1044 : vector<16x128xf32>
    %1046 = arith.addf %1040, %1045 : vector<16x128xf32>
    %cst_704 = arith.constant 0.000000e+00 : f32
    %1047 = vector.broadcast %cst_704 : f32 to vector<16x128xf32>
    %1048 = arith.subf %989, %1047 : vector<16x128xf32>
    %1049 = math.absf %1048 : vector<16x128xf32>
    %cst_705 = arith.constant 1.000000e+00 : f32
    %1050 = vector.broadcast %cst_705 : f32 to vector<16x128xf32>
    %1051 = arith.subf %1050, %1049 : vector<16x128xf32>
    %cst_706 = arith.constant 0.000000e+00 : f32
    %1052 = vector.broadcast %cst_706 : f32 to vector<16x128xf32>
    %1053 = arith.maximumf %1051, %1052 : vector<16x128xf32>
    %1054 = arith.mulf %1053, %1043 : vector<16x128xf32>
    %1055 = arith.addf %1041, %1054 : vector<16x128xf32>
    %c3_707 = arith.constant 3 : index
    %c1_708 = arith.constant 1 : index
    %c0_709 = arith.constant 0 : index
    %c0_710 = arith.constant 0 : index
    %1056 = vector.load %arg3[%c3_707, %c1_708, %c0_709, %c0_710] : memref<4x17x16x128xf32, #tpu.memory_space<vmem>>, vector<1x1x16x128xf32>
    %1057 = vector.shape_cast %1056 : vector<1x1x16x128xf32> to vector<16x128xf32>
    %1058 = arith.subf %1057, %1039 : vector<16x128xf32>
    %1059 = math.exp %1058 : vector<16x128xf32>
    %1060 = arith.addf %1046, %1059 : vector<16x128xf32>
    %cst_711 = arith.constant 1.000000e+00 : f32
    %1061 = vector.broadcast %cst_711 : f32 to vector<16x128xf32>
    %1062 = arith.subf %989, %1061 : vector<16x128xf32>
    %1063 = math.absf %1062 : vector<16x128xf32>
    %cst_712 = arith.constant 1.000000e+00 : f32
    %1064 = vector.broadcast %cst_712 : f32 to vector<16x128xf32>
    %1065 = arith.subf %1064, %1063 : vector<16x128xf32>
    %cst_713 = arith.constant 0.000000e+00 : f32
    %1066 = vector.broadcast %cst_713 : f32 to vector<16x128xf32>
    %1067 = arith.maximumf %1065, %1066 : vector<16x128xf32>
    %1068 = arith.mulf %1067, %1057 : vector<16x128xf32>
    %1069 = arith.addf %1055, %1068 : vector<16x128xf32>
    %c3_714 = arith.constant 3 : index
    %c2_715 = arith.constant 2 : index
    %c0_716 = arith.constant 0 : index
    %c0_717 = arith.constant 0 : index
    %1070 = vector.load %arg3[%c3_714, %c2_715, %c0_716, %c0_717] : memref<4x17x16x128xf32, #tpu.memory_space<vmem>>, vector<1x1x16x128xf32>
    %1071 = vector.shape_cast %1070 : vector<1x1x16x128xf32> to vector<16x128xf32>
    %1072 = arith.subf %1071, %1039 : vector<16x128xf32>
    %1073 = math.exp %1072 : vector<16x128xf32>
    %1074 = arith.addf %1060, %1073 : vector<16x128xf32>
    %cst_718 = arith.constant 2.000000e+00 : f32
    %1075 = vector.broadcast %cst_718 : f32 to vector<16x128xf32>
    %1076 = arith.subf %989, %1075 : vector<16x128xf32>
    %1077 = math.absf %1076 : vector<16x128xf32>
    %cst_719 = arith.constant 1.000000e+00 : f32
    %1078 = vector.broadcast %cst_719 : f32 to vector<16x128xf32>
    %1079 = arith.subf %1078, %1077 : vector<16x128xf32>
    %cst_720 = arith.constant 0.000000e+00 : f32
    %1080 = vector.broadcast %cst_720 : f32 to vector<16x128xf32>
    %1081 = arith.maximumf %1079, %1080 : vector<16x128xf32>
    %1082 = arith.mulf %1081, %1071 : vector<16x128xf32>
    %1083 = arith.addf %1069, %1082 : vector<16x128xf32>
    %c3_721 = arith.constant 3 : index
    %c3_722 = arith.constant 3 : index
    %c0_723 = arith.constant 0 : index
    %c0_724 = arith.constant 0 : index
    %1084 = vector.load %arg3[%c3_721, %c3_722, %c0_723, %c0_724] : memref<4x17x16x128xf32, #tpu.memory_space<vmem>>, vector<1x1x16x128xf32>
    %1085 = vector.shape_cast %1084 : vector<1x1x16x128xf32> to vector<16x128xf32>
    %1086 = arith.subf %1085, %1039 : vector<16x128xf32>
    %1087 = math.exp %1086 : vector<16x128xf32>
    %1088 = arith.addf %1074, %1087 : vector<16x128xf32>
    %cst_725 = arith.constant 3.000000e+00 : f32
    %1089 = vector.broadcast %cst_725 : f32 to vector<16x128xf32>
    %1090 = arith.subf %989, %1089 : vector<16x128xf32>
    %1091 = math.absf %1090 : vector<16x128xf32>
    %cst_726 = arith.constant 1.000000e+00 : f32
    %1092 = vector.broadcast %cst_726 : f32 to vector<16x128xf32>
    %1093 = arith.subf %1092, %1091 : vector<16x128xf32>
    %cst_727 = arith.constant 0.000000e+00 : f32
    %1094 = vector.broadcast %cst_727 : f32 to vector<16x128xf32>
    %1095 = arith.maximumf %1093, %1094 : vector<16x128xf32>
    %1096 = arith.mulf %1095, %1085 : vector<16x128xf32>
    %1097 = arith.addf %1083, %1096 : vector<16x128xf32>
    %c3_728 = arith.constant 3 : index
    %c4_729 = arith.constant 4 : index
    %c0_730 = arith.constant 0 : index
    %c0_731 = arith.constant 0 : index
    %1098 = vector.load %arg3[%c3_728, %c4_729, %c0_730, %c0_731] : memref<4x17x16x128xf32, #tpu.memory_space<vmem>>, vector<1x1x16x128xf32>
    %1099 = vector.shape_cast %1098 : vector<1x1x16x128xf32> to vector<16x128xf32>
    %1100 = arith.subf %1099, %1039 : vector<16x128xf32>
    %1101 = math.exp %1100 : vector<16x128xf32>
    %1102 = arith.addf %1088, %1101 : vector<16x128xf32>
    %cst_732 = arith.constant 4.000000e+00 : f32
    %1103 = vector.broadcast %cst_732 : f32 to vector<16x128xf32>
    %1104 = arith.subf %989, %1103 : vector<16x128xf32>
    %1105 = math.absf %1104 : vector<16x128xf32>
    %cst_733 = arith.constant 1.000000e+00 : f32
    %1106 = vector.broadcast %cst_733 : f32 to vector<16x128xf32>
    %1107 = arith.subf %1106, %1105 : vector<16x128xf32>
    %cst_734 = arith.constant 0.000000e+00 : f32
    %1108 = vector.broadcast %cst_734 : f32 to vector<16x128xf32>
    %1109 = arith.maximumf %1107, %1108 : vector<16x128xf32>
    %1110 = arith.mulf %1109, %1099 : vector<16x128xf32>
    %1111 = arith.addf %1097, %1110 : vector<16x128xf32>
    %c3_735 = arith.constant 3 : index
    %c5_736 = arith.constant 5 : index
    %c0_737 = arith.constant 0 : index
    %c0_738 = arith.constant 0 : index
    %1112 = vector.load %arg3[%c3_735, %c5_736, %c0_737, %c0_738] : memref<4x17x16x128xf32, #tpu.memory_space<vmem>>, vector<1x1x16x128xf32>
    %1113 = vector.shape_cast %1112 : vector<1x1x16x128xf32> to vector<16x128xf32>
    %1114 = arith.subf %1113, %1039 : vector<16x128xf32>
    %1115 = math.exp %1114 : vector<16x128xf32>
    %1116 = arith.addf %1102, %1115 : vector<16x128xf32>
    %cst_739 = arith.constant 5.000000e+00 : f32
    %1117 = vector.broadcast %cst_739 : f32 to vector<16x128xf32>
    %1118 = arith.subf %989, %1117 : vector<16x128xf32>
    %1119 = math.absf %1118 : vector<16x128xf32>
    %cst_740 = arith.constant 1.000000e+00 : f32
    %1120 = vector.broadcast %cst_740 : f32 to vector<16x128xf32>
    %1121 = arith.subf %1120, %1119 : vector<16x128xf32>
    %cst_741 = arith.constant 0.000000e+00 : f32
    %1122 = vector.broadcast %cst_741 : f32 to vector<16x128xf32>
    %1123 = arith.maximumf %1121, %1122 : vector<16x128xf32>
    %1124 = arith.mulf %1123, %1113 : vector<16x128xf32>
    %1125 = arith.addf %1111, %1124 : vector<16x128xf32>
    %c3_742 = arith.constant 3 : index
    %c6_743 = arith.constant 6 : index
    %c0_744 = arith.constant 0 : index
    %c0_745 = arith.constant 0 : index
    %1126 = vector.load %arg3[%c3_742, %c6_743, %c0_744, %c0_745] : memref<4x17x16x128xf32, #tpu.memory_space<vmem>>, vector<1x1x16x128xf32>
    %1127 = vector.shape_cast %1126 : vector<1x1x16x128xf32> to vector<16x128xf32>
    %1128 = arith.subf %1127, %1039 : vector<16x128xf32>
    %1129 = math.exp %1128 : vector<16x128xf32>
    %1130 = arith.addf %1116, %1129 : vector<16x128xf32>
    %cst_746 = arith.constant 6.000000e+00 : f32
    %1131 = vector.broadcast %cst_746 : f32 to vector<16x128xf32>
    %1132 = arith.subf %989, %1131 : vector<16x128xf32>
    %1133 = math.absf %1132 : vector<16x128xf32>
    %cst_747 = arith.constant 1.000000e+00 : f32
    %1134 = vector.broadcast %cst_747 : f32 to vector<16x128xf32>
    %1135 = arith.subf %1134, %1133 : vector<16x128xf32>
    %cst_748 = arith.constant 0.000000e+00 : f32
    %1136 = vector.broadcast %cst_748 : f32 to vector<16x128xf32>
    %1137 = arith.maximumf %1135, %1136 : vector<16x128xf32>
    %1138 = arith.mulf %1137, %1127 : vector<16x128xf32>
    %1139 = arith.addf %1125, %1138 : vector<16x128xf32>
    %c3_749 = arith.constant 3 : index
    %c7_750 = arith.constant 7 : index
    %c0_751 = arith.constant 0 : index
    %c0_752 = arith.constant 0 : index
    %1140 = vector.load %arg3[%c3_749, %c7_750, %c0_751, %c0_752] : memref<4x17x16x128xf32, #tpu.memory_space<vmem>>, vector<1x1x16x128xf32>
    %1141 = vector.shape_cast %1140 : vector<1x1x16x128xf32> to vector<16x128xf32>
    %1142 = arith.subf %1141, %1039 : vector<16x128xf32>
    %1143 = math.exp %1142 : vector<16x128xf32>
    %1144 = arith.addf %1130, %1143 : vector<16x128xf32>
    %cst_753 = arith.constant 7.000000e+00 : f32
    %1145 = vector.broadcast %cst_753 : f32 to vector<16x128xf32>
    %1146 = arith.subf %989, %1145 : vector<16x128xf32>
    %1147 = math.absf %1146 : vector<16x128xf32>
    %cst_754 = arith.constant 1.000000e+00 : f32
    %1148 = vector.broadcast %cst_754 : f32 to vector<16x128xf32>
    %1149 = arith.subf %1148, %1147 : vector<16x128xf32>
    %cst_755 = arith.constant 0.000000e+00 : f32
    %1150 = vector.broadcast %cst_755 : f32 to vector<16x128xf32>
    %1151 = arith.maximumf %1149, %1150 : vector<16x128xf32>
    %1152 = arith.mulf %1151, %1141 : vector<16x128xf32>
    %1153 = arith.addf %1139, %1152 : vector<16x128xf32>
    %c3_756 = arith.constant 3 : index
    %c8_757 = arith.constant 8 : index
    %c0_758 = arith.constant 0 : index
    %c0_759 = arith.constant 0 : index
    %1154 = vector.load %arg3[%c3_756, %c8_757, %c0_758, %c0_759] : memref<4x17x16x128xf32, #tpu.memory_space<vmem>>, vector<1x1x16x128xf32>
    %1155 = vector.shape_cast %1154 : vector<1x1x16x128xf32> to vector<16x128xf32>
    %1156 = arith.subf %1155, %1039 : vector<16x128xf32>
    %1157 = math.exp %1156 : vector<16x128xf32>
    %1158 = arith.addf %1144, %1157 : vector<16x128xf32>
    %cst_760 = arith.constant 8.000000e+00 : f32
    %1159 = vector.broadcast %cst_760 : f32 to vector<16x128xf32>
    %1160 = arith.subf %989, %1159 : vector<16x128xf32>
    %1161 = math.absf %1160 : vector<16x128xf32>
    %cst_761 = arith.constant 1.000000e+00 : f32
    %1162 = vector.broadcast %cst_761 : f32 to vector<16x128xf32>
    %1163 = arith.subf %1162, %1161 : vector<16x128xf32>
    %cst_762 = arith.constant 0.000000e+00 : f32
    %1164 = vector.broadcast %cst_762 : f32 to vector<16x128xf32>
    %1165 = arith.maximumf %1163, %1164 : vector<16x128xf32>
    %1166 = arith.mulf %1165, %1155 : vector<16x128xf32>
    %1167 = arith.addf %1153, %1166 : vector<16x128xf32>
    %c3_763 = arith.constant 3 : index
    %c9_764 = arith.constant 9 : index
    %c0_765 = arith.constant 0 : index
    %c0_766 = arith.constant 0 : index
    %1168 = vector.load %arg3[%c3_763, %c9_764, %c0_765, %c0_766] : memref<4x17x16x128xf32, #tpu.memory_space<vmem>>, vector<1x1x16x128xf32>
    %1169 = vector.shape_cast %1168 : vector<1x1x16x128xf32> to vector<16x128xf32>
    %1170 = arith.subf %1169, %1039 : vector<16x128xf32>
    %1171 = math.exp %1170 : vector<16x128xf32>
    %1172 = arith.addf %1158, %1171 : vector<16x128xf32>
    %cst_767 = arith.constant 9.000000e+00 : f32
    %1173 = vector.broadcast %cst_767 : f32 to vector<16x128xf32>
    %1174 = arith.subf %989, %1173 : vector<16x128xf32>
    %1175 = math.absf %1174 : vector<16x128xf32>
    %cst_768 = arith.constant 1.000000e+00 : f32
    %1176 = vector.broadcast %cst_768 : f32 to vector<16x128xf32>
    %1177 = arith.subf %1176, %1175 : vector<16x128xf32>
    %cst_769 = arith.constant 0.000000e+00 : f32
    %1178 = vector.broadcast %cst_769 : f32 to vector<16x128xf32>
    %1179 = arith.maximumf %1177, %1178 : vector<16x128xf32>
    %1180 = arith.mulf %1179, %1169 : vector<16x128xf32>
    %1181 = arith.addf %1167, %1180 : vector<16x128xf32>
    %c3_770 = arith.constant 3 : index
    %c10_771 = arith.constant 10 : index
    %c0_772 = arith.constant 0 : index
    %c0_773 = arith.constant 0 : index
    %1182 = vector.load %arg3[%c3_770, %c10_771, %c0_772, %c0_773] : memref<4x17x16x128xf32, #tpu.memory_space<vmem>>, vector<1x1x16x128xf32>
    %1183 = vector.shape_cast %1182 : vector<1x1x16x128xf32> to vector<16x128xf32>
    %1184 = arith.subf %1183, %1039 : vector<16x128xf32>
    %1185 = math.exp %1184 : vector<16x128xf32>
    %1186 = arith.addf %1172, %1185 : vector<16x128xf32>
    %cst_774 = arith.constant 1.000000e+01 : f32
    %1187 = vector.broadcast %cst_774 : f32 to vector<16x128xf32>
    %1188 = arith.subf %989, %1187 : vector<16x128xf32>
    %1189 = math.absf %1188 : vector<16x128xf32>
    %cst_775 = arith.constant 1.000000e+00 : f32
    %1190 = vector.broadcast %cst_775 : f32 to vector<16x128xf32>
    %1191 = arith.subf %1190, %1189 : vector<16x128xf32>
    %cst_776 = arith.constant 0.000000e+00 : f32
    %1192 = vector.broadcast %cst_776 : f32 to vector<16x128xf32>
    %1193 = arith.maximumf %1191, %1192 : vector<16x128xf32>
    %1194 = arith.mulf %1193, %1183 : vector<16x128xf32>
    %1195 = arith.addf %1181, %1194 : vector<16x128xf32>
    %c3_777 = arith.constant 3 : index
    %c11_778 = arith.constant 11 : index
    %c0_779 = arith.constant 0 : index
    %c0_780 = arith.constant 0 : index
    %1196 = vector.load %arg3[%c3_777, %c11_778, %c0_779, %c0_780] : memref<4x17x16x128xf32, #tpu.memory_space<vmem>>, vector<1x1x16x128xf32>
    %1197 = vector.shape_cast %1196 : vector<1x1x16x128xf32> to vector<16x128xf32>
    %1198 = arith.subf %1197, %1039 : vector<16x128xf32>
    %1199 = math.exp %1198 : vector<16x128xf32>
    %1200 = arith.addf %1186, %1199 : vector<16x128xf32>
    %cst_781 = arith.constant 1.100000e+01 : f32
    %1201 = vector.broadcast %cst_781 : f32 to vector<16x128xf32>
    %1202 = arith.subf %989, %1201 : vector<16x128xf32>
    %1203 = math.absf %1202 : vector<16x128xf32>
    %cst_782 = arith.constant 1.000000e+00 : f32
    %1204 = vector.broadcast %cst_782 : f32 to vector<16x128xf32>
    %1205 = arith.subf %1204, %1203 : vector<16x128xf32>
    %cst_783 = arith.constant 0.000000e+00 : f32
    %1206 = vector.broadcast %cst_783 : f32 to vector<16x128xf32>
    %1207 = arith.maximumf %1205, %1206 : vector<16x128xf32>
    %1208 = arith.mulf %1207, %1197 : vector<16x128xf32>
    %1209 = arith.addf %1195, %1208 : vector<16x128xf32>
    %c3_784 = arith.constant 3 : index
    %c12_785 = arith.constant 12 : index
    %c0_786 = arith.constant 0 : index
    %c0_787 = arith.constant 0 : index
    %1210 = vector.load %arg3[%c3_784, %c12_785, %c0_786, %c0_787] : memref<4x17x16x128xf32, #tpu.memory_space<vmem>>, vector<1x1x16x128xf32>
    %1211 = vector.shape_cast %1210 : vector<1x1x16x128xf32> to vector<16x128xf32>
    %1212 = arith.subf %1211, %1039 : vector<16x128xf32>
    %1213 = math.exp %1212 : vector<16x128xf32>
    %1214 = arith.addf %1200, %1213 : vector<16x128xf32>
    %cst_788 = arith.constant 1.200000e+01 : f32
    %1215 = vector.broadcast %cst_788 : f32 to vector<16x128xf32>
    %1216 = arith.subf %989, %1215 : vector<16x128xf32>
    %1217 = math.absf %1216 : vector<16x128xf32>
    %cst_789 = arith.constant 1.000000e+00 : f32
    %1218 = vector.broadcast %cst_789 : f32 to vector<16x128xf32>
    %1219 = arith.subf %1218, %1217 : vector<16x128xf32>
    %cst_790 = arith.constant 0.000000e+00 : f32
    %1220 = vector.broadcast %cst_790 : f32 to vector<16x128xf32>
    %1221 = arith.maximumf %1219, %1220 : vector<16x128xf32>
    %1222 = arith.mulf %1221, %1211 : vector<16x128xf32>
    %1223 = arith.addf %1209, %1222 : vector<16x128xf32>
    %c3_791 = arith.constant 3 : index
    %c13_792 = arith.constant 13 : index
    %c0_793 = arith.constant 0 : index
    %c0_794 = arith.constant 0 : index
    %1224 = vector.load %arg3[%c3_791, %c13_792, %c0_793, %c0_794] : memref<4x17x16x128xf32, #tpu.memory_space<vmem>>, vector<1x1x16x128xf32>
    %1225 = vector.shape_cast %1224 : vector<1x1x16x128xf32> to vector<16x128xf32>
    %1226 = arith.subf %1225, %1039 : vector<16x128xf32>
    %1227 = math.exp %1226 : vector<16x128xf32>
    %1228 = arith.addf %1214, %1227 : vector<16x128xf32>
    %cst_795 = arith.constant 1.300000e+01 : f32
    %1229 = vector.broadcast %cst_795 : f32 to vector<16x128xf32>
    %1230 = arith.subf %989, %1229 : vector<16x128xf32>
    %1231 = math.absf %1230 : vector<16x128xf32>
    %cst_796 = arith.constant 1.000000e+00 : f32
    %1232 = vector.broadcast %cst_796 : f32 to vector<16x128xf32>
    %1233 = arith.subf %1232, %1231 : vector<16x128xf32>
    %cst_797 = arith.constant 0.000000e+00 : f32
    %1234 = vector.broadcast %cst_797 : f32 to vector<16x128xf32>
    %1235 = arith.maximumf %1233, %1234 : vector<16x128xf32>
    %1236 = arith.mulf %1235, %1225 : vector<16x128xf32>
    %1237 = arith.addf %1223, %1236 : vector<16x128xf32>
    %c3_798 = arith.constant 3 : index
    %c14_799 = arith.constant 14 : index
    %c0_800 = arith.constant 0 : index
    %c0_801 = arith.constant 0 : index
    %1238 = vector.load %arg3[%c3_798, %c14_799, %c0_800, %c0_801] : memref<4x17x16x128xf32, #tpu.memory_space<vmem>>, vector<1x1x16x128xf32>
    %1239 = vector.shape_cast %1238 : vector<1x1x16x128xf32> to vector<16x128xf32>
    %1240 = arith.subf %1239, %1039 : vector<16x128xf32>
    %1241 = math.exp %1240 : vector<16x128xf32>
    %1242 = arith.addf %1228, %1241 : vector<16x128xf32>
    %cst_802 = arith.constant 1.400000e+01 : f32
    %1243 = vector.broadcast %cst_802 : f32 to vector<16x128xf32>
    %1244 = arith.subf %989, %1243 : vector<16x128xf32>
    %1245 = math.absf %1244 : vector<16x128xf32>
    %cst_803 = arith.constant 1.000000e+00 : f32
    %1246 = vector.broadcast %cst_803 : f32 to vector<16x128xf32>
    %1247 = arith.subf %1246, %1245 : vector<16x128xf32>
    %cst_804 = arith.constant 0.000000e+00 : f32
    %1248 = vector.broadcast %cst_804 : f32 to vector<16x128xf32>
    %1249 = arith.maximumf %1247, %1248 : vector<16x128xf32>
    %1250 = arith.mulf %1249, %1239 : vector<16x128xf32>
    %1251 = arith.addf %1237, %1250 : vector<16x128xf32>
    %c3_805 = arith.constant 3 : index
    %c15_806 = arith.constant 15 : index
    %c0_807 = arith.constant 0 : index
    %c0_808 = arith.constant 0 : index
    %1252 = vector.load %arg3[%c3_805, %c15_806, %c0_807, %c0_808] : memref<4x17x16x128xf32, #tpu.memory_space<vmem>>, vector<1x1x16x128xf32>
    %1253 = vector.shape_cast %1252 : vector<1x1x16x128xf32> to vector<16x128xf32>
    %1254 = arith.subf %1253, %1039 : vector<16x128xf32>
    %1255 = math.exp %1254 : vector<16x128xf32>
    %1256 = arith.addf %1242, %1255 : vector<16x128xf32>
    %cst_809 = arith.constant 1.500000e+01 : f32
    %1257 = vector.broadcast %cst_809 : f32 to vector<16x128xf32>
    %1258 = arith.subf %989, %1257 : vector<16x128xf32>
    %1259 = math.absf %1258 : vector<16x128xf32>
    %cst_810 = arith.constant 1.000000e+00 : f32
    %1260 = vector.broadcast %cst_810 : f32 to vector<16x128xf32>
    %1261 = arith.subf %1260, %1259 : vector<16x128xf32>
    %cst_811 = arith.constant 0.000000e+00 : f32
    %1262 = vector.broadcast %cst_811 : f32 to vector<16x128xf32>
    %1263 = arith.maximumf %1261, %1262 : vector<16x128xf32>
    %1264 = arith.mulf %1263, %1253 : vector<16x128xf32>
    %1265 = arith.addf %1251, %1264 : vector<16x128xf32>
    %c3_812 = arith.constant 3 : index
    %c16_813 = arith.constant 16 : index
    %c0_814 = arith.constant 0 : index
    %c0_815 = arith.constant 0 : index
    %1266 = vector.load %arg3[%c3_812, %c16_813, %c0_814, %c0_815] : memref<4x17x16x128xf32, #tpu.memory_space<vmem>>, vector<1x1x16x128xf32>
    %1267 = vector.shape_cast %1266 : vector<1x1x16x128xf32> to vector<16x128xf32>
    %1268 = arith.subf %1267, %1039 : vector<16x128xf32>
    %1269 = math.exp %1268 : vector<16x128xf32>
    %1270 = arith.addf %1256, %1269 : vector<16x128xf32>
    %cst_816 = arith.constant 1.600000e+01 : f32
    %1271 = vector.broadcast %cst_816 : f32 to vector<16x128xf32>
    %1272 = arith.subf %989, %1271 : vector<16x128xf32>
    %1273 = math.absf %1272 : vector<16x128xf32>
    %cst_817 = arith.constant 1.000000e+00 : f32
    %1274 = vector.broadcast %cst_817 : f32 to vector<16x128xf32>
    %1275 = arith.subf %1274, %1273 : vector<16x128xf32>
    %cst_818 = arith.constant 0.000000e+00 : f32
    %1276 = vector.broadcast %cst_818 : f32 to vector<16x128xf32>
    %1277 = arith.maximumf %1275, %1276 : vector<16x128xf32>
    %1278 = arith.mulf %1277, %1267 : vector<16x128xf32>
    %1279 = arith.addf %1265, %1278 : vector<16x128xf32>
    %c0_819 = arith.constant 0 : index
    %c0_820 = arith.constant 0 : index
    %1280 = vector.load %arg7[%c0_819, %c0_820] : memref<16x128xf32, #tpu.memory_space<vmem>>, vector<16x128xf32>
    %1281 = math.log %1270 : vector<16x128xf32>
    %1282 = arith.addf %1039, %1281 : vector<16x128xf32>
    %1283 = arith.subf %1282, %1279 : vector<16x128xf32>
    %1284 = arith.mulf %1283, %20 : vector<16x128xf32>
    %1285 = arith.addf %1280, %1284 : vector<16x128xf32>
    %c0_821 = arith.constant 0 : index
    %c0_822 = arith.constant 0 : index
    %1286 = vector.load %arg7[%c0_821, %c0_822] : memref<16x128xf32, #tpu.memory_space<vmem>>, vector<16x128xf32>
    tpu.vector_store %arg7[%c0_821, %c0_822], %1285 {strides = array<i32>} : memref<16x128xf32, #tpu.memory_space<vmem>>, vector<16x128xf32>,
    %c0_i32_823 = arith.constant 0 : i32
    %1287 = arith.cmpi eq, %arg1, %c0_i32_823 : i32
    %1288 = arith.extui %1287 : i1 to i32
    %c0_i32_824 = arith.constant 0 : i32
    %1289 = arith.cmpi ne, %1288, %c0_i32_824 : i32
    scf.if %1289 {
      %c0_825 = arith.constant 0 : index
      %c0_826 = arith.constant 0 : index
      %1290 = vector.load %arg6[%c0_825, %c0_826] : memref<16x128xf32, #tpu.memory_space<vmem>>, vector<16x128xf32>
      %1291 = vector.shape_cast %1290 : vector<16x128xf32> to vector<1x16x128xf32>
      %cst_827 = arith.constant dense<0.000000e+00> : vector<1xf32>
      %1292 = vector.multi_reduction <add>, %1291, %cst_827 [1, 2] : vector<1x16x128xf32> to vector<1xf32>
      %1293 = vector.shape_cast %1292 : vector<1xf32> to vector<1x1x1xf32>
      %1294 = vector.extract %1293[0, 0, 0] : f32 from vector<1x1x1xf32>
      %1295 = vector.broadcast %1294 : f32 to vector<1x1x1xf32>
      %c0_828 = arith.constant 0 : index
      %c0_829 = arith.constant 0 : index
      %c0_830 = arith.constant 0 : index
      %1296 = vector.load %arg4[%c0_828, %c0_829, %c0_830] : memref<1x1x1xf32, #tpu.memory_space<vmem>>, vector<1x1x1xf32>
      tpu.vector_store %arg4[%c0_828, %c0_829, %c0_830], %1295 {strides = array<i32>} : memref<1x1x1xf32, #tpu.memory_space<vmem>>, vector<1x1x1xf32>,
      %c0_831 = arith.constant 0 : index
      %c0_832 = arith.constant 0 : index
      %1297 = vector.load %arg7[%c0_831, %c0_832] : memref<16x128xf32, #tpu.memory_space<vmem>>, vector<16x128xf32>
      %1298 = vector.shape_cast %1297 : vector<16x128xf32> to vector<1x16x128xf32>
      %cst_833 = arith.constant dense<0.000000e+00> : vector<1xf32>
      %1299 = vector.multi_reduction <add>, %1298, %cst_833 [1, 2] : vector<1x16x128xf32> to vector<1xf32>
      %1300 = vector.shape_cast %1299 : vector<1xf32> to vector<1x1x1xf32>
      %1301 = vector.extract %1300[0, 0, 0] : f32 from vector<1x1x1xf32>
      %cst_834 = arith.constant 2.500000e-01 : f32
      %1302 = arith.mulf %cst_834, %1301 : f32
      %1303 = vector.broadcast %1302 : f32 to vector<1x1x1xf32>
      %c0_835 = arith.constant 0 : index
      %c0_836 = arith.constant 0 : index
      %c0_837 = arith.constant 0 : index
      %1304 = vector.load %arg5[%c0_835, %c0_836, %c0_837] : memref<1x1x1xf32, #tpu.memory_space<vmem>>, vector<1x1x1xf32>
      tpu.vector_store %arg5[%c0_835, %c0_836, %c0_837], %1303 {strides = array<i32>} : memref<1x1x1xf32, #tpu.memory_space<vmem>>, vector<1x1x1xf32>,
    } else {
    }
    return
  }
  func.func @transform_0(%arg0: i32, %arg1: i32) -> (i32, i32, i32) {
    %c1_i32 = arith.constant 1 : i32
    %0 = arith.muli %arg0, %c1_i32 : i32
    %1 = arith.addi %0, %arg1 : i32
    %c0_i32 = arith.constant 0 : i32
    %c0_i32_0 = arith.constant 0 : i32
    %c0_i32_1 = arith.constant 0 : i32
    return %c0_i32, %1, %c0_i32_0 : i32, i32, i32
  }
  func.func @transform_1(%arg0: i32, %arg1: i32) -> (i32, i32, i32, i32) {
    %c1_i32 = arith.constant 1 : i32
    %0 = arith.muli %arg0, %c1_i32 : i32
    %1 = arith.addi %0, %arg1 : i32
    %c0_i32 = arith.constant 0 : i32
    %c0_i32_0 = arith.constant 0 : i32
    %c0_i32_1 = arith.constant 0 : i32
    %c0_i32_2 = arith.constant 0 : i32
    return %c0_i32, %c0_i32_0, %1, %c0_i32_1 : i32, i32, i32, i32
  }
  func.func @transform_2(%arg0: i32, %arg1: i32) -> (i32, i32, i32) {
    %c0_i32 = arith.constant 0 : i32
    %c0_i32_0 = arith.constant 0 : i32
    %c0_i32_1 = arith.constant 0 : i32
    return %arg0, %c0_i32, %c0_i32_0 : i32, i32, i32
  }
  func.func @transform_3(%arg0: i32, %arg1: i32) -> (i32, i32, i32) {
    %c0_i32 = arith.constant 0 : i32
    %c0_i32_0 = arith.constant 0 : i32
    %c0_i32_1 = arith.constant 0 : i32
    return %arg0, %c0_i32, %c0_i32_0 : i32, i32, i32
  }
}

</mosaic_0001>

<bundles_post_ra>
// kernel: tpu_custom_call.1
= control target key start
LH: loop header
LB: loop body
LE: loop exit
PB: predicated region body
PF: predicated region fallthrough
CT: control target
= control target key end

     0   :  { %9 = vsyncpa [#allocation5], 0  ;;  %s3818_s0 = inlined_call_operand.hbm [shape: f32[11,16,128], index: 0, kind: input, shape index: {}]   ;;  %s3819_s1 = inlined_call_operand.hbm [shape: f32[4,17,16,128], index: 1, kind: input, shape index: {}]   ;;  %s3820_s2 = inlined_call_operand.hbm [shape: f32[1,1,1], index: 2, kind: output, shape index: {0}]   ;;  %s3821_s3 = inlined_call_operand.hbm [shape: f32[1,1,1], index: 3, kind: output, shape index: {1}]  }
   0x1   :  { %10 = vsyncpa [#allocation8], 0 }
   0x2   :  { %11 = vsyncpa [#allocation6], 0 }
   0x3   :  { %12 = vsyncpa [#allocation11], 0  ;;  %s2551_s12 = smov [#allocation4]   ;;  %s2455_s16 = scalar_lea.hbm %s3818_s0, 2816 }
   0x4   :  { %s22_s13 = sshll.u32 %s2551_s12, 4  ;;  %p2456_p0 = scmp.ne.s32.totalorder %s3818_s0, %s2455_s16  ;;  %s23_s13 = int_to_ptr.vmem [resolvable:$true] %s22_s13 }
   0x5   :  { %p2459_p1 = scmp.lt.u32.totalorder %s2455_s16, %s3818_s0 }
   0x7   :  { %p2461_p2 = pnand %p2459_p1, %p2456_p0 }
   0x9   :  { %2464 = shalt.err (!%p2461_p2)
}
   0xa   :  { %s2465_s21 = scalar_lea.vmem %s23_s13, 2816  ;;  %p2470_p4 = scmp.lt.s32.totalorder %s23_s13, %s23_s13 }
   0xb   :  { %p2466_p3 = scmp.ne.s32.totalorder %s23_s13, %s2465_s21  ;;  %p2471_p5 = scmp.lt.s32.totalorder %s2465_s21, %s2465_s21 }
   0xd   :  { %p2472_p6 = por %p2471_p5, %p2470_p4 }
   0xf   :  { %p2473_p7 = pnand %p2472_p6, %p2466_p3 }
  0x11   :  { %2476 = shalt.err (!%p2473_p7)
}
  0x12   :  { %s2552_s22 = smov 128   ;;  %s2553_s23 = smov 8  }
  0x13   :  { %28 = dma.hbm_to_vmem [thread:$0]  %s3818_s0, 2816, %s23_s13, [#allocation5], %s2552_s22, %s2552_s22, %s2553_s23  }
  0x14   :  { %s2554_s26 = smov [#allocation7]   ;;  %s2477_s30 = scalar_lea.hbm %s3819_s1, 17408 }
  0x15   :  { %s38_s27 = sshll.u32 %s2554_s26, 4  ;;  %p2478_p8 = scmp.ne.s32.totalorder %s3819_s1, %s2477_s30  ;;  %s39_s27 = int_to_ptr.vmem [resolvable:$true] %s38_s27 }
  0x16   :  { %p2481_p9 = scmp.lt.u32.totalorder %s2477_s30, %s3819_s1 }
  0x18   :  { %p2483_p10 = pnand %p2481_p9, %p2478_p8 }
  0x1a   :  { %2486 = shalt.err (!%p2483_p10)
}
  0x1b   :  { %s2487_s8 = scalar_lea.vmem %s39_s27, 17408  ;;  %p2492_p12 = scmp.lt.s32.totalorder %s39_s27, %s39_s27 }
  0x1c   :  { %p2488_p11 = scmp.ne.s32.totalorder %s39_s27, %s2487_s8  ;;  %p2493_p13 = scmp.lt.s32.totalorder %s2487_s8, %s2487_s8 }
  0x1e   :  { %p2494_p0 = por %p2493_p13, %p2492_p12 }
  0x20   :  { %p2495_p1 = pnand %p2494_p0, %p2488_p11 }
  0x22   :  { %2498 = shalt.err (!%p2495_p1)
}
  0x23   :  { %44 = dma.hbm_to_vmem [thread:$0]  %s3819_s1, 17408, %s39_s27, [#allocation8], %s2552_s22, %s2552_s22, %s2553_s23  }
  0x24   :  { %2543 = dma.done.wait [#allocation5], 2816  }
  0x25   :  { %2544 = vsyncadd [#allocation5], 4294964480 }
  0x26   :  { %2545 = dma.done.wait [#allocation8], 17408  }
  0x27   :  { %2546 = vsyncadd [#allocation8], 4294949888  ;;  %v63_v0 = vld [vmem:[#allocation4] sm:$0xff]  ;;  %v64_v1 = vld [vmem:[#allocation4 + $0x8] sm:$0xff]  ;;  %vm1968_vm0 = vcmask 0   ;;  %s2555_s10 = smov [#allocation9]  }
  0x28   :  { %v2601_v2 = vld [vmem:[#allocation4 + $0x10] sm:$0xff]  ;;  %v2603_v3 = vld [vmem:[#allocation4 + $0x18] sm:$0xff]  ;;  %v69_v4 = vld [vmem:[#allocation4 + $0x20] sm:$0xff]  ;;  %s1991_s11 = sshll.u32 %s2555_s10, 4  ;;  %s1992_s11 = int_to_ptr.vmem [resolvable:$true] %s1991_s11 }
  0x29   :  { %v70_v5 = vld [vmem:[#allocation4 + $0x28] sm:$0xff]  ;;  %v72_v6 = vld [vmem:[#allocation4 + $0x30] sm:$0xff]  ;;  %v73_v7 = vld [vmem:[#allocation4 + $0x38] sm:$0xff]  ;;  %v107_v9 = vsub.f32 %v69_v4, %v63_v0  ;;  %s2499_s12 = scalar_lea.vmem %s1992_s11, 16  ;;  %s2503_s13 = scalar_lea.vmem %s1992_s11, 32 }
  0x2a   :  { %v2605_v8 = vld [vmem:[#allocation4 + $0x40] sm:$0xff]  ;;  %v108_v10 = vsub.f32 %v70_v5, %v64_v1  ;;  %v2607_v11 = vld [vmem:[#allocation4 + $0x48] sm:$0xff]  ;;  %v2609_v12 = vld [vmem:[#allocation4 + $0x50] sm:$0xff]  ;;  %v109_v15 = vsub.f32 %v72_v6, %v2601_v2  ;;  %v110_v16 = vsub.f32 %v73_v7, %v2603_v3  ;;  %p2500_p2 = scmp.ne.s32.totalorder %s1992_s11, %s2499_s12  ;;  %p2504_p3 = scmp.lt.s32.totalorder %s1992_s11, %s1992_s11 }
  0x2b   :  { %v2611_v13 = vld [vmem:[#allocation4 + $0x58] sm:$0xff]  ;;  %v91_v14 = vmax.f32 %v63_v0, %v2605_v8  ;;  %v131_v17 = vmin.f32 %v63_v0, %v2605_v8  ;;  %v81_v18 = vld [vmem:[#allocation4 + $0x60] sm:$0xff]  ;;  %v82_v19 = vld [vmem:[#allocation4 + $0x68] sm:$0xff]  ;;  %v92_v21 = vmax.f32 %v64_v1, %v2607_v11  ;;  %v99_v22 = vmax.f32 %v2601_v2, %v2609_v12  ;;  %p2505_p4 = scmp.lt.s32.totalorder %s2503_s13, %s2499_s12 }
  0x2c   :  { %v84_v20 = vld [vmem:[#allocation4 + $0x70] sm:$0xff]  ;;  %v100_v23 = vmax.f32 %v2603_v3, %v2611_v13  ;;  %v132_v24 = vmin.f32 %v64_v1, %v2607_v11  ;;  %v85_v25 = vld [vmem:[#allocation4 + $0x78] sm:$0xff]  ;;  %v89_v26 = vmin.f32 %v69_v4, %v81_v18  ;;  %v90_v27 = vmin.f32 %v70_v5, %v82_v19  ;;  %v2629_v51 = vld [vmem:[#allocation7 + $0x10] sm:$0xff] }
  0x2d   :  { %v97_v28 = vmin.f32 %v72_v6, %v84_v20  ;;  %v111_v29 = vmul.f32 %v109_v15, %v107_v9  ;;  %v98_v30 = vmin.f32 %v73_v7, %v85_v25  ;;  %v112_v31 = vmul.f32 %v110_v16, %v108_v10  ;;  %v2627_v50 = vld [vmem:[#allocation7] sm:$0xff]  ;;  %v2633_v56 = vld [vmem:[#allocation7 + $0x8] sm:$0xff]  ;;  %v2635_v57 = vld [vmem:[#allocation7 + $0x18] sm:$0xff]  ;;  %p2506_p5 = por %p2505_p4, %p2504_p3 }
  0x2e   :  { %v113_v32 = vsub.f32 %v81_v18, %v2605_v8  ;;  %v114_v33 = vsub.f32 %v82_v19, %v2607_v11  ;;  %v93_v34 = vsub.f32 %v89_v26, %v91_v14  ;;  %v94_v35 = vsub.f32 %v90_v27, %v92_v21  ;;  %v2643_v62 = vld [vmem:[#allocation7 + $0x20] sm:$0xff]  ;;  %v2648_v1 = vld [vmem:[#allocation7 + $0x28] sm:$0xff]  ;;  %v2656_v10 = vld [vmem:[#allocation7 + $0x38] sm:$0xff] }
  0x2f   :  { %v101_v36 = vsub.f32 %v97_v28, %v99_v22  ;;  %v115_v37 = vsub.f32 %v84_v20, %v2609_v12  ;;  %v102_v38 = vsub.f32 %v98_v30, %v100_v23  ;;  %v116_v39 = vsub.f32 %v85_v25, %v2611_v13  ;;  %v164_v23 = vld [vmem:[#allocation4 + $0x80] sm:$0xff]  ;;  %v2668_v27 = vld [vmem:[#allocation7 + $0x58] sm:$0xff]  ;;  %p2507_p6 = pnand %p2506_p5, %p2500_p2 }
  0x30   :  { %v129_v40 = vmax.f32 %v69_v4, %v81_v18  ;;  %v130_v41 = vmax.f32 %v70_v5, %v82_v19  ;;  %v95_v42 = vmax.f32 %v93_v34, 0.0  ;;  %v96_v43 = vmax.f32 %v94_v35, 0.0  ;;  %v2659_v18 = vld [vmem:[#allocation7 + $0x40] sm:$0xff]  ;;  %v2678_v35 = vld [vmem:[#allocation7 + $0x70] sm:$0xff] }
  0x31   :  { %v103_v44 = vmax.f32 %v101_v36, 0.0  ;;  %v117_v45 = vmul.f32 %v115_v37, %v113_v32  ;;  %v104_v46 = vmax.f32 %v102_v38, 0.0  ;;  %v118_v47 = vmul.f32 %v116_v39, %v114_v33  ;;  %v2675_v32 = vld [vmem:[#allocation7 + $0x68] sm:$0xff]  ;;  %v165_v33 = vld [vmem:[#allocation4 + $0x88] sm:$0xff]  ;;  %v2684_v39 = vld [vmem:[#allocation7 + $0x80] sm:$0xff] }
  0x32   :  { %v133_v48 = vsub.f32 %v129_v40, %v131_v17  ;;  %v134_v49 = vsub.f32 %v130_v41, %v132_v24  ;;  %v135_v54 = vmax.f32 %v72_v6, %v84_v20  ;;  %v136_v55 = vmax.f32 %v73_v7, %v85_v25  ;;  %v2662_v20 = vld [vmem:[#allocation7 + $0x48] sm:$0xff]  ;;  %v2665_v25 = vld [vmem:[#allocation7 + $0x50] sm:$0xff]  ;;  %v2681_v37 = vld [vmem:[#allocation7 + $0x78] sm:$0xff] }
  0x33   :  { %v2631_v52 = vmul.f32 %v103_v44, %v95_v42  ;;  %v119_v53 = vadd.f32 %v117_v45, %v111_v29  ;;  %v2637_v58 = vmul.f32 %v104_v46, %v96_v43  ;;  %v120_v59 = vadd.f32 %v118_v47, %v112_v31  ;;  %v2671_v29 = vld [vmem:[#allocation7 + $0x60] sm:$0xff]  ;;  %v2688_v42 = vld [vmem:[#allocation7 + $0x88] sm:$0xff]  ;;  %v2691_v44 = vld [vmem:[#allocation7 + $0x90] sm:$0xff] }
  0x34   :  { %v137_v60 = vmin.f32 %v2601_v2, %v2609_v12  ;;  %v138_v61 = vmin.f32 %v2603_v3, %v2611_v13  ;;  %v179_v0 = vmax.f32 %v2627_v50, %v2629_v51  ;;  %v180_v7 = vmax.f32 %v2633_v56, %v2635_v57  ;;  %v2653_v2 = vld [vmem:[#allocation7 + $0x30] sm:$0xff] }
  0x35   :  { %v121_v63 = vsub.f32 %v119_v53, %v2631_v52  ;;  %v122_v4 = vsub.f32 %v120_v59, %v2637_v58  ;;  %v168_v30 = vsub.f32 %v164_v23, %v2605_v8  ;;  %v169_v40 = vsub.f32 %v165_v33, %v2607_v11  ;;  %v2697_v11 = vld [vmem:[#allocation7 + $0xa0] sm:$0xff]  ;;  %v87_v23 = vld [vmem:[#allocation4 + $0xa0] sm:$0xff] }
  0x36   :  { %v139_v5 = vsub.f32 %v135_v54, %v137_v60  ;;  %v140_v6 = vsub.f32 %v136_v55, %v138_v61  ;;  %v184_v3 = vmax.f32 %v179_v0, %v2643_v62  ;;  %v185_v17 = vmax.f32 %v180_v7, %v2648_v1 }
  0x37   :  { %v123_v9 = vadd.f32 1e-09, %v121_v63  ;;  %v124_v14 = vadd.f32 1e-09, %v122_v4  ;;  %v170_v8 = vmax.f32 %v168_v30, 0.0  ;;  %v171_v59 = vmax.f32 %v169_v40, 0.0 }
  0x38   :  { %v141_v15 = vmul.f32 %v139_v5, %v133_v48  ;;  %v142_v16 = vmul.f32 %v140_v6, %v134_v49  ;;  %v189_v19 = vmax.f32 %v184_v3, %v2653_v2  ;;  %v190_v24 = vmax.f32 %v185_v17, %v2656_v10  ;;  %v2694_v48 = vld [vmem:[#allocation7 + $0x98] sm:$0xff]  ;;  %v2703_v63 = vld [vmem:[#allocation7 + $0xa8] sm:$0xff]  ;;  %v2707_v6 = vld [vmem:[#allocation7 + $0xb0] sm:$0xff] }
  0x39   :  { %2153 = vrcp.f32 %v123_v9  ;;  %v2700_v60 = vmin.f32 %v170_v8, 15.99  ;;  %v88_v30 = vld [vmem:[#allocation4 + $0xa8] sm:$0xff]  ;;  %v2728_v40 = vld [vmem:[#allocation7 + $0xe0] sm:$0xff] }
  0x3a   :  { %2155 = vrcp.f32 %v124_v14  ;;  %v143_v21 = vadd.f32 1e-09, %v141_v15  ;;  %v144_v22 = vadd.f32 1e-09, %v142_v16  ;;  %v194_v26 = vmax.f32 %v189_v19, %v2659_v18  ;;  %v2713_v16 = vld [vmem:[#allocation7 + $0xc0] sm:$0xff] }
  0x3b   :  { %v195_v28 = vmax.f32 %v190_v24, %v2662_v20  ;;  %v2715_v19 = vmin.f32 %v171_v59, 15.99  ;;  %v264_v8 = vand.u32 2147483647, %v2700_v60 }
  0x3c   :  { %2157 = vrcp.f32 %v143_v21  ;;  %v199_v31 = vmax.f32 %v194_v26, %v2665_v25  ;;  %v145_v46 = vsub.f32 %v143_v21, %v123_v9  ;;  %v146_v53 = vsub.f32 %v144_v22, %v124_v14  ;;  %v2710_v14 = vld [vmem:[#allocation7 + $0xb8] sm:$0xff]  ;;  %v2718_v21 = vld [vmem:[#allocation7 + $0xc8] sm:$0xff] }
  0x3d   :  { %2159 = vrcp.f32 %v144_v22  ;;  %v200_v34 = vmax.f32 %v195_v28, %v2668_v27  ;;  %v2015_v22 = vadd.f32 -1.0, %v2700_v60  ;;  %v2722_v28 = vld [vmem:[#allocation7 + $0xd0] sm:$0xff]  ;;  %v2018_v59 = vadd.f32 -2.0, %v2715_v19 }
  0x3e   :  { %v204_v36 = vmax.f32 %v199_v31, %v2671_v29 }
  0x3f   :  { %v205_v38 = vmax.f32 %v200_v34, %v2675_v32  ;;  %v2725_v34 = vld [vmem:[#allocation7 + $0xd8] sm:$0xff] }
  0x40   :  { %v209_v41 = vmax.f32 %v204_v36, %v2678_v35 }
  0x41   :  { %v210_v43 = vmax.f32 %v205_v38, %v2681_v37 }
  0x42   :  { %v214_v47 = vmax.f32 %v209_v41, %v2684_v39 }
  0x43   :  { %v2154_v45 = vpop.eup %2153  ;;  %v215_v54 = vmax.f32 %v210_v43, %v2688_v42 }
  0x44   :  { %v2156_v49 = vpop.eup %2155  ;;  %v127_v55 = vmul.f32 %v2154_v45, %v2631_v52  ;;  %v219_v61 = vmax.f32 %v214_v47, %v2691_v44  ;;  %v2732_v45 = vld [vmem:[#allocation7 + $0xe8] sm:$0xff]  ;;  %v284_v47 = vand.u32 2147483647, %v2015_v22 }
  0x45   :  { %v128_v4 = vmul.f32 %v2156_v49, %v2637_v58  ;;  %v220_v5 = vmax.f32 %v215_v54, %v2694_v48  ;;  %v2736_v54 = vld [vmem:[#allocation7 + $0xf0] sm:$0xff] }
  0x46   :  { %v2158_v0 = vpop.eup %2157  ;;  %v224_v3 = vmax.f32 %v219_v61, %v2697_v11 }
  0x47   :  { %v2160_v7 = vpop.eup %2159  ;;  %v149_v9 = vmul.f32 %v2158_v0, %v145_v46  ;;  %v225_v15 = vmax.f32 %v220_v5, %v2703_v63  ;;  %v2016_v46 = vadd.f32 -1.0, %v2715_v19  ;;  %v2741_v0 = vld [vmem:[#allocation7 + $0xf8] sm:$0xff] }
  0x48   :  { %v150_v52 = vmul.f32 %v2160_v7, %v146_v53  ;;  %v229_v58 = vmax.f32 %v224_v3, %v2707_v6  ;;  %v2744_v7 = vld [vmem:[#allocation7 + $0x100] sm:$0xff] }
  0x49   :  { %v151_v17 = vsub.f32 %v127_v55, %v149_v9  ;;  %v230_v26 = vmax.f32 %v225_v15, %v2710_v14  ;;  %v2017_v55 = vadd.f32 -2.0, %v2700_v60  ;;  %v265_v9 = vand.u32 2147483647, %v2715_v19 }
  0x4a   :  { %v152_v24 = vsub.f32 %v128_v4, %v150_v52  ;;  %v234_v33 = vmax.f32 %v229_v58, %v2713_v16  ;;  %v2748_v52 = vld [vmem:[#allocation7 + $0x108] sm:$0xff]  ;;  %v266_v15 = vsub.f32 1.0, %v264_v8  ;;  %v286_v58 = vsub.f32 1.0, %v284_v47 }
  0x4b   :  { %v155_v31 = vsub.f32 1.0, %v151_v17  ;;  %v235_v38 = vmax.f32 %v230_v26, %v2718_v21  ;;  %v285_v17 = vand.u32 2147483647, %v2016_v46  ;;  %v2020_v47 = vadd.f32 -3.0, %v2715_v19 }
  0x4c   :  { %v156_v36 = vsub.f32 1.0, %v152_v24  ;;  %v239_v43 = vmax.f32 %v234_v33, %v2722_v28  ;;  %v305_v24 = vand.u32 2147483647, %v2018_v59  ;;  %v2019_v33 = vadd.f32 -3.0, %v2700_v60 }
  0x4d   :  { %v157_v41 = vmul.f32 %v155_v31, %v87_v23  ;;  %v240_v53 = vmax.f32 %v235_v38, %v2725_v34  ;;  %v304_v23 = vand.u32 2147483647, %v2017_v55  ;;  %v267_v31 = vsub.f32 1.0, %v265_v9 }
  0x4e   :  { %v158_v49 = vmul.f32 %v156_v36, %v88_v30  ;;  %v244_v61 = vmax.f32 %v239_v43, %v2728_v40  ;;  %v268_v36 = vmax.f32 %v266_v15, 0.0  ;;  %v287_v38 = vsub.f32 1.0, %v285_v17 }
  0x4f   :  { %v245_v5 = vmax.f32 %v240_v53, %v2732_v45  ;;  %v306_v8 = vsub.f32 1.0, %v304_v23  ;;  %v307_v43 = vsub.f32 1.0, %v305_v24  ;;  %v269_v53 = vmax.f32 %v267_v31, 0.0 }
  0x50   :  { %v1957_v4 = vadd.f32 %v158_v49, %v157_v41  ;;  %v249_v3 = vmax.f32 %v244_v61, %v2736_v54  ;;  %v288_v41 = vmax.f32 %v286_v58, 0.0  ;;  %v324_v55 = vand.u32 2147483647, %v2019_v33 }
  0x51   :  { %v250_v22 = vmax.f32 %v245_v5, %v2741_v0  ;;  %v270_v59 = vmul.f32 %v268_v36, %v2627_v50  ;;  %v309_v15 = vmax.f32 %v307_v43, 0.0  ;;  %v325_v58 = vand.u32 2147483647, %v2020_v47 }
  0x52   :  { %1958 = vadd.xlane.f32.xlu0 %v1957_v4  ;;  %v2752_v26 = vmax.f32 %v249_v3, %v2744_v7  ;;  %v289_v4 = vmax.f32 %v287_v38, 0.0  ;;  %v290_v5 = vmul.f32 %v288_v41, %v2629_v51  ;;  %v308_v3 = vmax.f32 %v306_v8, 0.0 }
  0x53   :  { %v2755_v30 = vmax.f32 %v250_v22, %v2748_v52  ;;  %v2021_v22 = vadd.f32 -4.0, %v2700_v60  ;;  %v271_v24 = vmul.f32 %v269_v53, %v2633_v56  ;;  %v326_v31 = vsub.f32 1.0, %v324_v55 }
  0x54   :  { %3856 = vst [vmem:[#allocation16_spill] sm:$0xff] %v2752_v26  ;;  %v256_v46 = vsub.f32 %v2627_v50, %v2752_v26  ;;  %v274_v61 = vsub.f32 %v2629_v51, %v2752_v26  ;;  %v2022_v50 = vadd.f32 -4.0, %v2715_v19  ;;  %v291_v36 = vmul.f32 %v289_v4, %v2635_v57 }
  0x55   :  { %3857 = vst [vmem:[#allocation17_spill] sm:$0xff] %v2755_v30  ;;  %v257_v49 = vsub.f32 %v2633_v56, %v2755_v30  ;;  %v275_v9 = vsub.f32 %v2635_v57, %v2755_v30  ;;  %v292_v38 = vadd.f32 %v290_v5, %v270_v59  ;;  %v294_v51 = vsub.f32 %v2643_v62, %v2752_v26 }
  0x56   :  { %v258_v17 = vmul.f32 1.442695, %v256_v46  ;;  %v276_v33 = vmul.f32 1.442695, %v274_v61  ;;  %v295_v8 = vsub.f32 %v2648_v1, %v2755_v30  ;;  %v310_v43 = vmul.f32 %v308_v3, %v2643_v62 }
  0x57   :  { %v260_v23 = vmul.f32 1.442695, %v257_v49  ;;  %v278_v41 = vmul.f32 1.442695, %v275_v9  ;;  %v311_v46 = vmul.f32 %v309_v15, %v2648_v1  ;;  %v327_v56 = vsub.f32 1.0, %v325_v58 }
  0x58   :  { %2161 = vpow2.f32 %v258_v17  ;;  %v344_v47 = vand.u32 2147483647, %v2021_v22  ;;  %v2023_v49 = vadd.f32 -5.0, %v2700_v60  ;;  %v328_v53 = vmax.f32 %v326_v31, 0.0 }
  0x59   :  { %2163 = vpow2.f32 %v260_v23  ;;  %v345_v57 = vand.u32 2147483647, %v2022_v50  ;;  %v2024_v55 = vadd.f32 -5.0, %v2715_v19  ;;  %v293_v59 = vadd.f32 %v291_v36, %v271_v24 }
  0x5a   :  { %2165 = vpow2.f32 %v276_v33  ;;  %v296_v61 = vmul.f32 1.442695, %v294_v51  ;;  %v314_v4 = vsub.f32 %v2653_v2, %v2752_v26  ;;  %v298_v62 = vmul.f32 1.442695, %v295_v8 }
  0x5b   :  { %2167 = vpow2.f32 %v278_v41  ;;  %v312_v5 = vadd.f32 %v310_v43, %v292_v38  ;;  %v315_v1 = vsub.f32 %v2656_v10, %v2755_v30  ;;  %v329_v9 = vmax.f32 %v327_v56, 0.0 }
  0x5c   :  { %v346_v3 = vsub.f32 1.0, %v344_v47  ;;  %v364_v15 = vand.u32 2147483647, %v2023_v49  ;;  %v2025_v17 = vadd.f32 -6.0, %v2700_v60  ;;  %v330_v58 = vmul.f32 %v328_v53, %v2653_v2 }
  0x5d   :  { %v347_v22 = vsub.f32 1.0, %v345_v57  ;;  %v365_v23 = vand.u32 2147483647, %v2024_v55  ;;  %v2026_v24 = vadd.f32 -6.0, %v2715_v19  ;;  %2169 = vpow2.f32 %v296_v61 }
  0x5e   :  { %v316_v31 = vmul.f32 1.442695, %v314_v4  ;;  %v334_v50 = vsub.f32 %v2659_v18, %v2752_v26  ;;  %2171 = vpow2.f32 %v298_v62  ;;  %v313_v33 = vadd.f32 %v311_v46, %v293_v59 }
  0x5f   :  { %v318_v36 = vmul.f32 1.442695, %v315_v1  ;;  %v335_v38 = vsub.f32 %v2662_v20, %v2755_v30  ;;  %v331_v51 = vmul.f32 %v329_v9, %v2656_v10  ;;  %v348_v41 = vmax.f32 %v346_v3, 0.0 }
  0x60   :  { %v366_v8 = vsub.f32 1.0, %v364_v15  ;;  %v384_v2 = vand.u32 2147483647, %v2025_v17  ;;  %v332_v43 = vadd.f32 %v330_v58, %v312_v5  ;;  %v349_v56 = vmax.f32 %v347_v22, 0.0 }
  0x61   :  { %v367_v47 = vsub.f32 1.0, %v365_v23  ;;  %v385_v49 = vand.u32 2147483647, %v2026_v24  ;;  %2173 = vpow2.f32 %v316_v31  ;;  %v336_v57 = vmul.f32 1.442695, %v334_v50 }
  0x62   :  { %v2162_v53 = vpop.eup %2161  ;;  %v354_v55 = vsub.f32 %v2665_v25, %v2752_v26  ;;  %v2027_v46 = vadd.f32 -7.0, %v2700_v60  ;;  %2175 = vpow2.f32 %v318_v36  ;;  %v338_v61 = vmul.f32 1.442695, %v335_v38 }
  0x63   :  { %v2164_v59 = vpop.eup %2163  ;;  %v355_v10 = vsub.f32 %v2668_v27, %v2755_v30  ;;  %v2028_v4 = vadd.f32 -7.0, %v2715_v19  ;;  %v333_v5 = vadd.f32 %v331_v51, %v313_v33  ;;  %v350_v1 = vmul.f32 %v348_v41, %v2659_v18 }
  0x64   :  { %v2166_v62 = vpop.eup %2165  ;;  %v368_v9 = vmax.f32 %v366_v8, 0.0  ;;  %v386_v3 = vsub.f32 1.0, %v384_v2  ;;  %v351_v17 = vmul.f32 %v349_v56, %v2662_v20  ;;  %v369_v58 = vmax.f32 %v367_v47, 0.0 }
  0x65   :  { %v2168_v15 = vpop.eup %2167  ;;  %v374_v22 = vsub.f32 %v2671_v29, %v2752_v26  ;;  %v387_v23 = vsub.f32 1.0, %v385_v49  ;;  %2177 = vpow2.f32 %v336_v57  ;;  %v356_v24 = vmul.f32 1.442695, %v354_v55 }
  0x66   :  { %v375_v31 = vsub.f32 %v2675_v32, %v2755_v30  ;;  %v404_v50 = vand.u32 2147483647, %v2027_v46  ;;  %v280_v36 = vadd.f32 %v2166_v62, %v2162_v53  ;;  %2179 = vpow2.f32 %v338_v61 }
  0x67   :  { %v358_v33 = vmul.f32 1.442695, %v355_v10  ;;  %v405_v18 = vand.u32 2147483647, %v2028_v4  ;;  %v2170_v38 = vpop.eup %2169  ;;  %v281_v51 = vadd.f32 %v2168_v15, %v2164_v59  ;;  %v352_v41 = vadd.f32 %v350_v1, %v332_v43 }
  0x68   :  { %v370_v20 = vmul.f32 %v368_v9, %v2665_v25  ;;  %v388_v8 = vmax.f32 %v386_v3, 0.0  ;;  %v2172_v2 = vpop.eup %2171  ;;  %v353_v56 = vadd.f32 %v351_v17, %v333_v5  ;;  %v371_v47 = vmul.f32 %v369_v58, %v2668_v27 }
  0x69   :  { %v376_v49 = vmul.f32 1.442695, %v374_v22  ;;  %v389_v57 = vmax.f32 %v387_v23, 0.0  ;;  %2181 = vpow2.f32 %v356_v24  ;;  %v378_v55 = vmul.f32 1.442695, %v375_v31 }
  0x6a   :  { %v394_v53 = vsub.f32 %v2678_v35, %v2752_v26  ;;  %v406_v46 = vsub.f32 1.0, %v404_v50  ;;  %v300_v61 = vadd.f32 %v2170_v38, %v280_v36  ;;  %2183 = vpow2.f32 %v358_v33 }
  0x6b   :  { %v395_v43 = vsub.f32 %v2681_v37, %v2755_v30  ;;  %v407_v59 = vsub.f32 1.0, %v405_v18  ;;  %v2174_v25 = vpop.eup %2173  ;;  %v301_v10 = vadd.f32 %v2172_v2, %v281_v51  ;;  %v372_v4 = vadd.f32 %v370_v20, %v352_v41 }
  0x6c   :  { %v390_v62 = vmul.f32 %v388_v8, %v2671_v29  ;;  %v2029_v27 = vadd.f32 -8.0, %v2700_v60  ;;  %v2176_v5 = vpop.eup %2175  ;;  %v373_v1 = vadd.f32 %v371_v47, %v353_v56  ;;  %v391_v9 = vmul.f32 %v389_v57, %v2675_v32 }
  0x6d   :  { %v414_v3 = vsub.f32 %v2684_v39, %v2752_v26  ;;  %v2030_v15 = vadd.f32 -8.0, %v2715_v19  ;;  %2185 = vpow2.f32 %v376_v49  ;;  %v396_v17 = vmul.f32 1.442695, %v394_v53 }
  0x6e   :  { %v408_v58 = vmax.f32 %v406_v46, 0.0  ;;  %v415_v22 = vsub.f32 %v2688_v42, %v2755_v30  ;;  %v320_v23 = vadd.f32 %v2174_v25, %v300_v61  ;;  %2187 = vpow2.f32 %v378_v55 }
  0x6f   :  { %v398_v29 = vmul.f32 1.442695, %v395_v43  ;;  %v409_v24 = vmax.f32 %v407_v59, 0.0  ;;  %v2178_v31 = vpop.eup %2177  ;;  %v321_v50 = vadd.f32 %v2176_v5, %v301_v10  ;;  %v392_v36 = vadd.f32 %v390_v62, %v372_v4 }
  0x70   :  { %v424_v33 = vand.u32 2147483647, %v2029_v27  ;;  %v2031_v32 = vadd.f32 -9.0, %v2700_v60  ;;  %v2180_v18 = vpop.eup %2179  ;;  %v393_v38 = vadd.f32 %v391_v9, %v373_v1  ;;  %v416_v51 = vmul.f32 1.442695, %v414_v3 }
  0x71   :  { %v425_v41 = vand.u32 2147483647, %v2030_v15  ;;  %v2032_v20 = vadd.f32 -9.0, %v2715_v19  ;;  %2189 = vpow2.f32 %v396_v17  ;;  %v410_v8 = vmul.f32 %v408_v58, %v2678_v35 }
  0x72   :  { %v418_v2 = vmul.f32 1.442695, %v415_v22  ;;  %v434_v56 = vsub.f32 %v2691_v44, %v2752_v26  ;;  %v340_v47 = vadd.f32 %v2178_v31, %v320_v23  ;;  %2191 = vpow2.f32 %v398_v29 }
  0x73   :  { %v411_v49 = vmul.f32 %v409_v24, %v2681_v37  ;;  %v435_v57 = vsub.f32 %v2694_v48, %v2755_v30  ;;  %v2182_v55 = vpop.eup %2181  ;;  %v341_v53 = vadd.f32 %v2180_v18, %v321_v50  ;;  %v426_v46 = vsub.f32 1.0, %v424_v33 }
  0x74   :  { %v444_v61 = vand.u32 2147483647, %v2031_v32  ;;  %v2033_v43 = vadd.f32 -10.0, %v2700_v60  ;;  %v2184_v59 = vpop.eup %2183  ;;  %2193 = vpow2.f32 %v416_v51  ;;  %v427_v35 = vsub.f32 1.0, %v425_v41 }
  0x75   :  { %v445_v25 = vand.u32 2147483647, %v2032_v20  ;;  %v454_v10 = vsub.f32 %v2697_v11, %v2752_v26  ;;  %v412_v4 = vadd.f32 %v410_v8, %v392_v36  ;;  %2195 = vpow2.f32 %v418_v2 }
  0x76   :  { %v436_v62 = vmul.f32 1.442695, %v434_v56  ;;  %v2034_v37 = vadd.f32 -10.0, %v2715_v19  ;;  %v360_v27 = vadd.f32 %v2182_v55, %v340_v47  ;;  %v413_v5 = vadd.f32 %v411_v49, %v393_v38 }
  0x77   :  { %v438_v1 = vmul.f32 1.442695, %v435_v57  ;;  %v455_v9 = vsub.f32 %v2703_v63, %v2755_v30  ;;  %v2186_v3 = vpop.eup %2185  ;;  %v361_v15 = vadd.f32 %v2184_v59, %v341_v53  ;;  %v428_v17 = vmax.f32 %v426_v46, 0.0 }
  0x78   :  { %v446_v58 = vsub.f32 1.0, %v444_v61  ;;  %v464_v22 = vand.u32 2147483647, %v2033_v43  ;;  %v2188_v23 = vpop.eup %2187  ;;  %v429_v29 = vmax.f32 %v427_v35, 0.0  ;;  %v447_v24 = vsub.f32 1.0, %v445_v25 }
  0x79   :  { %v456_v31 = vmul.f32 1.442695, %v454_v10  ;;  %v2035_v50 = vadd.f32 -11.0, %v2700_v60  ;;  %2197 = vpow2.f32 %v436_v62  ;;  %v465_v36 = vand.u32 2147483647, %v2034_v37 }
  0x7a   :  { %v474_v33 = vsub.f32 %v2707_v6, %v2752_v26  ;;  %v2036_v32 = vadd.f32 -11.0, %v2715_v19  ;;  %v380_v18 = vadd.f32 %v2186_v3, %v360_v27  ;;  %2199 = vpow2.f32 %v438_v1 }
  0x7b   :  { %v458_v38 = vmul.f32 1.442695, %v455_v9  ;;  %v475_v51 = vsub.f32 %v2710_v14, %v2755_v30  ;;  %v2190_v41 = vpop.eup %2189  ;;  %v381_v20 = vadd.f32 %v2188_v23, %v361_v15  ;;  %v430_v8 = vmul.f32 %v428_v17, %v2684_v39 }
  0x7c   :  { %v448_v2 = vmax.f32 %v446_v58, 0.0  ;;  %v466_v56 = vsub.f32 1.0, %v464_v22  ;;  %v2192_v47 = vpop.eup %2191  ;;  %v431_v49 = vmul.f32 %v429_v29, %v2688_v42  ;;  %v449_v57 = vmax.f32 %v447_v24, 0.0 }
  0x7d   :  { %2201 = vpow2.f32 %v456_v31  ;;  %v484_v55 = vand.u32 2147483647, %v2035_v50  ;;  %v467_v53 = vsub.f32 1.0, %v465_v36  ;;  %v476_v46 = vmul.f32 1.442695, %v474_v33 }
  0x7e   :  { %v485_v61 = vand.u32 2147483647, %v2036_v32  ;;  %v2037_v43 = vadd.f32 -12.0, %v2700_v60  ;;  %v2194_v59 = vpop.eup %2193  ;;  %v400_v35 = vadd.f32 %v2190_v41, %v380_v18  ;;  %2203 = vpow2.f32 %v458_v38 }
  0x7f   :  { %v478_v25 = vmul.f32 1.442695, %v475_v51  ;;  %v2038_v10 = vadd.f32 -12.0, %v2715_v19  ;;  %v2196_v39 = vpop.eup %2195  ;;  %v401_v62 = vadd.f32 %v2192_v47, %v381_v20  ;;  %v432_v37 = vadd.f32 %v430_v8, %v412_v4 }
  0x80   :  { %v450_v27 = vmul.f32 %v448_v2, %v2691_v44  ;;  %v468_v42 = vmax.f32 %v466_v56, 0.0  ;;  %v433_v1 = vadd.f32 %v431_v49, %v413_v5  ;;  %v451_v9 = vmul.f32 %v449_v57, %v2694_v48 }
  0x81   :  { %v486_v3 = vsub.f32 1.0, %v484_v55  ;;  %v494_v15 = vsub.f32 %v2713_v16, %v2752_v26  ;;  %v469_v17 = vmax.f32 %v467_v53, 0.0  ;;  %2205 = vpow2.f32 %v476_v46 }
  0x82   :  { %v487_v58 = vsub.f32 1.0, %v485_v61  ;;  %v504_v22 = vand.u32 2147483647, %v2037_v43  ;;  %v420_v23 = vadd.f32 %v2194_v59, %v400_v35  ;;  %2207 = vpow2.f32 %v478_v25  ;;  %v2859_v25 = vld [vmem:[#allocation7 + $0x110] sm:$0xff] }
  0x83   :  { %v505_v29 = vand.u32 2147483647, %v2038_v10  ;;  %v2198_v24 = vpop.eup %2197  ;;  %v421_v31 = vadd.f32 %v2196_v39, %v401_v62  ;;  %v452_v4 = vadd.f32 %v450_v27, %v432_v37  ;;  %v470_v44 = vmul.f32 %v468_v42, %v2697_v11  ;;  %v2863_v37 = vld [vmem:[#allocation7 + $0x118] sm:$0xff]  ;;  %v2865_v27 = vld [vmem:[#allocation7 + $0x120] sm:$0xff]  ;;  %v2867_v42 = vld [vmem:[#allocation7 + $0x128] sm:$0xff] }
  0x84   :  { %v495_v5 = vsub.f32 %v2718_v21, %v2755_v30  ;;  %v2200_v48 = vpop.eup %2199  ;;  %v453_v50 = vadd.f32 %v451_v9, %v433_v1  ;;  %v488_v36 = vmax.f32 %v486_v3, 0.0  ;;  %v496_v33 = vmul.f32 1.442695, %v494_v15 }
  0x85   :  { %v471_v32 = vmul.f32 %v469_v17, %v2703_v63  ;;  %v489_v18 = vmax.f32 %v487_v58, 0.0  ;;  %v506_v38 = vsub.f32 1.0, %v504_v22  ;;  %v2039_v51 = vadd.f32 -13.0, %v2700_v60 }
  0x86   :  { %v507_v20 = vsub.f32 1.0, %v505_v29  ;;  %v514_v8 = vsub.f32 %v2722_v28, %v2752_v26  ;;  %v440_v2 = vadd.f32 %v2198_v24, %v420_v23  ;;  %v441_v11 = vadd.f32 %v2200_v48, %v421_v31  ;;  %v2872_v23 = vld [vmem:[#allocation7 + $0x130] sm:$0xff]  ;;  %v2874_v29 = vld [vmem:[#allocation7 + $0x138] sm:$0xff] }
  0x87   :  { %v2202_v41 = vpop.eup %2201  ;;  %v472_v56 = vadd.f32 %v470_v44, %v452_v4  ;;  %v498_v47 = vmul.f32 1.442695, %v495_v5  ;;  %v490_v57 = vmul.f32 %v488_v36, %v2707_v6  ;;  %2209 = vpow2.f32 %v496_v33  ;;  %v2884_v36 = vld [vmem:[#allocation7 + $0x148] sm:$0xff] }
  0x88   :  { %v2204_v49 = vpop.eup %2203  ;;  %v515_v63 = vsub.f32 %v2725_v34, %v2755_v30  ;;  %v2040_v55 = vadd.f32 -13.0, %v2715_v19  ;;  %v473_v53 = vadd.f32 %v471_v32, %v453_v50  ;;  %v491_v46 = vmul.f32 %v489_v18, %v2710_v14  ;;  %v2882_v50 = vld [vmem:[#allocation7 + $0x140] sm:$0xff] }
  0x89   :  { %v508_v61 = vmax.f32 %v506_v38, 0.0  ;;  %v524_v43 = vand.u32 2147483647, %v2039_v51  ;;  %v509_v59 = vmax.f32 %v507_v20, 0.0  ;;  %v516_v35 = vmul.f32 1.442695, %v514_v8 }
  0x8a   :  { %v460_v39 = vadd.f32 %v2202_v41, %v440_v2  ;;  %v461_v62 = vadd.f32 %v2204_v49, %v441_v11  ;;  %v534_v6 = vsub.f32 %v2728_v40, %v2752_v26  ;;  %v492_v14 = vadd.f32 %v490_v57, %v472_v56  ;;  %v611_v32 = vld [vmem:[#allocation4 + $0x90] sm:$0xff]  ;;  %v2891_v8 = vld [vmem:[#allocation7 + $0x150] sm:$0xff]  ;;  %v2893_v2 = vld [vmem:[#allocation7 + $0x158] sm:$0xff] }
  0x8b   :  { %v2206_v10 = vpop.eup %2205  ;;  %2211 = vpow2.f32 %v498_v47  ;;  %v518_v9 = vmul.f32 1.442695, %v515_v63  ;;  %v525_v3 = vand.u32 2147483647, %v2040_v55  ;;  %v493_v15 = vadd.f32 %v491_v46, %v473_v53  ;;  %v2902_v46 = vld [vmem:[#allocation7 + $0x160] sm:$0xff] }
  0x8c   :  { %v2208_v1 = vpop.eup %2207  ;;  %v510_v17 = vmul.f32 %v508_v61, %v2713_v16  ;;  %v526_v58 = vsub.f32 1.0, %v524_v43  ;;  %v535_v22 = vsub.f32 %v2732_v45, %v2755_v30  ;;  %v511_v24 = vmul.f32 %v509_v59, %v2718_v21  ;;  %v2904_v61 = vld [vmem:[#allocation7 + $0x168] sm:$0xff] }
  0x8d   :  { %2213 = vpow2.f32 %v516_v35  ;;  %v627_v31 = vmax.f32 %v2859_v25, %v2865_v27  ;;  %v628_v4 = vmax.f32 %v2863_v37, %v2867_v42  ;;  %v480_v44 = vadd.f32 %v2206_v10, %v460_v39 }
  0x8e   :  { %v481_v5 = vadd.f32 %v2208_v1, %v461_v62  ;;  %v536_v16 = vmul.f32 1.442695, %v534_v6  ;;  %v2041_v48 = vadd.f32 -14.0, %v2700_v60  ;;  %2215 = vpow2.f32 %v518_v9  ;;  %v612_v1 = vld [vmem:[#allocation4 + $0x98] sm:$0xff]  ;;  %v2912_v9 = vld [vmem:[#allocation7 + $0x178] sm:$0xff] }
  0x8f   :  { %v527_v33 = vsub.f32 1.0, %v525_v3  ;;  %v632_v21 = vmax.f32 %v627_v31, %v2872_v23  ;;  %v633_v18 = vmax.f32 %v628_v4, %v2874_v29  ;;  %v2888_v38 = vadd.f32 %v510_v17, %v492_v14  ;;  %v2910_v14 = vld [vmem:[#allocation7 + $0x170] sm:$0xff] }
  0x90   :  { %v528_v51 = vmax.f32 %v526_v58, 0.0  ;;  %v538_v41 = vmul.f32 1.442695, %v535_v22  ;;  %v2042_v20 = vadd.f32 -14.0, %v2715_v19  ;;  %v513_v56 = vadd.f32 %v511_v24, %v493_v15  ;;  %v2917_v22 = vld [vmem:[#allocation7 + $0x180] sm:$0xff] }
  0x91   :  { %v2210_v11 = vpop.eup %2209  ;;  %v554_v47 = vsub.f32 %v2736_v54, %v2752_v26  ;;  %v637_v49 = vmax.f32 %v632_v21, %v2882_v50  ;;  %v638_v57 = vmax.f32 %v633_v18, %v2884_v36  ;;  %2217 = vpow2.f32 %v536_v16 }
  0x92   :  { %v544_v63 = vand.u32 2147483647, %v2041_v48  ;;  %v555_v55 = vsub.f32 %v2741_v0, %v2755_v30  ;;  %v2043_v53 = vadd.f32 -15.0, %v2700_v60  ;;  %v529_v43 = vmax.f32 %v527_v33, 0.0 }
  0x93   :  { %v615_v59 = vsub.f32 %v611_v32, %v2609_v12  ;;  %v642_v35 = vmax.f32 %v637_v49, %v2891_v8  ;;  %v643_v10 = vmax.f32 %v638_v57, %v2893_v2  ;;  %v500_v39 = vadd.f32 %v2210_v11, %v480_v44  ;;  %v2921_v44 = vld [vmem:[#allocation7 + $0x188] sm:$0xff]  ;;  %v2929_v11 = vld [vmem:[#allocation7 + $0x190] sm:$0xff] }
  0x94   :  { %v530_v62 = vmul.f32 %v528_v51, %v2722_v28  ;;  %2219 = vpow2.f32 %v538_v41  ;;  %v545_v6 = vand.u32 2147483647, %v2042_v20  ;;  %v556_v15 = vmul.f32 1.442695, %v554_v47  ;;  %v2931_v47 = vld [vmem:[#allocation7 + $0x198] sm:$0xff] }
  0x95   :  { %v2212_v3 = vpop.eup %2211  ;;  %v2044_v17 = vadd.f32 -15.0, %v2715_v19  ;;  %v647_v12 = vmax.f32 %v642_v35, %v2902_v46  ;;  %v648_v58 = vmax.f32 %v643_v10, %v2904_v61  ;;  %v546_v24 = vsub.f32 1.0, %v544_v63 }
  0x96   :  { %v558_v31 = vmul.f32 1.442695, %v555_v55  ;;  %v564_v28 = vand.u32 2147483647, %v2043_v53  ;;  %v574_v4 = vsub.f32 %v2744_v7, %v2752_v26  ;;  %v616_v48 = vsub.f32 %v612_v1, %v2611_v13  ;;  %v2988_v26 = vld [vmem:[#allocation7 + $0x200] sm:$0xff] }
  0x97   :  { %v2214_v16 = vpop.eup %2213  ;;  %v617_v33 = vmax.f32 %v615_v59, 0.0  ;;  %v652_v32 = vmax.f32 %v647_v12, %v2910_v14  ;;  %v653_v21 = vmax.f32 %v648_v58, %v2912_v9  ;;  %v501_v18 = vadd.f32 %v2212_v3, %v481_v5  ;;  %v2944_v58 = vld [vmem:[#allocation7 + $0x1b0] sm:$0xff]  ;;  %3861 = vst [vmem:[#allocation21_spill] sm:$0xff] %v2988_v26 }
  0x98   :  { %v531_v51 = vmul.f32 %v529_v43, %v2725_v34  ;;  %v547_v41 = vsub.f32 1.0, %v545_v6  ;;  %v575_v20 = vsub.f32 %v2748_v52, %v2755_v30  ;;  %v2216_v49 = vpop.eup %2215  ;;  %2221 = vpow2.f32 %v556_v15  ;;  %v2935_v34 = vld [vmem:[#allocation7 + $0x1a0] sm:$0xff]  ;;  %v2937_v43 = vld [vmem:[#allocation7 + $0x1a8] sm:$0xff] }
  0x99   :  { %v565_v57 = vand.u32 2147483647, %v2044_v17  ;;  %v657_v13 = vmax.f32 %v652_v32, %v2917_v22  ;;  %v658_v63 = vmax.f32 %v653_v21, %v2921_v44  ;;  %v548_v55 = vmax.f32 %v546_v24, 0.0  ;;  %v2946_v24 = vld [vmem:[#allocation7 + $0x1b8] sm:$0xff] }
  0x9a   :  { %2223 = vpow2.f32 %v558_v31  ;;  %v566_v5 = vsub.f32 1.0, %v564_v28  ;;  %v576_v53 = vmul.f32 1.442695, %v574_v4  ;;  %v618_v59 = vmax.f32 %v616_v48, 0.0 }
  0x9b   :  { %v2939_v35 = vmin.f32 %v617_v33, 15.99  ;;  %v662_v10 = vmax.f32 %v657_v13, %v2929_v11  ;;  %v663_v6 = vmax.f32 %v658_v63, %v2931_v47  ;;  %v2218_v1 = vpop.eup %2217  ;;  %v532_v3 = vadd.f32 %v530_v62, %v2888_v38  ;;  %v2954_v62 = vld [vmem:[#allocation7 + $0x1c8] sm:$0xff]  ;;  %v2963_v13 = vld [vmem:[#allocation7 + $0x1d0] sm:$0xff] }
  0x9c   :  { %v533_v15 = vadd.f32 %v531_v51, %v513_v56  ;;  %v549_v17 = vmax.f32 %v547_v41, 0.0  ;;  %v578_v12 = vmul.f32 1.442695, %v575_v20  ;;  %v520_v31 = vadd.f32 %v2214_v16, %v500_v39  ;;  %v2952_v56 = vld [vmem:[#allocation7 + $0x1c0] sm:$0xff] }
  0x9d   :  { %v567_v28 = vsub.f32 1.0, %v565_v57  ;;  %v667_v4 = vmax.f32 %v662_v10, %v2935_v34  ;;  %v668_v48 = vmax.f32 %v663_v6, %v2937_v43  ;;  %v550_v32 = vmul.f32 %v548_v55, %v2728_v40  ;;  %v2970_v6 = vld [vmem:[#allocation7 + $0x1e0] sm:$0xff] }
  0x9e   :  { %v2220_v33 = vpop.eup %2219  ;;  %v568_v21 = vmax.f32 %v566_v5, 0.0  ;;  %2225 = vpow2.f32 %v576_v53  ;;  %v2045_v38 = vadd.f32 -16.0, %v2700_v60  ;;  %v2956_v51 = vmin.f32 %v618_v59, 15.99  ;;  %v2965_v60 = vld [vmem:[#allocation7 + $0x1d8] sm:$0xff] }
  0x9f   :  { %v672_v39 = vmax.f32 %v667_v4, %v2944_v58  ;;  %v673_v16 = vmax.f32 %v668_v48, %v2946_v24  ;;  %v2047_v41 = vadd.f32 -1.0, %v2939_v35  ;;  %v521_v20 = vadd.f32 %v2216_v49, %v501_v18  ;;  %v2972_v18 = vld [vmem:[#allocation7 + $0x1e8] sm:$0xff] }
  0xa0   :  { %v551_v57 = vmul.f32 %v549_v17, %v2732_v45  ;;  %2227 = vpow2.f32 %v578_v12  ;;  %v2046_v40 = vadd.f32 -16.0, %v2715_v19  ;;  %v569_v63 = vmax.f32 %v567_v28, 0.0  ;;  %3858 = vst [vmem:[#allocation18_spill] sm:$0xff] %v2972_v18 }
  0xa1   :  { %v677_v55 = vmax.f32 %v672_v39, %v2952_v56  ;;  %v678_v5 = vmax.f32 %v673_v16, %v2954_v62  ;;  %v552_v53 = vadd.f32 %v550_v32, %v532_v3  ;;  %v570_v59 = vmul.f32 %v568_v21, %v2736_v54  ;;  %v2978_v21 = vld [vmem:[#allocation7 + $0x1f0] sm:$0xff] }
  0xa2   :  { %v584_v10 = vand.u32 2147483647, %v2045_v38  ;;  %v712_v45 = vand.u32 2147483647, %v2939_v35  ;;  %v2222_v19 = vpop.eup %2221  ;;  %v2048_v12 = vadd.f32 -1.0, %v2956_v51  ;;  %v540_v48 = vadd.f32 %v2218_v1, %v520_v31  ;;  %3859 = vst [vmem:[#allocation19_spill] sm:$0xff] %v2978_v21 }
  0xa3   :  { %v682_v49 = vmax.f32 %v677_v55, %v2963_v13  ;;  %v683_v17 = vmax.f32 %v678_v5, %v2965_v60  ;;  %v732_v28 = vand.u32 2147483647, %v2047_v41  ;;  %v541_v3 = vadd.f32 %v2220_v33, %v521_v20  ;;  %v2980_v38 = vld [vmem:[#allocation7 + $0x1f8] sm:$0xff]  ;;  %v2990_v1 = vld [vmem:[#allocation7 + $0x208] sm:$0xff] }
  0xa4   :  { %v2224_v4 = vpop.eup %2223  ;;  %v553_v32 = vadd.f32 %v551_v57, %v533_v15  ;;  %v585_v54 = vand.u32 2147483647, %v2046_v40  ;;  %3860 = vst [vmem:[#allocation20_spill] sm:$0xff] %v2980_v38  ;;  %v571_v39 = vmul.f32 %v569_v63, %v2741_v0  ;;  %v2049_v5 = vadd.f32 -2.0, %v2939_v35  ;;  %3862 = vst [vmem:[#allocation22_spill] sm:$0xff] %v2990_v1 }
  0xa5   :  { %v687_v16 = vmax.f32 %v682_v49, %v2970_v6  ;;  %v688_v55 = vmax.f32 %v683_v17, %v2972_v18  ;;  %v2986_v30 = vadd.f32 %v570_v59, %v552_v53  ;;  %v586_v41 = vsub.f32 1.0, %v584_v10  ;;  %v2997_v53 = vld [vmem:[#allocation7 + $0x210] sm:$0xff]  ;;  %v2999_v59 = vld [vmem:[#allocation7 + $0x218] sm:$0xff] }
  0xa6   :  { %v713_v15 = vand.u32 2147483647, %v2956_v51  ;;  %v714_v31 = vsub.f32 1.0, %v712_v45  ;;  %v733_v20 = vand.u32 2147483647, %v2048_v12  ;;  %v734_v57 = vsub.f32 1.0, %v732_v28 }
  0xa7   :  { %v692_v33 = vmax.f32 %v687_v16, %v2978_v21  ;;  %v693_v0 = vmax.f32 %v688_v55, %v2980_v38  ;;  %v560_v63 = vadd.f32 %v2222_v19, %v540_v48  ;;  %v561_v49 = vadd.f32 %v2224_v4, %v541_v3 }
  0xa8   :  { %v2226_v40 = vpop.eup %2225  ;;  %v2995_v17 = vsub.f32 1.0, %v585_v54  ;;  %v2050_v10 = vadd.f32 -2.0, %v2956_v51  ;;  %v752_v16 = vand.u32 2147483647, %v2049_v5  ;;  %v2051_v55 = vadd.f32 -3.0, %v2939_v35 }
  0xa9   :  { %v697_v18 = vmax.f32 %v692_v33, %v2988_v26  ;;  %v698_v45 = vmax.f32 %v693_v0, %v2990_v1  ;;  %v3005_v28 = vadd.f32 %v571_v39, %v553_v32  ;;  %v588_v19 = vmax.f32 %v586_v41, 0.0 }
  0xaa   :  { %v2228_v12 = vpop.eup %2227  ;;  %v715_v4 = vsub.f32 1.0, %v713_v15  ;;  %v716_v48 = vmax.f32 %v714_v31, 0.0  ;;  %v735_v38 = vsub.f32 1.0, %v733_v20  ;;  %v736_v21 = vmax.f32 %v734_v57, 0.0 }
  0xab   :  { %v3008_v3 = vmax.f32 %v697_v18, %v2997_v53  ;;  %v3011_v54 = vmax.f32 %v698_v45, %v2999_v59  ;;  %v580_v33 = vadd.f32 %v2226_v40, %v560_v63  ;;  %v589_v0 = vmax.f32 %v2995_v17, 0.0 }
  0xac   :  { %v753_v5 = vand.u32 2147483647, %v2050_v10  ;;  %v2052_v1 = vadd.f32 -3.0, %v2956_v51  ;;  %v581_v26 = vadd.f32 %v2228_v12, %v561_v49  ;;  %v754_v39 = vsub.f32 1.0, %v752_v16 }
  0xad   :  { %3863 = vst [vmem:[#allocation23_spill] sm:$0xff] %v3008_v3  ;;  %3864 = vst [vmem:[#allocation24_spill] sm:$0xff] %v3011_v54  ;;  %v704_v32 = vsub.f32 %v2859_v25, %v3008_v3  ;;  %v772_v41 = vand.u32 2147483647, %v2051_v55  ;;  %v3018_v18 = vmul.f32 %v588_v19, %v2744_v7  ;;  %v705_v15 = vsub.f32 %v2863_v37, %v3011_v54 }
  0xae   :  { %v717_v31 = vmax.f32 %v715_v4, 0.0  ;;  %v2053_v20 = vadd.f32 -4.0, %v2939_v35  ;;  %v718_v57 = vmul.f32 %v716_v48, %v2859_v25  ;;  %v722_v40 = vsub.f32 %v2865_v27, %v3008_v3 }
  0xaf   :  { %v737_v63 = vmax.f32 %v735_v38, 0.0  ;;  %v738_v49 = vmul.f32 %v736_v21, %v2865_v27  ;;  %2229 = vlog2.f32 %v580_v33  ;;  %v723_v17 = vsub.f32 %v2867_v42, %v3011_v54 }
  0xb0   :  { %v755_v7 = vsub.f32 1.0, %v753_v5  ;;  %v773_v10 = vand.u32 2147483647, %v2052_v1  ;;  %2231 = vlog2.f32 %v581_v26  ;;  %v706_v45 = vmul.f32 1.442695, %v704_v32 }
  0xb1   :  { %v756_v16 = vmax.f32 %v754_v39, 0.0  ;;  %v774_v55 = vsub.f32 1.0, %v772_v41  ;;  %v708_v12 = vmul.f32 1.442695, %v705_v15  ;;  %v719_v19 = vmul.f32 %v717_v31, %v2863_v37 }
  0xb2   :  { %v2054_v25 = vadd.f32 -4.0, %v2956_v51  ;;  %v792_v4 = vand.u32 2147483647, %v2053_v20  ;;  %v724_v48 = vmul.f32 1.442695, %v722_v40  ;;  %v739_v38 = vmul.f32 %v737_v63, %v2867_v42 }
  0xb3   :  { %v740_v27 = vadd.f32 %v738_v49, %v718_v57  ;;  %v742_v21 = vsub.f32 %v2872_v23, %v3008_v3  ;;  %v726_v33 = vmul.f32 1.442695, %v723_v17  ;;  %v743_v26 = vsub.f32 %v2874_v29, %v3011_v54 }
  0xb4   :  { %v757_v1 = vmax.f32 %v755_v7, 0.0  ;;  %v775_v5 = vsub.f32 1.0, %v773_v10  ;;  %2233 = vpow2.f32 %v706_v45  ;;  %v758_v32 = vmul.f32 %v756_v16, %v2872_v23 }
  0xb5   :  { %v776_v37 = vmax.f32 %v774_v55, 0.0  ;;  %v2055_v39 = vadd.f32 -5.0, %v2939_v35  ;;  %2235 = vpow2.f32 %v708_v12  ;;  %v793_v41 = vand.u32 2147483647, %v2054_v25 }
  0xb6   :  { %v794_v15 = vsub.f32 1.0, %v792_v4  ;;  %v2056_v42 = vadd.f32 -5.0, %v2956_v51  ;;  %2237 = vpow2.f32 %v724_v48  ;;  %v741_v31 = vadd.f32 %v739_v38, %v719_v19 }
  0xb7   :  { %v744_v20 = vmul.f32 1.442695, %v742_v21  ;;  %v762_v57 = vsub.f32 %v2882_v50, %v3008_v3  ;;  %2239 = vpow2.f32 %v726_v33  ;;  %v746_v40 = vmul.f32 1.442695, %v743_v26 }
  0xb8   :  { %v763_v63 = vsub.f32 %v2884_v36, %v3011_v54  ;;  %v777_v23 = vmax.f32 %v775_v5, 0.0  ;;  %v759_v49 = vmul.f32 %v757_v1, %v2874_v29  ;;  %v760_v17 = vadd.f32 %v758_v32, %v740_v27  ;;  %v3059_v5 = vld [vmem:[#allocation4 + $0x60] sm:$0xff] }
  0xb9   :  { %v778_v7 = vmul.f32 %v776_v37, %v2882_v50  ;;  %v812_v10 = vand.u32 2147483647, %v2055_v39  ;;  %v3045_v45 = vpop.eup %2229  ;;  %v795_v16 = vsub.f32 1.0, %v793_v41  ;;  %v796_v55 = vmax.f32 %v794_v15, 0.0 }
  0xba   :  { %v813_v12 = vand.u32 2147483647, %v2056_v42  ;;  %v2057_v19 = vadd.f32 -6.0, %v2939_v35  ;;  %v3048_v25 = vpop.eup %2231  ;;  %v3051_v4 = vmul.f32 %v589_v0, %v2748_v52  ;;  %2241 = vpow2.f32 %v744_v20  ;;  %v3061_v52 = vld [vmem:[#allocation4 + $0x80] sm:$0xff] }
  0xbb   :  { %v764_v48 = vmul.f32 1.442695, %v762_v57  ;;  %v782_v29 = vsub.f32 %v2891_v8, %v3008_v3  ;;  %2243 = vpow2.f32 %v746_v40  ;;  %v766_v50 = vmul.f32 1.442695, %v763_v63 }
  0xbc   :  { %v779_v38 = vmul.f32 %v777_v23, %v2884_v36  ;;  %v783_v27 = vsub.f32 %v2893_v2, %v3011_v54  ;;  %v761_v21 = vadd.f32 %v759_v49, %v741_v31  ;;  %v780_v33 = vadd.f32 %v778_v7, %v760_v17 }
  0xbd   :  { %v814_v26 = vsub.f32 1.0, %v812_v10  ;;  %v2058_v1 = vadd.f32 -6.0, %v2956_v51  ;;  %v797_v0 = vmax.f32 %v795_v16, 0.0  ;;  %v798_v32 = vmul.f32 %v796_v55, %v2891_v8 }
  0xbe   :  { %v815_v37 = vsub.f32 1.0, %v813_v12  ;;  %v832_v39 = vand.u32 2147483647, %v2057_v19  ;;  %v2234_v41 = vpop.eup %2233  ;;  %2245 = vpow2.f32 %v764_v48  ;;  %v784_v36 = vmul.f32 1.442695, %v782_v29 }
  0xbf   :  { %v802_v15 = vsub.f32 %v2902_v46, %v3008_v3  ;;  %v2059_v42 = vadd.f32 -7.0, %v2939_v35  ;;  %v2236_v31 = vpop.eup %2235  ;;  %2247 = vpow2.f32 %v766_v50  ;;  %v786_v20 = vmul.f32 1.442695, %v783_v27 }
  0xc0   :  { %v803_v57 = vsub.f32 %v2904_v61, %v3011_v54  ;;  %v1062_v40 = vsub.f32 %v3059_v5, %v3061_v52  ;;  %v2238_v8 = vpop.eup %2237  ;;  %v781_v63 = vadd.f32 %v779_v38, %v761_v21  ;;  %v816_v23 = vmax.f32 %v814_v26, 0.0  ;;  %v3216_v5 = vld [vmem:[#allocation7 + $0x2a8] sm:$0xff] }
  0xc1   :  { %v833_v49 = vand.u32 2147483647, %v2058_v1  ;;  %v2060_v17 = vadd.f32 -7.0, %v2956_v51  ;;  %v2240_v7 = vpop.eup %2239  ;;  %v799_v10 = vmul.f32 %v797_v0, %v2893_v2  ;;  %v800_v16 = vadd.f32 %v798_v32, %v780_v33 }
  0xc2   :  { %v817_v55 = vmax.f32 %v815_v37, 0.0  ;;  %v834_v12 = vsub.f32 1.0, %v832_v39  ;;  %2249 = vpow2.f32 %v784_v36  ;;  %v804_v19 = vmul.f32 1.442695, %v802_v15 }
  0xc3   :  { %v822_v48 = vsub.f32 %v2910_v14, %v3008_v3  ;;  %v852_v29 = vand.u32 2147483647, %v2059_v42  ;;  %v728_v50 = vadd.f32 %v2238_v8, %v2234_v41  ;;  %2251 = vpow2.f32 %v786_v20 }
  0xc4   :  { %v806_v27 = vmul.f32 1.442695, %v803_v57  ;;  %v823_v38 = vsub.f32 %v2912_v9, %v3011_v54  ;;  %v2242_v21 = vpop.eup %2241  ;;  %v729_v26 = vadd.f32 %v2240_v7, %v2236_v31  ;;  %v818_v1 = vmul.f32 %v816_v23, %v2902_v46 }
  0xc5   :  { %v835_v2 = vsub.f32 1.0, %v833_v49  ;;  %v853_v33 = vand.u32 2147483647, %v2060_v17  ;;  %v2244_v0 = vpop.eup %2243  ;;  %v801_v32 = vadd.f32 %v799_v10, %v781_v63  ;;  %v819_v37 = vmul.f32 %v817_v55, %v2904_v61 }
  0xc6   :  { %v836_v39 = vmax.f32 %v834_v12, 0.0  ;;  %v2061_v36 = vadd.f32 -8.0, %v2939_v35  ;;  %2253 = vpow2.f32 %v804_v19  ;;  %v824_v41 = vmul.f32 1.442695, %v822_v48 }
  0xc7   :  { %v842_v15 = vsub.f32 %v2917_v22, %v3008_v3  ;;  %v854_v42 = vsub.f32 1.0, %v852_v29  ;;  %v748_v20 = vadd.f32 %v2242_v21, %v728_v50  ;;  %2255 = vpow2.f32 %v806_v27 }
  0xc8   :  { %v826_v31 = vmul.f32 1.442695, %v823_v38  ;;  %v843_v46 = vsub.f32 %v2921_v44, %v3011_v54  ;;  %v2246_v57 = vpop.eup %2245  ;;  %v749_v8 = vadd.f32 %v2244_v0, %v729_v26  ;;  %v820_v63 = vadd.f32 %v818_v1, %v800_v16 }
  0xc9   :  { %v837_v23 = vmax.f32 %v835_v2, 0.0  ;;  %v855_v61 = vsub.f32 1.0, %v853_v33  ;;  %v2248_v49 = vpop.eup %2247  ;;  %v821_v17 = vadd.f32 %v819_v37, %v801_v32  ;;  %v838_v7 = vmul.f32 %v836_v39, %v2910_v14 }
  0xca   :  { %v2062_v10 = vadd.f32 -8.0, %v2956_v51  ;;  %v872_v55 = vand.u32 2147483647, %v2061_v36  ;;  %2257 = vpow2.f32 %v824_v41  ;;  %v844_v12 = vmul.f32 1.442695, %v842_v15 }
  0xcb   :  { %v856_v19 = vmax.f32 %v854_v42, 0.0  ;;  %v862_v48 = vsub.f32 %v2929_v11, %v3008_v3  ;;  %v768_v29 = vadd.f32 %v2246_v57, %v748_v20  ;;  %2259 = vpow2.f32 %v826_v31 }
  0xcc   :  { %v846_v50 = vmul.f32 1.442695, %v843_v46  ;;  %v863_v16 = vsub.f32 %v2931_v47, %v3011_v54  ;;  %v2250_v27 = vpop.eup %2249  ;;  %v769_v38 = vadd.f32 %v2248_v49, %v749_v8  ;;  %v839_v21 = vmul.f32 %v837_v23, %v2912_v9 }
  0xcd   :  { %v857_v14 = vmax.f32 %v855_v61, 0.0  ;;  %v2063_v26 = vadd.f32 -9.0, %v2939_v35  ;;  %v2252_v1 = vpop.eup %2251  ;;  %v840_v2 = vadd.f32 %v838_v7, %v820_v63  ;;  %v873_v33 = vand.u32 2147483647, %v2062_v10 }
  0xce   :  { %v874_v0 = vsub.f32 1.0, %v872_v55  ;;  %v2064_v32 = vadd.f32 -9.0, %v2956_v51  ;;  %2261 = vpow2.f32 %v844_v12  ;;  %v858_v37 = vmul.f32 %v856_v19, %v2917_v22 }
  0xcf   :  { %v864_v39 = vmul.f32 1.442695, %v862_v48  ;;  %v882_v36 = vsub.f32 %v2935_v34, %v3008_v3  ;;  %v788_v41 = vadd.f32 %v2250_v27, %v768_v29  ;;  %2263 = vpow2.f32 %v846_v50 }
  0xd0   :  { %v866_v15 = vmul.f32 1.442695, %v863_v16  ;;  %v883_v9 = vsub.f32 %v2937_v43, %v3011_v54  ;;  %v2254_v42 = vpop.eup %2253  ;;  %v789_v20 = vadd.f32 %v2252_v1, %v769_v38  ;;  %v841_v31 = vadd.f32 %v839_v21, %v821_v17 }
  0xd1   :  { %v859_v46 = vmul.f32 %v857_v14, %v2921_v44  ;;  %v892_v57 = vand.u32 2147483647, %v2063_v26  ;;  %v2256_v8 = vpop.eup %2255  ;;  %v875_v63 = vsub.f32 1.0, %v873_v33  ;;  %v876_v23 = vmax.f32 %v874_v0, 0.0 }
  0xd2   :  { %v893_v22 = vand.u32 2147483647, %v2064_v32  ;;  %v2065_v61 = vadd.f32 -10.0, %v2939_v35  ;;  %v860_v49 = vadd.f32 %v858_v37, %v840_v2  ;;  %2265 = vpow2.f32 %v864_v39 }
  0xd3   :  { %v884_v7 = vmul.f32 1.442695, %v882_v36  ;;  %v2066_v10 = vadd.f32 -10.0, %v2956_v51  ;;  %v808_v55 = vadd.f32 %v2254_v42, %v788_v41  ;;  %2267 = vpow2.f32 %v866_v15 }
  0xd4   :  { %v886_v12 = vmul.f32 1.442695, %v883_v9  ;;  %v902_v17 = vsub.f32 %v2944_v58, %v3008_v3  ;;  %v2258_v19 = vpop.eup %2257  ;;  %v809_v44 = vadd.f32 %v2256_v8, %v789_v20  ;;  %v861_v48 = vadd.f32 %v859_v46, %v841_v31 }
  0xd5   :  { %v894_v29 = vsub.f32 1.0, %v892_v57  ;;  %v903_v50 = vsub.f32 %v2946_v24, %v3011_v54  ;;  %v2260_v16 = vpop.eup %2259  ;;  %v877_v27 = vmax.f32 %v875_v63, 0.0  ;;  %v878_v38 = vmul.f32 %v876_v23, %v2929_v11 }
  0xd6   :  { %v895_v21 = vsub.f32 1.0, %v893_v22  ;;  %v912_v14 = vand.u32 2147483647, %v2065_v61  ;;  %2269 = vpow2.f32 %v884_v7  ;;  %v913_v26 = vand.u32 2147483647, %v2066_v10 }
  0xd7   :  { %v2067_v1 = vadd.f32 -11.0, %v2939_v35  ;;  %v2068_v2 = vadd.f32 -11.0, %v2956_v51  ;;  %v828_v33 = vadd.f32 %v2258_v19, %v808_v55  ;;  %2271 = vpow2.f32 %v886_v12 }
  0xd8   :  { %v904_v0 = vmul.f32 1.442695, %v902_v17  ;;  %v922_v32 = vsub.f32 %v2952_v56, %v3008_v3  ;;  %v2262_v37 = vpop.eup %2261  ;;  %v829_v39 = vadd.f32 %v2260_v16, %v809_v44  ;;  %v896_v36 = vmax.f32 %v894_v29, 0.0 }
  0xd9   :  { %v906_v41 = vmul.f32 1.442695, %v903_v50  ;;  %v923_v11 = vsub.f32 %v2954_v62, %v3011_v54  ;;  %v2264_v15 = vpop.eup %2263  ;;  %v879_v9 = vmul.f32 %v877_v27, %v2931_v47  ;;  %v880_v42 = vadd.f32 %v878_v38, %v860_v49 }
  0xda   :  { %v897_v20 = vmax.f32 %v895_v21, 0.0  ;;  %v914_v31 = vsub.f32 1.0, %v912_v14  ;;  %v915_v46 = vsub.f32 1.0, %v913_v26  ;;  %v932_v57 = vand.u32 2147483647, %v2067_v1 }
  0xdb   :  { %v933_v8 = vand.u32 2147483647, %v2068_v2  ;;  %v2069_v63 = vadd.f32 -12.0, %v2939_v35  ;;  %v848_v23 = vadd.f32 %v2262_v37, %v828_v33  ;;  %2273 = vpow2.f32 %v904_v0 }
  0xdc   :  { %v924_v22 = vmul.f32 1.442695, %v922_v32  ;;  %v942_v61 = vsub.f32 %v2963_v13, %v3008_v3  ;;  %v2266_v7 = vpop.eup %2265  ;;  %v849_v10 = vadd.f32 %v2264_v15, %v829_v39  ;;  %v898_v55 = vmul.f32 %v896_v36, %v2935_v34 }
  0xdd   :  { %2275 = vpow2.f32 %v906_v41  ;;  %v926_v47 = vmul.f32 1.442695, %v923_v11  ;;  %v2268_v49 = vpop.eup %2267  ;;  %v881_v12 = vadd.f32 %v879_v9, %v861_v48  ;;  %v899_v17 = vmul.f32 %v897_v20, %v2937_v43 }
  0xde   :  { %v916_v19 = vmax.f32 %v914_v31, 0.0  ;;  %v2070_v44 = vadd.f32 -12.0, %v2956_v51  ;;  %v917_v29 = vmax.f32 %v915_v46, 0.0  ;;  %v934_v50 = vsub.f32 1.0, %v932_v57 }
  0xdf   :  { %v935_v16 = vsub.f32 1.0, %v933_v8  ;;  %v952_v27 = vand.u32 2147483647, %v2069_v63  ;;  %v3121_v38 = vadd.f32 %v3018_v18, %v2986_v30  ;;  %v868_v21 = vadd.f32 %v2266_v7, %v848_v23  ;;  %v3868_v7 = vld [vmem:[#allocation16_spill] sm:$0xff] }
  0xe0   :  { %2277 = vpow2.f32 %v924_v22  ;;  %v944_v34 = vmul.f32 1.442695, %v942_v61  ;;  %v2270_v14 = vpop.eup %2269  ;;  %v869_v26 = vadd.f32 %v2268_v49, %v849_v10  ;;  %v900_v1 = vadd.f32 %v898_v55, %v880_v42  ;;  %v3866_v42 = vld [vmem:[#allocation18_spill] sm:$0xff]  ;;  %v3870_v49 = vld [vmem:[#allocation17_spill] sm:$0xff] }
  0xe1   :  { %3865 = vst [vmem:[#allocation25_spill] sm:$0xff] %v3121_v38  ;;  %2279 = vpow2.f32 %v926_v47  ;;  %v943_v43 = vsub.f32 %v2965_v60, %v3011_v54  ;;  %v2272_v48 = vpop.eup %2271  ;;  %v901_v2 = vadd.f32 %v899_v17, %v881_v12  ;;  %v918_v33 = vmul.f32 %v916_v19, %v2944_v58 }
  0xe2   :  { %v953_v0 = vand.u32 2147483647, %v2070_v44  ;;  %v2071_v32 = vadd.f32 -13.0, %v2939_v35  ;;  %v919_v30 = vmul.f32 %v917_v29, %v2946_v24  ;;  %v936_v18 = vmax.f32 %v934_v50, 0.0  ;;  %v3147_v44 = vld [vmem:[#allocation7 + $0x220] sm:$0xff] }
  0xe3   :  { %v937_v37 = vmax.f32 %v935_v16, 0.0  ;;  %v954_v39 = vsub.f32 1.0, %v952_v27  ;;  %v597_v36 = vmul.f32 0.6931472, %v3045_v45  ;;  %2281 = vpow2.f32 %v944_v34  ;;  %v3151_v16 = vld [vmem:[#allocation7 + $0x228] sm:$0xff]  ;;  %v3153_v27 = vld [vmem:[#allocation7 + $0x230] sm:$0xff] }
  0xe4   :  { %v962_v41 = vsub.f32 %v2970_v6, %v3008_v3  ;;  %v2072_v11 = vadd.f32 -13.0, %v2956_v51  ;;  %v599_v15 = vmul.f32 0.6931472, %v3048_v25  ;;  %v888_v9 = vadd.f32 %v2270_v14, %v868_v21  ;;  %v3155_v21 = vld [vmem:[#allocation7 + $0x238] sm:$0xff] }
  0xe5   :  { %v946_v58 = vmul.f32 1.442695, %v943_v43  ;;  %v963_v20 = vsub.f32 %v3866_v42, %v3011_v54  ;;  %v2274_v31 = vpop.eup %2273  ;;  %v889_v24 = vadd.f32 %v2272_v48, %v869_v26  ;;  %v920_v46 = vadd.f32 %v918_v33, %v900_v1  ;;  %v3873_v43 = vld [vmem:[#allocation20_spill] sm:$0xff] }
  0xe6   :  { %v955_v57 = vsub.f32 1.0, %v953_v0  ;;  %v972_v8 = vand.u32 2147483647, %v2071_v32  ;;  %v921_v45 = vadd.f32 %v919_v30, %v901_v2  ;;  %v938_v23 = vmul.f32 %v936_v18, %v2952_v56  ;;  %v3162_v32 = vld [vmem:[#allocation7 + $0x240] sm:$0xff]  ;;  %v3164_v30 = vld [vmem:[#allocation7 + $0x248] sm:$0xff] }
  0xe7   :  { %v2276_v63 = vpop.eup %2275  ;;  %v939_v22 = vmul.f32 %v937_v37, %v2954_v62  ;;  %v956_v61 = vmax.f32 %v954_v39, 0.0  ;;  %v3139_v25 = vadd.f32 %v3051_v4, %v3005_v28  ;;  %v3142_v10 = vadd.f32 %v597_v36, %v3868_v7  ;;  %v3872_v28 = vld [vmem:[#allocation19_spill] sm:$0xff] }
  0xe8   :  { %v964_v55 = vmul.f32 1.442695, %v962_v41  ;;  %v973_v47 = vand.u32 2147483647, %v2072_v11  ;;  %v3145_v12 = vadd.f32 %v599_v15, %v3870_v49  ;;  %v908_v17 = vadd.f32 %v2274_v31, %v888_v9  ;;  %v3171_v9 = vld [vmem:[#allocation7 + $0x250] sm:$0xff]  ;;  %v1059_v7 = vld [vmem:[#allocation4 + $0x68] sm:$0xff] }
  0xe9   :  { %3867 = vst [vmem:[#allocation18_spill] sm:$0xff] %v3139_v25  ;;  %3869 = vst [vmem:[#allocation16_spill] sm:$0xff] %v3142_v10  ;;  %2283 = vpow2.f32 %v946_v58  ;;  %v966_v19 = vmul.f32 1.442695, %v963_v20  ;;  %v909_v62 = vadd.f32 %v2276_v63, %v889_v24  ;;  %v957_v29 = vmax.f32 %v955_v57, 0.0  ;;  %v3173_v58 = vld [vmem:[#allocation7 + $0x258] sm:$0xff] }
  0xea   :  { %3871 = vst [vmem:[#allocation17_spill] sm:$0xff] %v3145_v12  ;;  %v2278_v56 = vpop.eup %2277  ;;  %v974_v50 = vsub.f32 1.0, %v972_v8  ;;  %v982_v4 = vsub.f32 %v3872_v28, %v3008_v3  ;;  %v940_v14 = vadd.f32 %v938_v23, %v920_v46  ;;  %v941_v26 = vadd.f32 %v939_v22, %v921_v45  ;;  %v3177_v57 = vld [vmem:[#allocation7 + $0x260] sm:$0xff]  ;;  %v3179_v8 = vld [vmem:[#allocation7 + $0x268] sm:$0xff] }
  0xeb   :  { %v2280_v34 = vpop.eup %2279  ;;  %v958_v1 = vmul.f32 %v956_v61, %v2963_v13  ;;  %v983_v48 = vsub.f32 %v3873_v43, %v3011_v54  ;;  %2285 = vpow2.f32 %v964_v55  ;;  %v975_v2 = vsub.f32 1.0, %v973_v47  ;;  %v3250_v12 = vld [vmem:[#allocation7 + $0x2e0] sm:$0xff] }
  0xec   :  { %v2073_v33 = vadd.f32 -14.0, %v2939_v35  ;;  %v2074_v0 = vadd.f32 -14.0, %v2956_v51  ;;  %v928_v18 = vadd.f32 %v2278_v56, %v908_v17  ;;  %2287 = vpow2.f32 %v966_v19  ;;  %v3874_v19 = vld [vmem:[#allocation21_spill] sm:$0xff] }
  0xed   :  { %v1074_v37 = vmax.f32 %v3147_v44, %v3153_v27  ;;  %v1075_v13 = vmax.f32 %v3151_v16, %v3155_v21  ;;  %v2282_v39 = vpop.eup %2281  ;;  %v929_v36 = vadd.f32 %v2280_v34, %v909_v62  ;;  %v959_v41 = vmul.f32 %v957_v29, %v2965_v60  ;;  %v1061_v62 = vld [vmem:[#allocation4 + $0x88] sm:$0xff]  ;;  %v3188_v29 = vld [vmem:[#allocation7 + $0x270] sm:$0xff] }
  0xee   :  { %v976_v11 = vmax.f32 %v974_v50, 0.0  ;;  %v984_v15 = vmul.f32 1.442695, %v982_v4  ;;  %v960_v20 = vadd.f32 %v958_v1, %v940_v14  ;;  %v986_v31 = vmul.f32 1.442695, %v983_v48  ;;  %v3190_v50 = vld [vmem:[#allocation7 + $0x278] sm:$0xff] }
  0xef   :  { %v1079_v24 = vmax.f32 %v1074_v37, %v3162_v32  ;;  %v1080_v46 = vmax.f32 %v1075_v13, %v3164_v30  ;;  %v977_v63 = vmax.f32 %v975_v2, 0.0  ;;  %v992_v45 = vand.u32 2147483647, %v2073_v33  ;;  %v3875_v34 = vld [vmem:[#allocation22_spill] sm:$0xff] }
  0xf0   :  { %v993_v23 = vand.u32 2147483647, %v2074_v0  ;;  %v2075_v60 = vadd.f32 -15.0, %v2939_v35  ;;  %v948_v22 = vadd.f32 %v2282_v39, %v928_v18  ;;  %v2076_v61 = vadd.f32 -15.0, %v2956_v51  ;;  %v3197_v0 = vld [vmem:[#allocation7 + $0x280] sm:$0xff]  ;;  %v3199_v18 = vld [vmem:[#allocation7 + $0x288] sm:$0xff] }
  0xf1   :  { %v1084_v55 = vmax.f32 %v1079_v24, %v3171_v9  ;;  %v1085_v47 = vmax.f32 %v1080_v46, %v3173_v58  ;;  %v961_v49 = vadd.f32 %v959_v41, %v941_v26  ;;  %v978_v17 = vmul.f32 %v976_v11, %v2970_v6  ;;  %v3206_v46 = vld [vmem:[#allocation7 + $0x290] sm:$0xff] }
  0xf2   :  { %2289 = vpow2.f32 %v984_v15  ;;  %v1002_v56 = vsub.f32 %v3874_v19, %v3008_v3  ;;  %v1003_v14 = vsub.f32 %v3875_v34, %v3011_v54  ;;  %v979_v6 = vmul.f32 %v977_v63, %v3866_v42  ;;  %v3208_v63 = vld [vmem:[#allocation7 + $0x298] sm:$0xff] }
  0xf3   :  { %v2284_v4 = vpop.eup %2283  ;;  %2291 = vpow2.f32 %v986_v31  ;;  %v1089_v1 = vmax.f32 %v1084_v55, %v3177_v57  ;;  %v1090_v26 = vmax.f32 %v1085_v47, %v3179_v8  ;;  %v994_v48 = vsub.f32 1.0, %v992_v45 }
  0xf4   :  { %v995_v2 = vsub.f32 1.0, %v993_v23  ;;  %v1012_v33 = vand.u32 2147483647, %v2075_v60  ;;  %v1013_v37 = vand.u32 2147483647, %v2076_v61  ;;  %v1063_v13 = vsub.f32 %v1059_v7, %v1061_v62 }
  0xf5   :  { %v1094_v39 = vmax.f32 %v1089_v1, %v3188_v29  ;;  %v1095_v41 = vmax.f32 %v1090_v26, %v3190_v50  ;;  %v2286_v11 = vpop.eup %2285  ;;  %v949_v15 = vadd.f32 %v2284_v4, %v929_v36  ;;  %v980_v31 = vadd.f32 %v978_v17, %v960_v20  ;;  %v3214_v17 = vld [vmem:[#allocation7 + $0x2a0] sm:$0xff]  ;;  %v3225_v26 = vld [vmem:[#allocation7 + $0x2b0] sm:$0xff] }
  0xf6   :  { %v1004_v24 = vmul.f32 1.442695, %v1002_v56  ;;  %v1064_v42 = vmax.f32 %v1062_v40, 0.0  ;;  %v2288_v45 = vpop.eup %2287  ;;  %v1006_v23 = vmul.f32 1.442695, %v1003_v14  ;;  %v1022_v60 = vsub.f32 %v2997_v53, %v3008_v3 }
  0xf7   :  { %v1099_v61 = vmax.f32 %v1094_v39, %v3197_v0  ;;  %v1100_v7 = vmax.f32 %v1095_v41, %v3199_v18  ;;  %v981_v36 = vadd.f32 %v979_v6, %v961_v49  ;;  %v996_v20 = vmax.f32 %v994_v48, 0.0  ;;  %v3227_v6 = vld [vmem:[#allocation7 + $0x2b8] sm:$0xff]  ;;  %v3234_v41 = vld [vmem:[#allocation7 + $0x2c0] sm:$0xff] }
  0xf8   :  { %v997_v55 = vmax.f32 %v995_v2, 0.0  ;;  %v1014_v47 = vsub.f32 1.0, %v1012_v33  ;;  %v1015_v52 = vsub.f32 1.0, %v1013_v37  ;;  %v1065_v40 = vmax.f32 %v1063_v13, 0.0 }
  0xf9   :  { %v1104_v56 = vmax.f32 %v1099_v61, %v3206_v46  ;;  %v1105_v62 = vmax.f32 %v1100_v7, %v3208_v63  ;;  %v968_v4 = vadd.f32 %v2286_v11, %v948_v22  ;;  %v1023_v14 = vsub.f32 %v2999_v59, %v3011_v54  ;;  %v3236_v11 = vld [vmem:[#allocation7 + $0x2c8] sm:$0xff] }
  0xfa   :  { %v2077_v1 = vadd.f32 -16.0, %v2939_v35  ;;  %v3223_v49 = vmin.f32 %v1064_v42, 15.99  ;;  %2293 = vpow2.f32 %v1004_v24  ;;  %v1024_v48 = vmul.f32 1.442695, %v1022_v60 }
  0xfb   :  { %v1109_v2 = vmax.f32 %v1104_v56, %v3214_v17  ;;  %v1110_v33 = vmax.f32 %v1105_v62, %v3216_v5  ;;  %v998_v22 = vmul.f32 %v996_v20, %v3872_v28  ;;  %v999_v13 = vmul.f32 %v997_v55, %v3873_v43  ;;  %v3242_v56 = vld [vmem:[#allocation7 + $0x2d0] sm:$0xff]  ;;  %v3244_v20 = vld [vmem:[#allocation7 + $0x2d8] sm:$0xff] }
  0xfc   :  { %v2290_v37 = vpop.eup %2289  ;;  %v1016_v39 = vmax.f32 %v1014_v47, 0.0  ;;  %v2078_v35 = vadd.f32 -16.0, %v2956_v51  ;;  %v1017_v61 = vmax.f32 %v1015_v52, 0.0  ;;  %v3238_v24 = vmin.f32 %v1065_v40, 15.99 }
  0xfd   :  { %v2292_v42 = vpop.eup %2291  ;;  %v1114_v60 = vmax.f32 %v1109_v2, %v3225_v26  ;;  %v1115_v7 = vmax.f32 %v1110_v33, %v3227_v6  ;;  %2295 = vpow2.f32 %v1006_v23  ;;  %v1026_v28 = vmul.f32 1.442695, %v1023_v14  ;;  %v3252_v23 = vld [vmem:[#allocation7 + $0x2e8] sm:$0xff] }
  0xfe   :  { %v1032_v43 = vand.u32 2147483647, %v2077_v1  ;;  %v2079_v51 = vadd.f32 -1.0, %v3223_v49  ;;  %v969_v55 = vadd.f32 %v2288_v45, %v949_v15  ;;  %2297 = vpow2.f32 %v1024_v48  ;;  %v3257_v45 = vld [vmem:[#allocation7 + $0x2f0] sm:$0xff] }
  0xff   :  { %v1119_v47 = vmax.f32 %v1114_v60, %v3234_v41  ;;  %v1120_v52 = vmax.f32 %v1115_v7, %v3236_v11  ;;  %v1000_v40 = vadd.f32 %v998_v22, %v980_v31  ;;  %v1001_v62 = vadd.f32 %v999_v13, %v981_v36  ;;  %3876 = vst [vmem:[#allocation19_spill] sm:$0xff] %v3257_v45  ;;  %v3260_v36 = vld [vmem:[#allocation7 + $0x2f8] sm:$0xff] }
 0x100   :  { %v1018_v2 = vmul.f32 %v1016_v39, %v3874_v19  ;;  %v1033_v33 = vand.u32 2147483647, %v2078_v35  ;;  %v1019_v14 = vmul.f32 %v1017_v61, %v3875_v34  ;;  %v2080_v48 = vadd.f32 -1.0, %v3238_v24  ;;  %3877 = vst [vmem:[#allocation20_spill] sm:$0xff] %v3260_v36  ;;  %v3265_v35 = vld [vmem:[#allocation7 + $0x300] sm:$0xff] }
 0x101   :  { %v1124_v1 = vmax.f32 %v1119_v47, %v3242_v56  ;;  %v1125_v15 = vmax.f32 %v1120_v52, %v3244_v20  ;;  %2299 = vpow2.f32 %v1026_v28  ;;  %v1034_v31 = vsub.f32 1.0, %v1032_v43  ;;  %v3270_v28 = vld [vmem:[#allocation7 + $0x308] sm:$0xff]  ;;  %v3273_v52 = vld [vmem:[#allocation4 + $0x70] sm:$0xff] }
 0x102   :  { %v1159_v19 = vand.u32 2147483647, %v3223_v49  ;;  %v1179_v22 = vand.u32 2147483647, %v2079_v51  ;;  %v988_v13 = vadd.f32 %v2290_v37, %v968_v4  ;;  %v2081_v61 = vadd.f32 -2.0, %v3223_v49  ;;  %3878 = vst [vmem:[#allocation21_spill] sm:$0xff] %v3270_v28 }
 0x103   :  { %v1129_v39 = vmax.f32 %v1124_v1, %v3250_v12  ;;  %v1130_v34 = vmax.f32 %v1125_v15, %v3252_v23  ;;  %v989_v60 = vadd.f32 %v2292_v42, %v969_v55  ;;  %v3268_v7 = vadd.f32 %v1018_v2, %v1000_v40  ;;  %v3275_v51 = vld [vmem:[#allocation4 + $0x90] sm:$0xff]  ;;  %v3281_v42 = vld [vmem:[#allocation4 + $0x78] sm:$0xff]  ;;  %v3285_v2 = vld [vmem:[#allocation7 + $0x310] sm:$0xff] }
 0x104   :  { %v1035_v47 = vsub.f32 1.0, %v1033_v33  ;;  %v1160_v43 = vand.u32 2147483647, %v3238_v24  ;;  %3879 = vst [vmem:[#allocation22_spill] sm:$0xff] %v3275_v51  ;;  %v2294_v4 = vpop.eup %2293  ;;  %v3277_v37 = vadd.f32 %v1019_v14, %v1001_v62  ;;  %v1180_v25 = vand.u32 2147483647, %v2080_v48 }
 0x105   :  { %v1134_v1 = vmax.f32 %v1129_v39, %v3257_v45  ;;  %v1135_v15 = vmax.f32 %v1130_v34, %v3260_v36  ;;  %3881 = vst [vmem:[#allocation27_spill] sm:$0xff] %v3281_v42  ;;  %v3283_v55 = vld [vmem:[#allocation4 + $0x98] sm:$0xff]  ;;  %v1036_v40 = vmax.f32 %v1034_v31, 0.0  ;;  %v3287_v33 = vld [vmem:[#allocation7 + $0x318] sm:$0xff]  ;;  %v1161_v10 = vsub.f32 1.0, %v1159_v19  ;;  %v3294_v31 = vld [vmem:[#allocation7 + $0x320] sm:$0xff] }
 0x106   :  { %3880 = vst [vmem:[#allocation26_spill] sm:$0xff] %v3277_v37  ;;  %3882 = vst [vmem:[#allocation28_spill] sm:$0xff] %v3283_v55  ;;  %v1181_v38 = vsub.f32 1.0, %v1179_v22  ;;  %v2082_v54 = vadd.f32 -2.0, %v3238_v24  ;;  %v1199_v39 = vand.u32 2147483647, %v2081_v61  ;;  %v1008_v3 = vadd.f32 %v2294_v4, %v988_v13 }
 0x107   :  { %v1139_v62 = vmax.f32 %v1134_v1, %v3265_v35  ;;  %v1140_v14 = vmax.f32 %v1135_v15, %v3270_v28  ;;  %v2296_v34 = vpop.eup %2295  ;;  %v1037_v37 = vmax.f32 %v1035_v47, 0.0  ;;  %v3296_v36 = vld [vmem:[#allocation7 + $0x328] sm:$0xff]  ;;  %v1162_v45 = vsub.f32 1.0, %v1160_v43 }
 0x108   :  { %3883 = vst [vmem:[#allocation29_spill] sm:$0xff] %v3296_v36  ;;  %v2298_v22 = vpop.eup %2297  ;;  %v1182_v61 = vsub.f32 1.0, %v1180_v25  ;;  %v2083_v28 = vadd.f32 -3.0, %v3223_v49  ;;  %v3304_v48 = vmul.f32 %v1036_v40, %v2997_v53  ;;  %v1163_v13 = vmax.f32 %v1161_v10, 0.0 }
 0x109   :  { %v1144_v1 = vmax.f32 %v1139_v62, %v3285_v2  ;;  %v1145_v15 = vmax.f32 %v1140_v14, %v3287_v33  ;;  %v1183_v47 = vmax.f32 %v1181_v38, 0.0  ;;  %v1200_v4 = vand.u32 2147483647, %v2082_v54 }
 0x10a   :  { %v1009_v51 = vadd.f32 %v2296_v34, %v989_v60  ;;  %v1201_v55 = vsub.f32 1.0, %v1199_v39  ;;  %v1028_v42 = vadd.f32 %v2298_v22, %v1008_v3  ;;  %v3313_v25 = vmul.f32 %v1037_v37, %v2999_v59 }
 0x10b   :  { %v3307_v43 = vmax.f32 %v1144_v1, %v3294_v31  ;;  %v3310_v19 = vmax.f32 %v1145_v15, %v3296_v36  ;;  %v2300_v62 = vpop.eup %2299  ;;  %v1164_v14 = vmax.f32 %v1162_v45, 0.0  ;;  %v2084_v53 = vadd.f32 -3.0, %v3238_v24 }
 0x10c   :  { %v1184_v10 = vmax.f32 %v1182_v61, 0.0  ;;  %v1219_v60 = vand.u32 2147483647, %v2083_v28  ;;  %v1165_v39 = vmul.f32 %v1163_v13, %v3147_v44  ;;  %v1185_v3 = vmul.f32 %v1183_v47, %v3153_v27 }
 0x10d   :  { %3884 = vst [vmem:[#allocation30_spill] sm:$0xff] %v3307_v43  ;;  %3885 = vst [vmem:[#allocation31_spill] sm:$0xff] %v3310_v19  ;;  %v1151_v38 = vsub.f32 %v3147_v44, %v3307_v43  ;;  %v1169_v54 = vsub.f32 %v3153_v27, %v3307_v43  ;;  %v1152_v40 = vsub.f32 %v3151_v16, %v3310_v19  ;;  %v1202_v59 = vsub.f32 1.0, %v1200_v4 }
 0x10e   :  { %v1029_v37 = vadd.f32 %v2300_v62, %v1009_v51  ;;  %v1170_v34 = vsub.f32 %v3155_v21, %v3310_v19  ;;  %v1203_v22 = vmax.f32 %v1201_v55, 0.0  ;;  %2301 = vlog2.f32 %v1028_v42 }
 0x10f   :  { %v1153_v45 = vmul.f32 1.442695, %v1151_v38  ;;  %v1171_v1 = vmul.f32 1.442695, %v1169_v54  ;;  %v1189_v15 = vsub.f32 %v3162_v32, %v3307_v43  ;;  %v1220_v28 = vand.u32 2147483647, %v2084_v53 }
 0x110   :  { %v1166_v61 = vmul.f32 %v1164_v14, %v3151_v16  ;;  %v1186_v36 = vmul.f32 %v1184_v10, %v3155_v21  ;;  %v1221_v44 = vsub.f32 1.0, %v1219_v60  ;;  %v2085_v27 = vadd.f32 -4.0, %v3223_v49 }
 0x111   :  { %v1155_v13 = vmul.f32 1.442695, %v1152_v40  ;;  %v1187_v51 = vadd.f32 %v1185_v3, %v1165_v39  ;;  %v1204_v47 = vmax.f32 %v1202_v59, 0.0  ;;  %v2086_v4 = vadd.f32 -4.0, %v3238_v24 }
 0x112   :  { %2303 = vpow2.f32 %v1153_v45  ;;  %v1173_v55 = vmul.f32 1.442695, %v1170_v34  ;;  %v1190_v42 = vsub.f32 %v3164_v30, %v3310_v19  ;;  %v1205_v62 = vmul.f32 %v1203_v22, %v3162_v32 }
 0x113   :  { %2305 = vpow2.f32 %v1171_v1  ;;  %v1191_v53 = vmul.f32 1.442695, %v1189_v15  ;;  %v1209_v16 = vsub.f32 %v3171_v9, %v3307_v43  ;;  %v1222_v21 = vsub.f32 1.0, %v1220_v28 }
 0x114   :  { %v1188_v14 = vadd.f32 %v1186_v36, %v1166_v61  ;;  %v1223_v38 = vmax.f32 %v1221_v44, 0.0  ;;  %v1239_v54 = vand.u32 2147483647, %v2085_v27  ;;  %v2087_v10 = vadd.f32 -5.0, %v3223_v49 }
 0x115   :  { %2307 = vpow2.f32 %v1155_v13  ;;  %v1206_v60 = vmul.f32 %v1204_v47, %v3164_v30  ;;  %v1240_v40 = vand.u32 2147483647, %v2086_v4  ;;  %v2088_v39 = vadd.f32 -5.0, %v3238_v24 }
 0x116   :  { %2309 = vpow2.f32 %v1173_v55  ;;  %v1193_v3 = vmul.f32 1.442695, %v1190_v42  ;;  %v1207_v32 = vadd.f32 %v1205_v62, %v1187_v51  ;;  %v1210_v59 = vsub.f32 %v3173_v58, %v3310_v19 }
 0x117   :  { %2311 = vpow2.f32 %v1191_v53  ;;  %v1211_v45 = vmul.f32 1.442695, %v1209_v16  ;;  %v1224_v34 = vmax.f32 %v1222_v21, 0.0  ;;  %v1229_v36 = vsub.f32 %v3177_v57, %v3307_v43 }
 0x118   :  { %v1225_v22 = vmul.f32 %v1223_v38, %v3171_v9  ;;  %v1241_v1 = vsub.f32 1.0, %v1239_v54  ;;  %v1259_v15 = vand.u32 2147483647, %v2087_v10  ;;  %v2089_v30 = vadd.f32 -6.0, %v3223_v49  ;;  %v3346_v28 = vpop.eup %2301 }
 0x119   :  { %2313 = vlog2.f32 %v1029_v37  ;;  %v1208_v61 = vadd.f32 %v1206_v60, %v1188_v14  ;;  %v1242_v44 = vsub.f32 1.0, %v1240_v40  ;;  %v1260_v27 = vand.u32 2147483647, %v2088_v39 }
 0x11a   :  { %2315 = vpow2.f32 %v1193_v3  ;;  %v1213_v13 = vmul.f32 1.442695, %v1210_v59  ;;  %v1230_v51 = vsub.f32 %v3179_v8, %v3310_v19  ;;  %v2090_v47 = vadd.f32 -6.0, %v3238_v24 }
 0x11b   :  { %2317 = vpow2.f32 %v1211_v45  ;;  %v1226_v9 = vmul.f32 %v1224_v34, %v3173_v58  ;;  %v1231_v4 = vmul.f32 1.442695, %v1229_v36  ;;  %v1249_v55 = vsub.f32 %v3188_v29, %v3307_v43 }
 0x11c   :  { %v2304_v42 = vpop.eup %2303  ;;  %v1227_v62 = vadd.f32 %v1225_v22, %v1207_v32  ;;  %v1243_v37 = vmax.f32 %v1241_v1, 0.0  ;;  %v1261_v53 = vsub.f32 1.0, %v1259_v15  ;;  %v1279_v16 = vand.u32 2147483647, %v2089_v30 }
 0x11d   :  { %v2306_v21 = vpop.eup %2305  ;;  %v1244_v14 = vmax.f32 %v1242_v44, 0.0  ;;  %v1250_v38 = vsub.f32 %v3190_v50, %v3310_v19  ;;  %v1262_v54 = vsub.f32 1.0, %v1260_v27  ;;  %v2091_v10 = vadd.f32 -7.0, %v3223_v49 }
 0x11e   :  { %2319 = vpow2.f32 %v1213_v13  ;;  %v1233_v60 = vmul.f32 1.442695, %v1230_v51  ;;  %v1280_v58 = vand.u32 2147483647, %v2090_v47  ;;  %v2092_v40 = vadd.f32 -7.0, %v3238_v24 }
 0x11f   :  { %v2308_v39 = vpop.eup %2307  ;;  %v1228_v3 = vadd.f32 %v1226_v9, %v1208_v61  ;;  %2321 = vpow2.f32 %v1231_v4  ;;  %v1251_v32 = vmul.f32 1.442695, %v1249_v55  ;;  %v1269_v59 = vsub.f32 %v3197_v0, %v3307_v43 }
 0x120   :  { %v2310_v45 = vpop.eup %2309  ;;  %v1175_v34 = vadd.f32 %v2306_v21, %v2304_v42  ;;  %v1245_v36 = vmul.f32 %v1243_v37, %v3177_v57  ;;  %v1263_v22 = vmax.f32 %v1261_v53, 0.0  ;;  %v1281_v1 = vsub.f32 1.0, %v1279_v16 }
 0x121   :  { %v2312_v15 = vpop.eup %2311  ;;  %v1246_v30 = vmul.f32 %v1244_v14, %v3179_v8  ;;  %v1253_v44 = vmul.f32 1.442695, %v1250_v38  ;;  %v1264_v27 = vmax.f32 %v1262_v54, 0.0  ;;  %v1299_v13 = vand.u32 2147483647, %v2091_v10 }
 0x122   :  { %2323 = vpow2.f32 %v1233_v60  ;;  %v1270_v61 = vsub.f32 %v3199_v18, %v3310_v19  ;;  %v1282_v51 = vsub.f32 1.0, %v1280_v58  ;;  %v1300_v47 = vand.u32 2147483647, %v2092_v40 }
 0x123   :  { %v3364_v9 = vpop.eup %2313  ;;  %v1176_v4 = vadd.f32 %v2310_v45, %v2308_v39  ;;  %2325 = vpow2.f32 %v1251_v32  ;;  %v1271_v55 = vmul.f32 1.442695, %v1269_v59  ;;  %v1289_v57 = vsub.f32 %v3206_v46, %v3307_v43 }
 0x124   :  { %v2316_v42 = vpop.eup %2315  ;;  %v1195_v37 = vadd.f32 %v2312_v15, %v1175_v34  ;;  %v1247_v8 = vadd.f32 %v1245_v36, %v1227_v62  ;;  %v1265_v53 = vmul.f32 %v1263_v22, %v3188_v29  ;;  %v1283_v16 = vmax.f32 %v1281_v1, 0.0 }
 0x125   :  { %v2318_v21 = vpop.eup %2317  ;;  %v1248_v14 = vadd.f32 %v1246_v30, %v1228_v3  ;;  %v1266_v38 = vmul.f32 %v1264_v27, %v3190_v50  ;;  %v1290_v54 = vsub.f32 %v3208_v63, %v3310_v19  ;;  %v1301_v10 = vsub.f32 1.0, %v1299_v13 }
 0x126   :  { %2327 = vpow2.f32 %v1253_v44  ;;  %v1273_v60 = vmul.f32 1.442695, %v1270_v61  ;;  %v1284_v58 = vmax.f32 %v1282_v51, 0.0  ;;  %v1302_v40 = vsub.f32 1.0, %v1300_v47 }
 0x127   :  { %v1196_v39 = vadd.f32 %v2316_v42, %v1176_v4  ;;  %2329 = vpow2.f32 %v1271_v55  ;;  %v1291_v32 = vmul.f32 1.442695, %v1289_v57  ;;  %v1309_v62 = vsub.f32 %v3214_v17, %v3307_v43 }
 0x128   :  { %v2320_v29 = vpop.eup %2319  ;;  %v1215_v59 = vadd.f32 %v2318_v21, %v1195_v37  ;;  %v1267_v45 = vadd.f32 %v1265_v53, %v1247_v8  ;;  %v1285_v3 = vmul.f32 %v1283_v16, %v3197_v0  ;;  %v2093_v50 = vadd.f32 -8.0, %v3223_v49 }
 0x129   :  { %v2322_v34 = vpop.eup %2321  ;;  %v1268_v36 = vadd.f32 %v1266_v38, %v1248_v14  ;;  %v1293_v22 = vmul.f32 1.442695, %v1290_v54  ;;  %v1303_v1 = vmax.f32 %v1301_v10, 0.0  ;;  %v2094_v15 = vadd.f32 -8.0, %v3238_v24 }
 0x12a   :  { %2331 = vpow2.f32 %v1273_v60  ;;  %v1286_v30 = vmul.f32 %v1284_v58, %v3199_v18  ;;  %v1304_v44 = vmax.f32 %v1302_v40, 0.0  ;;  %v1310_v27 = vsub.f32 %v3216_v5, %v3310_v19 }
 0x12b   :  { %v1216_v13 = vadd.f32 %v2320_v29, %v1196_v39  ;;  %2333 = vpow2.f32 %v1291_v32  ;;  %v1311_v61 = vmul.f32 1.442695, %v1309_v62  ;;  %v1329_v0 = vsub.f32 %v3225_v26, %v3307_v43 }
 0x12c   :  { %v2324_v51 = vpop.eup %2323  ;;  %v1235_v47 = vadd.f32 %v2322_v34, %v1215_v59  ;;  %v1287_v4 = vadd.f32 %v1285_v3, %v1267_v45  ;;  %v1319_v55 = vand.u32 2147483647, %v2093_v50  ;;  %v2095_v57 = vadd.f32 -9.0, %v3223_v49 }
 0x12d   :  { %v2326_v42 = vpop.eup %2325  ;;  %v1305_v37 = vmul.f32 %v1303_v1, %v3206_v46  ;;  %v1320_v18 = vand.u32 2147483647, %v2094_v15  ;;  %v1330_v8 = vsub.f32 %v3227_v6, %v3310_v19  ;;  %v2096_v53 = vadd.f32 -9.0, %v3238_v24 }
 0x12e   :  { %v1288_v16 = vadd.f32 %v1286_v30, %v1268_v36  ;;  %2335 = vpow2.f32 %v1293_v22  ;;  %v1306_v21 = vmul.f32 %v1304_v44, %v3208_v63  ;;  %v1313_v14 = vmul.f32 1.442695, %v1310_v27 }
 0x12f   :  { %v1236_v38 = vadd.f32 %v2324_v51, %v1216_v13  ;;  %2337 = vpow2.f32 %v1311_v61  ;;  %v1331_v54 = vmul.f32 1.442695, %v1329_v0  ;;  %v1349_v10 = vsub.f32 %v3234_v41, %v3307_v43 }
 0x130   :  { %v2328_v60 = vpop.eup %2327  ;;  %v1255_v58 = vadd.f32 %v2326_v42, %v1235_v47  ;;  %v1321_v46 = vsub.f32 1.0, %v1319_v55  ;;  %v1339_v40 = vand.u32 2147483647, %v2095_v57  ;;  %v2097_v39 = vadd.f32 -10.0, %v3223_v49 }
 0x131   :  { %v2330_v32 = vpop.eup %2329  ;;  %v1307_v62 = vadd.f32 %v1305_v37, %v1287_v4  ;;  %v1322_v29 = vsub.f32 1.0, %v1320_v18  ;;  %v1333_v59 = vmul.f32 1.442695, %v1330_v8  ;;  %v1340_v45 = vand.u32 2147483647, %v2096_v53 }
 0x132   :  { %v1308_v3 = vadd.f32 %v1306_v21, %v1288_v16  ;;  %2339 = vpow2.f32 %v1313_v14  ;;  %v1350_v63 = vsub.f32 %v3236_v11, %v3310_v19  ;;  %v2098_v50 = vadd.f32 -10.0, %v3238_v24 }
 0x133   :  { %v1256_v34 = vadd.f32 %v2328_v60, %v1236_v38  ;;  %2341 = vpow2.f32 %v1331_v54  ;;  %v1351_v36 = vmul.f32 1.442695, %v1349_v10  ;;  %v1369_v22 = vsub.f32 %v3242_v56, %v3307_v43 }
 0x134   :  { %v2332_v1 = vpop.eup %2331  ;;  %v1275_v15 = vadd.f32 %v2330_v32, %v1255_v58  ;;  %v1323_v30 = vmax.f32 %v1321_v46, 0.0  ;;  %v1341_v44 = vsub.f32 1.0, %v1339_v40  ;;  %v1359_v27 = vand.u32 2147483647, %v2097_v39 }
 0x135   :  { %v2334_v13 = vpop.eup %2333  ;;  %v1324_v61 = vmax.f32 %v1322_v29, 0.0  ;;  %2343 = vpow2.f32 %v1333_v59  ;;  %v1342_v0 = vsub.f32 1.0, %v1340_v45  ;;  %v2099_v51 = vadd.f32 -11.0, %v3223_v49 }
 0x136   :  { %v1353_v47 = vmul.f32 1.442695, %v1350_v63  ;;  %v1360_v4 = vand.u32 2147483647, %v2098_v50  ;;  %v1370_v55 = vsub.f32 %v3244_v20, %v3310_v19  ;;  %v2100_v57 = vadd.f32 -11.0, %v3238_v24 }
 0x137   :  { %v1276_v42 = vadd.f32 %v2332_v1, %v1256_v34  ;;  %2345 = vpow2.f32 %v1351_v36  ;;  %v1371_v37 = vmul.f32 1.442695, %v1369_v22  ;;  %v1389_v18 = vsub.f32 %v3250_v12, %v3307_v43 }
 0x138   :  { %v2336_v8 = vpop.eup %2335  ;;  %v1295_v53 = vadd.f32 %v2334_v13, %v1275_v15  ;;  %v1325_v16 = vmul.f32 %v1323_v30, %v3214_v17  ;;  %v1343_v21 = vmax.f32 %v1341_v44, 0.0  ;;  %v1361_v14 = vsub.f32 1.0, %v1359_v27 }
 0x139   :  { %v2338_v38 = vpop.eup %2337  ;;  %v1326_v54 = vmul.f32 %v1324_v61, %v3216_v5  ;;  %v1344_v10 = vmax.f32 %v1342_v0, 0.0  ;;  %v1379_v60 = vand.u32 2147483647, %v2099_v51  ;;  %v2101_v58 = vadd.f32 -12.0, %v3223_v49 }
 0x13a   :  { %2347 = vpow2.f32 %v1353_v47  ;;  %v1362_v46 = vsub.f32 1.0, %v1360_v4  ;;  %v1373_v40 = vmul.f32 1.442695, %v1370_v55  ;;  %v1380_v39 = vand.u32 2147483647, %v2100_v57 }
 0x13b   :  { %v1296_v32 = vadd.f32 %v2336_v8, %v1276_v42  ;;  %2349 = vpow2.f32 %v1371_v37  ;;  %v1391_v29 = vmul.f32 1.442695, %v1389_v18  ;;  %v2102_v59 = vadd.f32 -12.0, %v3238_v24  ;;  %v3888_v8 = vld [vmem:[#allocation20_spill] sm:$0xff] }
 0x13c   :  { %v2340_v45 = vpop.eup %2339  ;;  %v1315_v17 = vadd.f32 %v2338_v38, %v1295_v53  ;;  %v1327_v63 = vadd.f32 %v1325_v16, %v1307_v62  ;;  %v1345_v50 = vmul.f32 %v1343_v21, %v3225_v26  ;;  %v1363_v34 = vmax.f32 %v1361_v14, 0.0  ;;  %v3889_v16 = vld [vmem:[#allocation26_spill] sm:$0xff] }
 0x13d   :  { %v2342_v5 = vpop.eup %2341  ;;  %v3409_v36 = vadd.f32 %v3304_v48, %v3268_v7  ;;  %v1328_v22 = vadd.f32 %v1326_v54, %v1308_v3  ;;  %v1381_v1 = vsub.f32 1.0, %v1379_v60  ;;  %v1399_v15 = vand.u32 2147483647, %v2101_v58  ;;  %v3887_v48 = vld [vmem:[#allocation19_spill] sm:$0xff] }
 0x13e   :  { %v1346_v30 = vmul.f32 %v1344_v10, %v3227_v6  ;;  %v1364_v44 = vmax.f32 %v1362_v46, 0.0  ;;  %2351 = vpow2.f32 %v1373_v40  ;;  %v1382_v27 = vsub.f32 1.0, %v1380_v39 }
 0x13f   :  { %3886 = vst [vmem:[#allocation32_spill] sm:$0xff] %v3409_v36  ;;  %v2344_v13 = vpop.eup %2343  ;;  %v1316_v61 = vadd.f32 %v2340_v45, %v1296_v32  ;;  %v1390_v62 = vsub.f32 %v3252_v23, %v3310_v19  ;;  %2353 = vpow2.f32 %v1391_v29  ;;  %v1400_v26 = vand.u32 2147483647, %v2102_v59 }
 0x140   :  { %v1335_v0 = vadd.f32 %v2342_v5, %v1315_v17  ;;  %v1347_v51 = vadd.f32 %v1345_v50, %v1327_v63  ;;  %v1365_v7 = vmul.f32 %v1363_v34, %v3234_v41  ;;  %v1409_v3 = vsub.f32 %v3887_v48, %v3307_v43  ;;  %v3891_v5 = vld [vmem:[#allocation23_spill] sm:$0xff] }
 0x141   :  { %v2346_v47 = vpop.eup %2345  ;;  %v1383_v4 = vmax.f32 %v1381_v1, 0.0  ;;  %v1401_v6 = vsub.f32 1.0, %v1399_v15  ;;  %v2103_v55 = vadd.f32 -13.0, %v3223_v49  ;;  %v2104_v57 = vadd.f32 -13.0, %v3238_v24  ;;  %v3893_v1 = vld [vmem:[#allocation21_spill] sm:$0xff] }
 0x142   :  { %v1348_v42 = vadd.f32 %v1346_v30, %v1328_v22  ;;  %v1366_v37 = vmul.f32 %v1364_v44, %v3236_v11  ;;  %v1384_v18 = vmax.f32 %v1382_v27, 0.0  ;;  %v1410_v53 = vsub.f32 %v3888_v8, %v3310_v19 }
 0x143   :  { %v3424_v41 = vadd.f32 %v3313_v25, %v3889_v16  ;;  %v1336_v21 = vadd.f32 %v2344_v13, %v1316_v61  ;;  %v1393_v14 = vmul.f32 1.442695, %v1390_v62  ;;  %v1402_v38 = vsub.f32 1.0, %v1400_v26  ;;  %v3440_v61 = vld [vmem:[#allocation7 + $0x338] sm:$0xff]  ;;  %v3442_v62 = vld [vmem:[#allocation7 + $0x340] sm:$0xff]  ;;  %v3444_v26 = vld [vmem:[#allocation7 + $0x348] sm:$0xff] }
 0x144   :  { %v2348_v54 = vpop.eup %2347  ;;  %v1045_v10 = vmul.f32 0.6931472, %v3346_v28  ;;  %v1355_v60 = vadd.f32 %v2346_v47, %v1335_v0  ;;  %v1367_v58 = vadd.f32 %v1365_v7, %v1347_v51  ;;  %v1411_v46 = vmul.f32 1.442695, %v1409_v3  ;;  %v3894_v0 = vld [vmem:[#allocation24_spill] sm:$0xff] }
 0x145   :  { %3890 = vst [vmem:[#allocation19_spill] sm:$0xff] %v3424_v41  ;;  %v2350_v40 = vpop.eup %2349  ;;  %v1385_v11 = vmul.f32 %v1383_v4, %v3242_v56  ;;  %v1403_v39 = vmax.f32 %v1401_v6, 0.0  ;;  %v1419_v32 = vand.u32 2147483647, %v2103_v55  ;;  %v1420_v29 = vand.u32 2147483647, %v2104_v57 }
 0x146   :  { %v1047_v59 = vmul.f32 0.6931472, %v3364_v9  ;;  %v1368_v45 = vadd.f32 %v1366_v37, %v1348_v42  ;;  %v1386_v25 = vmul.f32 %v1384_v18, %v3244_v20  ;;  %v1413_v17 = vmul.f32 1.442695, %v1410_v53  ;;  %v3437_v9 = vld [vmem:[#allocation7 + $0x330] sm:$0xff]  ;;  %v3454_v57 = vld [vmem:[#allocation7 + $0x358] sm:$0xff] }
 0x147   :  { %v1356_v63 = vadd.f32 %v2348_v54, %v1336_v21  ;;  %2355 = vpow2.f32 %v1393_v14  ;;  %v1404_v50 = vmax.f32 %v1402_v38, 0.0  ;;  %v1429_v28 = vsub.f32 %v3265_v35, %v3307_v43  ;;  %v3452_v55 = vld [vmem:[#allocation7 + $0x350] sm:$0xff] }
 0x148   :  { %v2352_v34 = vpop.eup %2351  ;;  %v3433_v22 = vadd.f32 %v1045_v10, %v3891_v5  ;;  %v1375_v56 = vadd.f32 %v2350_v40, %v1355_v60  ;;  %2357 = vpow2.f32 %v1411_v46  ;;  %v1430_v15 = vsub.f32 %v3893_v1, %v3310_v19  ;;  %v3463_v10 = vld [vmem:[#allocation7 + $0x360] sm:$0xff]  ;;  %v3465_v60 = vld [vmem:[#allocation7 + $0x368] sm:$0xff] }
 0x149   :  { %v2354_v30 = vpop.eup %2353  ;;  %v1387_v20 = vadd.f32 %v1385_v11, %v1367_v58  ;;  %v1405_v44 = vmul.f32 %v1403_v39, %v3250_v12  ;;  %v1421_v27 = vsub.f32 1.0, %v1419_v32  ;;  %v1422_v13 = vsub.f32 1.0, %v1420_v29  ;;  %v3898_v46 = vld [vmem:[#allocation27_spill] sm:$0xff]  ;;  %v3899_v40 = vld [vmem:[#allocation28_spill] sm:$0xff] }
 0x14a   :  { %3892 = vst [vmem:[#allocation20_spill] sm:$0xff] %v3433_v22  ;;  %v3447_v51 = vadd.f32 %v1047_v59, %v3894_v0  ;;  %v1388_v7 = vadd.f32 %v1386_v25, %v1368_v45  ;;  %2359 = vpow2.f32 %v1413_v17  ;;  %v2105_v3 = vadd.f32 -14.0, %v3223_v49  ;;  %v3476_v25 = vld [vmem:[#allocation7 + $0x370] sm:$0xff]  ;;  %v3478_v17 = vld [vmem:[#allocation7 + $0x378] sm:$0xff]  ;;  %v3573_v22 = vld [vmem:[#allocation7 + $0x400] sm:$0xff] }
 0x14b   :  { %v1376_v47 = vadd.f32 %v2352_v34, %v1356_v63  ;;  %v1406_v4 = vmul.f32 %v1404_v50, %v3252_v23  ;;  %v1431_v6 = vmul.f32 1.442695, %v1429_v28  ;;  %v2106_v12 = vadd.f32 -14.0, %v3238_v24  ;;  %v3896_v23 = vld [vmem:[#allocation22_spill] sm:$0xff] }
 0x14c   :  { %3895 = vst [vmem:[#allocation26_spill] sm:$0xff] %v3447_v51  ;;  %v1395_v42 = vadd.f32 %v2354_v30, %v1375_v56  ;;  %v1433_v37 = vmul.f32 1.442695, %v1430_v15  ;;  %v1521_v18 = vmax.f32 %v3437_v9, %v3442_v62  ;;  %v1522_v53 = vmax.f32 %v3440_v61, %v3444_v26  ;;  %v3489_v30 = vld [vmem:[#allocation7 + $0x388] sm:$0xff] }
 0x14d   :  { %v1407_v16 = vadd.f32 %v1405_v44, %v1387_v20  ;;  %v1423_v21 = vmax.f32 %v1421_v27, 0.0  ;;  %v1424_v14 = vmax.f32 %v1422_v13, 0.0  ;;  %v3897_v38 = vsub.f32 %v3273_v52, %v3896_v23 }
 0x14e   :  { %v1449_v58 = vsub.f32 %v3285_v2, %v3307_v43  ;;  %v3900_v11 = vsub.f32 %v3898_v46, %v3899_v40  ;;  %v1526_v32 = vmax.f32 %v1521_v18, %v3452_v55  ;;  %v1527_v29 = vmax.f32 %v1522_v53, %v3454_v57 }
 0x14f   :  { %v1511_v54 = vmax.f32 %v3897_v38, 0.0  ;;  %2361 = vpow2.f32 %v1431_v6  ;;  %v1439_v59 = vand.u32 2147483647, %v2105_v3  ;;  %v1440_v45 = vand.u32 2147483647, %v2106_v12  ;;  %v3498_v6 = vld [vmem:[#allocation7 + $0x398] sm:$0xff] }
 0x150   :  { %v1512_v39 = vmax.f32 %v3900_v11, 0.0  ;;  %v1450_v52 = vsub.f32 %v3287_v33, %v3310_v19  ;;  %v1408_v63 = vadd.f32 %v1406_v4, %v1388_v7  ;;  %v2107_v2 = vadd.f32 -15.0, %v3223_v49  ;;  %v3487_v33 = vld [vmem:[#allocation7 + $0x380] sm:$0xff]  ;;  %v3495_v7 = vld [vmem:[#allocation7 + $0x390] sm:$0xff] }
 0x151   :  { %v1531_v50 = vmax.f32 %v1526_v32, %v3463_v10  ;;  %v1532_v28 = vmax.f32 %v1527_v29, %v3465_v60  ;;  %v2356_v34 = vpop.eup %2355  ;;  %v1425_v5 = vmul.f32 %v1423_v21, %v3887_v48  ;;  %v1426_v56 = vmul.f32 %v1424_v14, %v3888_v8  ;;  %v3516_v29 = vld [vmem:[#allocation7 + $0x3b8] sm:$0xff] }
 0x152   :  { %2363 = vpow2.f32 %v1433_v37  ;;  %v3485_v15 = vmin.f32 %v1511_v54, 15.99  ;;  %v2358_v20 = vpop.eup %2357  ;;  %v1451_v44 = vmul.f32 1.442695, %v1449_v58  ;;  %v3491_v27 = vmin.f32 %v1512_v39, 15.99 }
 0x153   :  { %v1536_v13 = vmax.f32 %v1531_v50, %v3476_v25  ;;  %v1537_v0 = vmax.f32 %v1532_v28, %v3478_v17  ;;  %v1441_v48 = vsub.f32 1.0, %v1439_v59  ;;  %v1442_v3 = vsub.f32 1.0, %v1440_v45  ;;  %v3506_v54 = vld [vmem:[#allocation7 + $0x3a0] sm:$0xff]  ;;  %v3508_v58 = vld [vmem:[#allocation7 + $0x3a8] sm:$0xff] }
 0x154   :  { %v1453_v8 = vmul.f32 1.442695, %v1450_v52  ;;  %v2108_v4 = vadd.f32 -15.0, %v3238_v24  ;;  %v2360_v12 = vpop.eup %2359  ;;  %v1396_v37 = vadd.f32 %v2356_v34, %v1376_v47  ;;  %v1459_v18 = vand.u32 2147483647, %v2107_v2  ;;  %v3524_v2 = vld [vmem:[#allocation7 + $0x3c0] sm:$0xff] }
 0x155   :  { %v1541_v53 = vmax.f32 %v1536_v13, %v3487_v33  ;;  %v1542_v21 = vmax.f32 %v1537_v0, %v3489_v30  ;;  %v3502_v14 = vadd.f32 %v2358_v20, %v1395_v42  ;;  %v1427_v23 = vadd.f32 %v1425_v5, %v1407_v16  ;;  %v3514_v16 = vld [vmem:[#allocation7 + $0x3b0] sm:$0xff]  ;;  %v3528_v34 = vld [vmem:[#allocation7 + $0x3c8] sm:$0xff] }
 0x156   :  { %v3504_v38 = vadd.f32 %v1426_v56, %v1408_v63  ;;  %v2111_v46 = vadd.f32 -1.0, %v3485_v15  ;;  %2365 = vpow2.f32 %v1451_v44  ;;  %v2112_v11 = vadd.f32 -1.0, %v3491_v27 }
 0x157   :  { %v1546_v40 = vmax.f32 %v1541_v53, %v3495_v7  ;;  %v1547_v47 = vmax.f32 %v1542_v21, %v3498_v6  ;;  %v1443_v39 = vmax.f32 %v1441_v48, 0.0  ;;  %v1444_v32 = vmax.f32 %v1442_v3, 0.0 }
 0x158   :  { %2367 = vpow2.f32 %v1453_v8  ;;  %v1460_v42 = vand.u32 2147483647, %v2108_v4  ;;  %v3518_v59 = vsub.f32 1.0, %v1459_v18  ;;  %v1469_v45 = vsub.f32 %v3294_v31, %v3307_v43  ;;  %v3903_v4 = vld [vmem:[#allocation29_spill] sm:$0xff]  ;;  %v3544_v18 = vld [vmem:[#allocation7 + $0x3d8] sm:$0xff] }
 0x159   :  { %v1551_v52 = vmax.f32 %v1546_v40, %v3506_v54  ;;  %v1552_v63 = vmax.f32 %v1547_v47, %v3508_v58  ;;  %v2362_v50 = vpop.eup %2361  ;;  %v3526_v28 = vadd.f32 %v2360_v12, %v1396_v37  ;;  %v1606_v5 = vand.u32 2147483647, %v3485_v15  ;;  %v3542_v37 = vld [vmem:[#allocation7 + $0x3d0] sm:$0xff] }
 0x15a   :  { %3901 = vst [vmem:[#allocation23_spill] sm:$0xff] %v3518_v59  ;;  %v1626_v56 = vand.u32 2147483647, %v2111_v46  ;;  %v2113_v20 = vadd.f32 -2.0, %v3485_v15  ;;  %v1607_v13 = vand.u32 2147483647, %v3491_v27  ;;  %v1445_v3 = vmul.f32 %v1443_v39, %v3265_v35 }
 0x15b   :  { %v1556_v44 = vmax.f32 %v1551_v52, %v3514_v16  ;;  %v1557_v31 = vmax.f32 %v1552_v63, %v3516_v29  ;;  %v1627_v0 = vand.u32 2147483647, %v2112_v11  ;;  %v3538_v8 = vsub.f32 1.0, %v1460_v42  ;;  %v3551_v35 = vld [vmem:[#allocation7 + $0x3e0] sm:$0xff]  ;;  %v3553_v11 = vld [vmem:[#allocation7 + $0x3e8] sm:$0xff] }
 0x15c   :  { %v3535_v48 = vpop.eup %2363  ;;  %v1470_v12 = vsub.f32 %v3903_v4, %v3310_v19  ;;  %v2114_v53 = vadd.f32 -2.0, %v3491_v27  ;;  %v1446_v21 = vmul.f32 %v1444_v32, %v3893_v1  ;;  %3904 = vst [vmem:[#allocation24_spill] sm:$0xff] %v3551_v35  ;;  %3905 = vst [vmem:[#allocation22_spill] sm:$0xff] %v3553_v11  ;;  %v1608_v39 = vsub.f32 1.0, %v1606_v5  ;;  %v3558_v1 = vld [vmem:[#allocation7 + $0x3f0] sm:$0xff]  ;;  %v3560_v32 = vld [vmem:[#allocation7 + $0x3f8] sm:$0xff] }
 0x15d   :  { %3902 = vst [vmem:[#allocation21_spill] sm:$0xff] %v3538_v8  ;;  %v1561_v40 = vmax.f32 %v1556_v44, %v3524_v2  ;;  %v1562_v47 = vmax.f32 %v1557_v31, %v3528_v34  ;;  %v1628_v42 = vsub.f32 1.0, %v1626_v56  ;;  %v1646_v52 = vand.u32 2147483647, %v2113_v20 }
 0x15e   :  { %v2115_v63 = vadd.f32 -3.0, %v3485_v15  ;;  %v1609_v44 = vsub.f32 1.0, %v1607_v13  ;;  %v1629_v46 = vsub.f32 1.0, %v1627_v0  ;;  %v1471_v31 = vmul.f32 1.442695, %v1469_v45  ;;  %v3577_v45 = vld [vmem:[#allocation7 + $0x408] sm:$0xff] }
 0x15f   :  { %v1566_v4 = vmax.f32 %v1561_v40, %v3542_v37  ;;  %v1567_v19 = vmax.f32 %v1562_v47, %v3544_v18  ;;  %v3563_v43 = vadd.f32 -16.0, %v3223_v49  ;;  %v1647_v51 = vand.u32 2147483647, %v2114_v53  ;;  %v3583_v40 = vld [vmem:[#allocation7 + $0x418] sm:$0xff] }
 0x160   :  { %v2116_v5 = vadd.f32 -3.0, %v3491_v27  ;;  %v3566_v56 = vpop.eup %2365  ;;  %v3568_v20 = vadd.f32 %v1445_v3, %v1427_v23  ;;  %v1610_v49 = vmax.f32 %v1608_v39, 0.0  ;;  %v1630_v0 = vmax.f32 %v1628_v42, 0.0  ;;  %v3581_v3 = vld [vmem:[#allocation7 + $0x410] sm:$0xff] }
 0x161   :  { %v1571_v47 = vmax.f32 %v1566_v4, %v3551_v35  ;;  %v1572_v41 = vmax.f32 %v1567_v19, %v3553_v11  ;;  %v1648_v53 = vsub.f32 1.0, %v1646_v52  ;;  %v1666_v36 = vand.u32 2147483647, %v2115_v63  ;;  %v3596_v63 = vld [vmem:[#allocation7 + $0x420] sm:$0xff] }
 0x162   :  { %3906 = vst [vmem:[#allocation27_spill] sm:$0xff] %v3568_v20  ;;  %v3575_v13 = vpop.eup %2367  ;;  %v1611_v4 = vmax.f32 %v1609_v44, 0.0  ;;  %v1631_v19 = vmax.f32 %v1629_v46, 0.0  ;;  %v1473_v20 = vmul.f32 1.442695, %v1470_v12  ;;  %v3586_v8 = vadd.f32 -16.0, %v3238_v24 }
 0x163   :  { %v1576_v59 = vmax.f32 %v1571_v47, %v3558_v1  ;;  %v1577_v23 = vmax.f32 %v1572_v41, %v3560_v32  ;;  %v1649_v11 = vsub.f32 1.0, %v1647_v51  ;;  %v1667_v35 = vand.u32 2147483647, %v2116_v5  ;;  %3908 = vst [vmem:[#allocation29_spill] sm:$0xff] %v3596_v63  ;;  %v3598_v44 = vld [vmem:[#allocation7 + $0x428] sm:$0xff]  ;;  %v3608_v5 = vld [vmem:[#allocation7 + $0x438] sm:$0xff] }
 0x164   :  { %v3589_v39 = vadd.f32 %v2362_v50, %v3502_v14  ;;  %v3592_v42 = vadd.f32 %v1446_v21, %v3504_v38  ;;  %v1612_v12 = vmul.f32 %v1610_v49, %v3437_v9  ;;  %v1632_v24 = vmul.f32 %v1630_v0, %v3442_v62  ;;  %v3606_v21 = vld [vmem:[#allocation7 + $0x430] sm:$0xff] }
 0x165   :  { %v1581_v41 = vmax.f32 %v1576_v59, %v3573_v22  ;;  %v1582_v52 = vmax.f32 %v1577_v23, %v3577_v45  ;;  %v1650_v51 = vmax.f32 %v1648_v53, 0.0  ;;  %v1668_v46 = vsub.f32 1.0, %v1666_v36 }
 0x166   :  { %3907 = vst [vmem:[#allocation28_spill] sm:$0xff] %v3592_v42  ;;  %v1613_v38 = vmul.f32 %v1611_v4, %v3440_v61  ;;  %v1633_v59 = vmul.f32 %v1631_v19, %v3444_v26  ;;  %v1651_v47 = vmax.f32 %v1649_v11, 0.0  ;;  %v1669_v23 = vsub.f32 1.0, %v1667_v35 }
 0x167   :  { %v1586_v14 = vmax.f32 %v1581_v41, %v3581_v3  ;;  %v1587_v50 = vmax.f32 %v1582_v52, %v3583_v40  ;;  %v2117_v49 = vadd.f32 -4.0, %v3485_v15  ;;  %v2118_v0 = vadd.f32 -4.0, %v3491_v27 }
 0x168   :  { %v3614_v36 = vadd.f32 %v3535_v48, %v3526_v28  ;;  %2369 = vpow2.f32 %v1471_v31  ;;  %v1634_v19 = vadd.f32 %v1632_v24, %v1612_v12  ;;  %v1652_v41 = vmul.f32 %v1650_v51, %v3452_v55 }
 0x169   :  { %v1591_v53 = vmax.f32 %v1586_v14, %v3596_v63  ;;  %v1592_v4 = vmax.f32 %v1587_v50, %v3598_v44  ;;  %2371 = vpow2.f32 %v1473_v20  ;;  %v1670_v52 = vmax.f32 %v1668_v46, 0.0 }
 0x16a   :  { %v1479_v35 = vand.u32 2147483647, %v3563_v43  ;;  %v1635_v28 = vadd.f32 %v1633_v59, %v1613_v38  ;;  %v1653_v48 = vmul.f32 %v1651_v47, %v3454_v57  ;;  %v1671_v31 = vmax.f32 %v1669_v23, 0.0 }
 0x16b   :  { %v3621_v11 = vmax.f32 %v1591_v53, %v3606_v21  ;;  %v3624_v42 = vmax.f32 %v1592_v4, %v3608_v5  ;;  %v1686_v14 = vand.u32 2147483647, %v2117_v49  ;;  %v1687_v63 = vand.u32 2147483647, %v2118_v0 }
 0x16c   :  { %v1654_v38 = vadd.f32 %v1652_v41, %v1634_v19  ;;  %v1672_v59 = vmul.f32 %v1670_v52, %v3463_v10  ;;  %v2119_v41 = vadd.f32 -5.0, %v3485_v15 }
 0x16d   :  { %v1598_v20 = vsub.f32 %v3437_v9, %v3621_v11  ;;  %v1599_v12 = vsub.f32 %v3440_v61, %v3624_v42  ;;  %v1616_v24 = vsub.f32 %v3442_v62, %v3621_v11  ;;  %v1617_v51 = vsub.f32 %v3444_v26, %v3624_v42 }
 0x16e   :  { %v1636_v46 = vsub.f32 %v3452_v55, %v3621_v11  ;;  %v1637_v50 = vsub.f32 %v3454_v57, %v3624_v42  ;;  %v1656_v61 = vsub.f32 %v3463_v10, %v3621_v11  ;;  %v1655_v62 = vadd.f32 %v1653_v48, %v1635_v28 }
 0x16f   :  { %v1600_v47 = vmul.f32 1.442695, %v1598_v20  ;;  %v1602_v9 = vmul.f32 1.442695, %v1599_v12  ;;  %v1618_v23 = vmul.f32 1.442695, %v1616_v24  ;;  %v1657_v26 = vsub.f32 %v3465_v60, %v3624_v42 }
 0x170   :  { %v1620_v49 = vmul.f32 1.442695, %v1617_v51  ;;  %v1688_v0 = vsub.f32 1.0, %v1686_v14  ;;  %v1638_v55 = vmul.f32 1.442695, %v1636_v46  ;;  %v1676_v57 = vsub.f32 %v3476_v25, %v3621_v11 }
 0x171   :  { %2373 = vpow2.f32 %v1600_v47  ;;  %v1689_v53 = vsub.f32 1.0, %v1687_v63  ;;  %v1640_v4 = vmul.f32 1.442695, %v1637_v50  ;;  %v1677_v19 = vsub.f32 %v3478_v17, %v3624_v42 }
 0x172   :  { %2375 = vpow2.f32 %v1602_v9  ;;  %v3649_v10 = vpop.eup %2369  ;;  %v1658_v52 = vmul.f32 1.442695, %v1656_v61  ;;  %v1673_v28 = vmul.f32 %v1671_v31, %v3465_v60  ;;  %v2120_v48 = vadd.f32 -5.0, %v3491_v27 }
 0x173   :  { %2377 = vpow2.f32 %v1618_v23  ;;  %v3653_v14 = vpop.eup %2371  ;;  %v1660_v20 = vmul.f32 1.442695, %v1657_v26  ;;  %v1690_v63 = vmax.f32 %v1688_v0, 0.0  ;;  %v1696_v12 = vsub.f32 %v3487_v33, %v3621_v11 }
 0x174   :  { %2379 = vpow2.f32 %v1620_v49  ;;  %v1678_v24 = vmul.f32 1.442695, %v1676_v57  ;;  %v1691_v51 = vmax.f32 %v1689_v53, 0.0  ;;  %v1697_v46 = vsub.f32 %v3489_v30, %v3624_v42 }
 0x175   :  { %2381 = vpow2.f32 %v1638_v55  ;;  %v1674_v50 = vadd.f32 %v1672_v59, %v1654_v38  ;;  %v1680_v47 = vmul.f32 1.442695, %v1677_v19  ;;  %v1706_v60 = vand.u32 2147483647, %v2119_v41 }
 0x176   :  { %2383 = vpow2.f32 %v1640_v4  ;;  %v1675_v31 = vadd.f32 %v1673_v28, %v1655_v62  ;;  %v1707_v9 = vand.u32 2147483647, %v2120_v48  ;;  %v2121_v23 = vadd.f32 -6.0, %v3485_v15 }
 0x177   :  { %2385 = vpow2.f32 %v1658_v52  ;;  %v1692_v61 = vmul.f32 %v1690_v63, %v3476_v25  ;;  %v1698_v49 = vmul.f32 1.442695, %v1696_v12  ;;  %v1716_v26 = vsub.f32 %v3495_v7, %v3621_v11 }
 0x178   :  { %2387 = vpow2.f32 %v1660_v20  ;;  %v1693_v0 = vmul.f32 %v1691_v51, %v3478_v17  ;;  %v1700_v55 = vmul.f32 1.442695, %v1697_v46  ;;  %v1717_v38 = vsub.f32 %v3498_v6, %v3624_v42 }
 0x179   :  { %2389 = vpow2.f32 %v1678_v24  ;;  %v1480_v59 = vand.u32 2147483647, %v3586_v8  ;;  %v1708_v62 = vsub.f32 1.0, %v1706_v60  ;;  %v2122_v57 = vadd.f32 -6.0, %v3491_v27 }
 0x17a   :  { %2391 = vpow2.f32 %v1680_v47  ;;  %v3670_v25 = vadd.f32 %v3566_v56, %v3589_v39  ;;  %v3674_v4 = vadd.f32 %v3575_v13, %v3614_v36  ;;  %v1709_v17 = vsub.f32 1.0, %v1707_v9 }
 0x17b   :  { %v2374_v53 = vpop.eup %2373  ;;  %v1726_v19 = vand.u32 2147483647, %v2121_v23  ;;  %v1694_v52 = vadd.f32 %v1692_v61, %v1674_v50  ;;  %2393 = vpow2.f32 %v1698_v49  ;;  %v1718_v28 = vmul.f32 1.442695, %v1716_v26 }
 0x17c   :  { %v2376_v41 = vpop.eup %2375  ;;  %v1736_v48 = vsub.f32 %v3506_v54, %v3621_v11  ;;  %v3678_v63 = vadd.f32 %v1693_v0, %v1675_v31  ;;  %2395 = vpow2.f32 %v1700_v55  ;;  %v1720_v12 = vmul.f32 1.442695, %v1717_v38 }
 0x17d   :  { %v2378_v20 = vpop.eup %2377  ;;  %v1737_v56 = vsub.f32 %v3508_v58, %v3624_v42  ;;  %v1710_v36 = vmax.f32 %v1708_v62, 0.0  ;;  %v1727_v24 = vand.u32 2147483647, %v2122_v57  ;;  %v2123_v51 = vadd.f32 -7.0, %v3485_v15 }
 0x17e   :  { %v2380_v39 = vpop.eup %2379  ;;  %v1622_v13 = vadd.f32 %v2378_v20, %v2374_v53  ;;  %v1711_v47 = vmax.f32 %v1709_v17, 0.0  ;;  %v1728_v60 = vsub.f32 1.0, %v1726_v19  ;;  %v2124_v9 = vadd.f32 -7.0, %v3491_v27 }
 0x17f   :  { %v2382_v46 = vpop.eup %2381  ;;  %v1623_v50 = vadd.f32 %v2380_v39, %v2376_v41  ;;  %2397 = vpow2.f32 %v1718_v28  ;;  %v1738_v61 = vmul.f32 1.442695, %v1736_v48  ;;  %v1756_v49 = vsub.f32 %v3514_v16, %v3621_v11 }
 0x180   :  { %v2384_v23 = vpop.eup %2383  ;;  %v1642_v31 = vadd.f32 %v2382_v46, %v1622_v13  ;;  %2399 = vpow2.f32 %v1720_v12  ;;  %v1740_v55 = vmul.f32 1.442695, %v1737_v56  ;;  %v1757_v38 = vsub.f32 %v3516_v29, %v3624_v42 }
 0x181   :  { %v2386_v26 = vpop.eup %2385  ;;  %v1643_v0 = vadd.f32 %v2384_v23, %v1623_v50  ;;  %v1712_v53 = vmul.f32 %v1710_v36, %v3487_v33  ;;  %v1729_v17 = vsub.f32 1.0, %v1727_v24  ;;  %v1746_v19 = vand.u32 2147483647, %v2123_v51 }
 0x182   :  { %v2388_v62 = vpop.eup %2387  ;;  %v1662_v57 = vadd.f32 %v2386_v26, %v1642_v31  ;;  %v1730_v28 = vmax.f32 %v1728_v60, 0.0  ;;  %v1747_v48 = vand.u32 2147483647, %v2124_v9  ;;  %v2125_v39 = vadd.f32 -8.0, %v3485_v15 }
 0x183   :  { %v2390_v41 = vpop.eup %2389  ;;  %v1663_v20 = vadd.f32 %v2388_v62, %v1643_v0  ;;  %v1713_v46 = vmul.f32 %v1711_v47, %v3489_v30  ;;  %2401 = vpow2.f32 %v1738_v61  ;;  %v1758_v12 = vmul.f32 1.442695, %v1756_v49 }
 0x184   :  { %v2392_v13 = vpop.eup %2391  ;;  %v1776_v56 = vsub.f32 %v3524_v2, %v3621_v11  ;;  %v1682_v50 = vadd.f32 %v2390_v41, %v1662_v57  ;;  %2403 = vpow2.f32 %v1740_v55  ;;  %v1760_v23 = vmul.f32 1.442695, %v1757_v38 }
 0x185   :  { %v1777_v33 = vsub.f32 %v3528_v34, %v3624_v42  ;;  %v2394_v36 = vpop.eup %2393  ;;  %v1683_v24 = vadd.f32 %v2392_v13, %v1663_v20  ;;  %v1714_v51 = vadd.f32 %v1712_v53, %v1694_v52  ;;  %v1731_v60 = vmax.f32 %v1729_v17, 0.0 }
 0x186   :  { %v1748_v9 = vsub.f32 1.0, %v1746_v19  ;;  %v2396_v31 = vpop.eup %2395  ;;  %v1732_v26 = vmul.f32 %v1730_v28, %v3495_v7  ;;  %v1749_v30 = vsub.f32 1.0, %v1747_v48  ;;  %v2126_v47 = vadd.f32 -8.0, %v3491_v27 }
 0x187   :  { %v1766_v61 = vand.u32 2147483647, %v2125_v39  ;;  %2405 = vpow2.f32 %v1758_v12  ;;  %v1778_v49 = vmul.f32 1.442695, %v1776_v56  ;;  %v2127_v0 = vadd.f32 -9.0, %v3485_v15 }
 0x188   :  { %v1796_v55 = vsub.f32 %v3542_v37, %v3621_v11  ;;  %v1702_v38 = vadd.f32 %v2394_v36, %v1682_v50  ;;  %2407 = vpow2.f32 %v1760_v23  ;;  %v1780_v62 = vmul.f32 1.442695, %v1777_v33 }
 0x189   :  { %v1797_v52 = vsub.f32 %v3544_v18, %v3624_v42  ;;  %v2398_v57 = vpop.eup %2397  ;;  %v1475_v7 = vadd.f32 %v3649_v10, %v3670_v25  ;;  %v1703_v53 = vadd.f32 %v2396_v31, %v1683_v24  ;;  %v1715_v17 = vadd.f32 %v1713_v46, %v3678_v63  ;;  %v3909_v46 = vld [vmem:[#allocation24_spill] sm:$0xff] }
 0x18a   :  { %v1750_v19 = vmax.f32 %v1748_v9, 0.0  ;;  %v2400_v41 = vpop.eup %2399  ;;  %v1733_v20 = vmul.f32 %v1731_v60, %v3498_v6  ;;  %v1767_v28 = vand.u32 2147483647, %v2126_v47  ;;  %v1768_v48 = vsub.f32 1.0, %v1766_v61  ;;  %v3910_v6 = vld [vmem:[#allocation22_spill] sm:$0xff] }
 0x18b   :  { %v2128_v39 = vadd.f32 -9.0, %v3491_v27  ;;  %v1751_v13 = vmax.f32 %v1749_v30, 0.0  ;;  %2409 = vpow2.f32 %v1778_v49  ;;  %v1786_v12 = vand.u32 2147483647, %v2127_v0 }
 0x18c   :  { %v1798_v56 = vmul.f32 1.442695, %v1796_v55  ;;  %v1722_v50 = vadd.f32 %v2398_v57, %v1702_v38  ;;  %v1734_v23 = vadd.f32 %v1732_v26, %v1714_v51  ;;  %2411 = vpow2.f32 %v1780_v62 }
 0x18d   :  { %v1800_v33 = vmul.f32 1.442695, %v1797_v52  ;;  %v2402_v10 = vpop.eup %2401  ;;  %v1723_v25 = vadd.f32 %v2400_v41, %v1703_v53  ;;  %v1752_v63 = vmul.f32 %v1750_v19, %v3506_v54  ;;  %v1816_v36 = vsub.f32 %v3909_v46, %v3621_v11 }
 0x18e   :  { %v1817_v24 = vsub.f32 %v3910_v6, %v3624_v42  ;;  %v2404_v60 = vpop.eup %2403  ;;  %v1769_v9 = vsub.f32 1.0, %v1767_v28  ;;  %v1770_v31 = vmax.f32 %v1768_v48, 0.0  ;;  %v1787_v30 = vand.u32 2147483647, %v2128_v39 }
 0x18f   :  { %v2129_v47 = vadd.f32 -10.0, %v3485_v15  ;;  %v1788_v61 = vsub.f32 1.0, %v1786_v12  ;;  %2413 = vpow2.f32 %v1798_v56  ;;  %v1818_v51 = vmul.f32 1.442695, %v1816_v36 }
 0x190   :  { %v1836_v26 = vsub.f32 %v3558_v1, %v3621_v11  ;;  %v1742_v49 = vadd.f32 %v2402_v10, %v1722_v50  ;;  %2415 = vpow2.f32 %v1800_v33  ;;  %v1820_v54 = vmul.f32 1.442695, %v1817_v24 }
 0x191   :  { %v1837_v0 = vsub.f32 %v3560_v32, %v3624_v42  ;;  %v2406_v55 = vpop.eup %2405  ;;  %2417 = vlog2.f32 %v1475_v7  ;;  %v1735_v38 = vadd.f32 %v1733_v20, %v1715_v17  ;;  %v1743_v62 = vadd.f32 %v2404_v60, %v1723_v25 }
 0x192   :  { %v2130_v52 = vadd.f32 -10.0, %v3491_v27  ;;  %v2408_v57 = vpop.eup %2407  ;;  %v1753_v53 = vmul.f32 %v1751_v13, %v3508_v58  ;;  %v1754_v19 = vadd.f32 %v1752_v63, %v1734_v23  ;;  %v1771_v41 = vmax.f32 %v1769_v9, 0.0 }
 0x193   :  { %v1806_v28 = vand.u32 2147483647, %v2129_v47  ;;  %v1772_v48 = vmul.f32 %v1770_v31, %v3514_v16  ;;  %v1789_v39 = vsub.f32 1.0, %v1787_v30  ;;  %2419 = vpow2.f32 %v1818_v51 }
 0x194   :  { %v1838_v12 = vmul.f32 1.442695, %v1836_v26  ;;  %v1762_v56 = vadd.f32 %v2406_v55, %v1742_v49  ;;  %v1790_v50 = vmax.f32 %v1788_v61, 0.0  ;;  %2421 = vpow2.f32 %v1820_v54 }
 0x195   :  { %v1840_v33 = vmul.f32 1.442695, %v1837_v0  ;;  %v2410_v7 = vpop.eup %2409  ;;  %v1763_v17 = vadd.f32 %v2408_v57, %v1743_v62  ;;  %v1807_v20 = vand.u32 2147483647, %v2130_v52  ;;  %v2131_v10 = vadd.f32 -11.0, %v3485_v15 }
 0x196   :  { %v1856_v58 = vsub.f32 %v3573_v22, %v3621_v11  ;;  %v2412_v13 = vpop.eup %2411  ;;  %v1755_v23 = vadd.f32 %v1753_v53, %v1735_v38  ;;  %v1773_v25 = vmul.f32 %v1771_v41, %v3516_v29  ;;  %v1808_v16 = vsub.f32 1.0, %v1806_v28 }
 0x197   :  { %v2132_v63 = vadd.f32 -11.0, %v3491_v27  ;;  %v1774_v36 = vadd.f32 %v1772_v48, %v1754_v19  ;;  %2423 = vpow2.f32 %v1838_v12  ;;  %v1857_v24 = vsub.f32 %v3577_v45, %v3624_v42 }
 0x198   :  { %v1858_v60 = vmul.f32 1.442695, %v1856_v58  ;;  %v1782_v9 = vadd.f32 %v2410_v7, %v1762_v56  ;;  %v1791_v31 = vmax.f32 %v1789_v39, 0.0  ;;  %v1792_v30 = vmul.f32 %v1790_v50, %v3524_v2 }
 0x199   :  { %2425 = vpow2.f32 %v1840_v33  ;;  %v2414_v47 = vpop.eup %2413  ;;  %v1783_v61 = vadd.f32 %v2412_v13, %v1763_v17  ;;  %v1809_v51 = vsub.f32 1.0, %v1807_v20  ;;  %v1826_v26 = vand.u32 2147483647, %v2131_v10 }
 0x19a   :  { %v1860_v49 = vmul.f32 1.442695, %v1857_v24  ;;  %v2416_v29 = vpop.eup %2415  ;;  %v1810_v54 = vmax.f32 %v1808_v16, 0.0  ;;  %v1827_v0 = vand.u32 2147483647, %v2132_v63  ;;  %v1876_v55 = vsub.f32 %v3581_v3, %v3621_v11 }
 0x19b   :  { %v1877_v38 = vsub.f32 %v3583_v40, %v3624_v42  ;;  %v3732_v62 = vpop.eup %2417  ;;  %v1476_v2 = vadd.f32 %v3653_v14, %v3674_v4  ;;  %v2133_v52 = vadd.f32 -12.0, %v3485_v15  ;;  %v2134_v57 = vadd.f32 -12.0, %v3491_v27 }
 0x19c   :  { %2427 = vpow2.f32 %v1858_v60  ;;  %v1775_v53 = vadd.f32 %v1773_v25, %v1755_v23  ;;  %v1802_v19 = vadd.f32 %v2414_v47, %v1782_v9  ;;  %v1878_v41 = vmul.f32 1.442695, %v1876_v55 }
 0x19d   :  { %2429 = vpow2.f32 %v1860_v49  ;;  %v2420_v28 = vpop.eup %2419  ;;  %v1793_v48 = vmul.f32 %v1791_v31, %v3528_v34  ;;  %v1794_v39 = vadd.f32 %v1792_v30, %v1774_v36  ;;  %v1803_v12 = vadd.f32 %v2416_v29, %v1783_v61  ;;  %v3911_v34 = vld [vmem:[#allocation29_spill] sm:$0xff] }
 0x19e   :  { %v1880_v56 = vmul.f32 1.442695, %v1877_v38  ;;  %v2422_v50 = vpop.eup %2421  ;;  %v1811_v33 = vmax.f32 %v1809_v51, 0.0  ;;  %v1812_v7 = vmul.f32 %v1810_v54, %v3542_v37  ;;  %v1828_v14 = vsub.f32 1.0, %v1826_v26 }
 0x19f   :  { %v1829_v4 = vsub.f32 1.0, %v1827_v0  ;;  %v1846_v17 = vand.u32 2147483647, %v2133_v52  ;;  %v1847_v20 = vand.u32 2147483647, %v2134_v57  ;;  %v2135_v10 = vadd.f32 -13.0, %v3485_v15 }
 0x1a0   :  { %2431 = vpow2.f32 %v1878_v41  ;;  %v1822_v58 = vadd.f32 %v2420_v28, %v1802_v19  ;;  %v2136_v13 = vadd.f32 -13.0, %v3491_v27  ;;  %v1896_v23 = vsub.f32 %v3911_v34, %v3621_v11 }
 0x1a1   :  { %2433 = vpow2.f32 %v1880_v56  ;;  %v2424_v25 = vpop.eup %2423  ;;  %v1795_v16 = vadd.f32 %v1793_v48, %v1775_v53  ;;  %v1823_v63 = vadd.f32 %v2422_v50, %v1803_v12  ;;  %v1897_v37 = vsub.f32 %v3598_v44, %v3624_v42 }
 0x1a2   :  { %2435 = vlog2.f32 %v1476_v2  ;;  %v1813_v24 = vmul.f32 %v1811_v33, %v3544_v18  ;;  %v1830_v60 = vmax.f32 %v1828_v14, 0.0  ;;  %v1831_v9 = vmax.f32 %v1829_v4, 0.0 }
 0x1a3   :  { %v2426_v36 = vpop.eup %2425  ;;  %v1898_v31 = vmul.f32 1.442695, %v1896_v23  ;;  %v1814_v30 = vadd.f32 %v1812_v7, %v1794_v39  ;;  %v1848_v47 = vsub.f32 1.0, %v1846_v17  ;;  %v1849_v61 = vsub.f32 1.0, %v1847_v20 }
 0x1a4   :  { %v1900_v51 = vmul.f32 1.442695, %v1897_v37  ;;  %v1842_v26 = vadd.f32 %v2424_v25, %v1822_v58  ;;  %v1866_v49 = vand.u32 2147483647, %v2135_v10  ;;  %v1867_v29 = vand.u32 2147483647, %v2136_v13 }
 0x1a5   :  { %2437 = vpow2.f32 %v1898_v31  ;;  %v1843_v0 = vadd.f32 %v2426_v36, %v1823_v63  ;;  %v2137_v55 = vadd.f32 -14.0, %v3485_v15  ;;  %v1916_v38 = vsub.f32 %v3606_v21, %v3621_v11  ;;  %v2449_v31 = vld [vmem:[#allocation7 + $0x310] sm:$0xff] }
 0x1a6   :  { %v2428_v54 = vpop.eup %2427  ;;  %2439 = vpow2.f32 %v1900_v51  ;;  %v1815_v2 = vadd.f32 %v1813_v24, %v1795_v16  ;;  %v1832_v52 = vmul.f32 %v1830_v60, %v3909_v46  ;;  %v2138_v57 = vadd.f32 -14.0, %v3491_v27 }
 0x1a7   :  { %v2430_v18 = vpop.eup %2429  ;;  %v1917_v53 = vsub.f32 %v3608_v5, %v3624_v42  ;;  %v1833_v19 = vmul.f32 %v1831_v9, %v3910_v6  ;;  %v1850_v41 = vmax.f32 %v1848_v47, 0.0  ;;  %v1851_v28 = vmax.f32 %v1849_v61, 0.0  ;;  %v3912_v47 = vld [vmem:[#allocation23_spill] sm:$0xff] }
 0x1a8   :  { %v1918_v48 = vmul.f32 1.442695, %v1916_v38  ;;  %v1862_v39 = vadd.f32 %v2428_v54, %v1842_v26  ;;  %v1868_v12 = vsub.f32 1.0, %v1866_v49  ;;  %v1869_v56 = vsub.f32 1.0, %v1867_v29  ;;  %v2450_v26 = vld [vmem:[#allocation7 + $0x318] sm:$0xff] }
 0x1a9   :  { %v1920_v50 = vmul.f32 1.442695, %v1917_v53  ;;  %v1863_v7 = vadd.f32 %v2430_v18, %v1843_v0  ;;  %v1886_v14 = vand.u32 2147483647, %v2137_v55  ;;  %v2139_v4 = vadd.f32 -15.0, %v3485_v15 }
 0x1aa   :  { %v2432_v33 = vpop.eup %2431  ;;  %2441 = vpow2.f32 %v1918_v48  ;;  %v1481_v17 = vsub.f32 1.0, %v1479_v35  ;;  %v1887_v20 = vand.u32 2147483647, %v2138_v57  ;;  %v2140_v6 = vadd.f32 -15.0, %v3491_v27 }
 0x1ab   :  { %v2434_v46 = vpop.eup %2433  ;;  %2443 = vpow2.f32 %v1920_v50  ;;  %v1482_v58 = vsub.f32 1.0, %v1480_v59  ;;  %v1834_v13 = vadd.f32 %v1832_v52, %v1814_v30  ;;  %v1835_v23 = vadd.f32 %v1833_v19, %v1815_v2 }
 0x1ac   :  { %v2436_v10 = vpop.eup %2435  ;;  %v1852_v25 = vmul.f32 %v1850_v41, %v3558_v1  ;;  %v1853_v16 = vmul.f32 %v1851_v28, %v3560_v32  ;;  %v1870_v63 = vmax.f32 %v1868_v12, 0.0  ;;  %v1871_v37 = vmax.f32 %v1869_v56, 0.0  ;;  %v3914_v32 = vld [vmem:[#allocation21_spill] sm:$0xff]  ;;  %v3916_v41 = vld [vmem:[#allocation27_spill] sm:$0xff]  ;;  %v3917_v56 = vld [vmem:[#allocation28_spill] sm:$0xff] }
 0x1ad   :  { %v1882_v36 = vadd.f32 %v2432_v33, %v1862_v39  ;;  %v1883_v24 = vadd.f32 %v2434_v46, %v1863_v7  ;;  %v1888_v43 = vsub.f32 1.0, %v1886_v14  ;;  %v1906_v35 = vand.u32 2147483647, %v2139_v4  ;;  %v2451_v33 = vld [vmem:[#allocation7 + $0x320] sm:$0xff]  ;;  %v2452_v14 = vld [vmem:[#allocation7 + $0x328] sm:$0xff] }
 0x1ae   :  { %v2141_v60 = vadd.f32 -16.0, %v3485_v15  ;;  %v3913_v61 = vmax.f32 %v3912_v47, 0.0  ;;  %v1889_v59 = vsub.f32 1.0, %v1887_v20  ;;  %v1907_v30 = vand.u32 2147483647, %v2140_v6  ;;  %v3924_v47 = vld [vmem:[#allocation19_spill] sm:$0xff] }
 0x1af   :  { %v2438_v9 = vpop.eup %2437  ;;  %v2142_v51 = vadd.f32 -16.0, %v3491_v27  ;;  %v3915_v49 = vmax.f32 %v3914_v32, 0.0  ;;  %v1483_v54 = vmax.f32 %v1481_v17, 0.0  ;;  %v1484_v0 = vmax.f32 %v1482_v58, 0.0  ;;  %v3927_v32 = vld [vmem:[#allocation31_spill] sm:$0xff] }
 0x1b0   :  { %v1465_v8 = vmul.f32 %v2449_v31, %v3913_v61  ;;  %v2440_v1 = vpop.eup %2439  ;;  %v1854_v55 = vadd.f32 %v1852_v25, %v1834_v13  ;;  %v1855_v38 = vadd.f32 %v1853_v16, %v1835_v23  ;;  %v1872_v15 = vmul.f32 %v1870_v63, %v3573_v22 }
 0x1b1   :  { %v1466_v29 = vmul.f32 %v2450_v26, %v3915_v49  ;;  %v1873_v18 = vmul.f32 %v1871_v37, %v3577_v45  ;;  %v1902_v2 = vadd.f32 %v2438_v9, %v1882_v36  ;;  %v1890_v52 = vmax.f32 %v1888_v43, 0.0  ;;  %v3918_v36 = vld [vmem:[#allocation25_spill] sm:$0xff]  ;;  %v3923_v9 = vld [vmem:[#allocation20_spill] sm:$0xff] }
 0x1b2   :  { %v1903_v57 = vadd.f32 %v2440_v1, %v1883_v24  ;;  %v1908_v53 = vsub.f32 1.0, %v1906_v35  ;;  %v1926_v19 = vand.u32 2147483647, %v2141_v60  ;;  %v1467_v27 = vadd.f32 %v1465_v8, %v3916_v41  ;;  %v3919_v24 = vld [vmem:[#allocation16_spill] sm:$0xff]  ;;  %v3920_v35 = vld [vmem:[#allocation18_spill] sm:$0xff] }
 0x1b3   :  { %v1891_v28 = vmax.f32 %v1889_v59, 0.0  ;;  %v1909_v48 = vsub.f32 1.0, %v1907_v30  ;;  %v1927_v39 = vand.u32 2147483647, %v2142_v51  ;;  %v1468_v50 = vadd.f32 %v1466_v29, %v3917_v56  ;;  %v3926_v30 = vld [vmem:[#allocation30_spill] sm:$0xff] }
 0x1b4   :  { %v2442_v12 = vpop.eup %2441  ;;  %v1485_v7 = vmul.f32 %v2451_v33, %v1483_v54  ;;  %v1486_v4 = vmul.f32 %v2452_v14, %v1484_v0  ;;  %v1492_v22 = vmul.f32 0.6931472, %v3732_v62  ;;  %v1494_v46 = vmul.f32 0.6931472, %v2436_v10  ;;  %v3921_v62 = vld [vmem:[#allocation17_spill] sm:$0xff]  ;;  %v3922_v10 = vld [vmem:[#allocation32_spill] sm:$0xff] }
 0x1b5   :  { %v2444_v45 = vpop.eup %2443  ;;  %v1874_v17 = vadd.f32 %v1872_v15, %v1854_v55  ;;  %v1875_v20 = vadd.f32 %v1873_v18, %v1855_v38  ;;  %v1922_v6 = vadd.f32 %v2442_v12, %v1902_v2  ;;  %v1892_v58 = vmul.f32 %v1890_v52, %v3581_v3  ;;  %v3925_v3 = vld [vmem:[#allocation26_spill] sm:$0xff] }
 0x1b6   :  { %v1910_v13 = vmax.f32 %v1908_v53, 0.0  ;;  %v1923_v23 = vadd.f32 %v2444_v45, %v1903_v57  ;;  %v1928_v25 = vsub.f32 1.0, %v1926_v19  ;;  %v1893_v16 = vmul.f32 %v1891_v28, %v3583_v40  ;;  %v2453_v55 = vld [vmem:[#allocation4 + $0xa0] sm:$0xff]  ;;  %v2454_v15 = vld [vmem:[#allocation4 + $0xa8] sm:$0xff] }
 0x1b7   :  { %v1911_v63 = vmax.f32 %v1909_v48, 0.0  ;;  %v1929_v37 = vsub.f32 1.0, %v1927_v39  ;;  %2445 = vlog2.f32 %v1922_v6  ;;  %v602_v43 = vsub.f32 %v3919_v24, %v3918_v36 }
 0x1b8   :  { %v603_v60 = vsub.f32 %v3921_v62, %v3920_v35  ;;  %2447 = vlog2.f32 %v1923_v23  ;;  %v1050_v31 = vsub.f32 %v3923_v9, %v3922_v10  ;;  %v1051_v61 = vsub.f32 %v3925_v3, %v3924_v47  ;;  %v1959_v23 = vpop.xlane.xlu0 %1958 }
 0x1b9   :  { %v1487_v8 = vadd.f32 %v1485_v7, %v1467_v27  ;;  %v1488_v59 = vadd.f32 %v1486_v4, %v1468_v50  ;;  %v1495_v40 = vadd.f32 %v1492_v22, %v3926_v30  ;;  %v1894_v51 = vadd.f32 %v1892_v58, %v1874_v17 }
 0x1ba   :  { %v1912_v1 = vmul.f32 %v1910_v13, %v3911_v34  ;;  %v1930_v26 = vmax.f32 %v1928_v25, 0.0  ;;  %v1496_v49 = vadd.f32 %v1494_v46, %v3927_v32  ;;  %v1895_v29 = vadd.f32 %v1893_v16, %v1875_v20 }
 0x1bb   :  { %v1913_v54 = vmul.f32 %v1911_v63, %v3598_v44  ;;  %v1931_v0 = vmax.f32 %v1929_v37, 0.0  ;;  %v604_v38 = vmul.f32 %v2453_v55, %v602_v43  ;;  %v605_v18 = vmul.f32 %v2454_v15, %v603_v60 }
 0x1bc   :  { %v1052_v2 = vmul.f32 %v2453_v55, %v1050_v31  ;;  %v1497_v52 = vsub.f32 %v1495_v40, %v1487_v8  ;;  %v1914_v57 = vadd.f32 %v1912_v1, %v1894_v51  ;;  %v1932_v53 = vmul.f32 %v1930_v26, %v3606_v21 }
 0x1bd   :  { %v1053_v19 = vmul.f32 %v2454_v15, %v1051_v61  ;;  %v1498_v41 = vsub.f32 %v1496_v49, %v1488_v59  ;;  %v1915_v27 = vadd.f32 %v1913_v54, %v1895_v29  ;;  %v1933_v34 = vmul.f32 %v1931_v0, %v3608_v5 }
 0x1be   :  { %v1054_v39 = vadd.f32 %v1052_v2, %v604_v38  ;;  %v1499_v12 = vmul.f32 %v2453_v55, %v1497_v52  ;;  %v1934_v44 = vadd.f32 %v1932_v53, %v1914_v57  ;;  %v1960_v25 = vrot.slane %v1959_v23, 4 }
 0x1bf   :  { %v1055_v50 = vadd.f32 %v1053_v19, %v605_v18  ;;  %v1500_v33 = vmul.f32 %v2454_v15, %v1498_v41  ;;  %v1935_v7 = vadd.f32 %v1933_v34, %v1915_v27 }
 0x1c0   :  { %v1501_v21 = vadd.f32 %v1499_v12, %v1054_v39  ;;  %v1961_v16 = vadd.f32 %v1960_v25, %v1959_v23 }
 0x1c1   :  { %v2446_v28 = vpop.eup %2445  ;;  %v1502_v46 = vadd.f32 %v1500_v33, %v1055_v50 }
 0x1c2   :  { %v2448_v48 = vpop.eup %2447  ;;  %v1939_v56 = vmul.f32 0.6931472, %v2446_v28  ;;  %v1962_v63 = vrot.slane %v1961_v16, 2 }
 0x1c3   :  { %v1941_v14 = vmul.f32 0.6931472, %v2448_v48 }
 0x1c4   :  { %v1942_v4 = vadd.f32 %v1939_v56, %v3621_v11  ;;  %v1963_v37 = vadd.f32 %v1962_v63, %v1961_v16 }
 0x1c5   :  { %v1943_v22 = vadd.f32 %v1941_v14, %v3624_v42 }
 0x1c6   :  { %v1944_v45 = vsub.f32 %v1942_v4, %v1934_v44  ;;  %v1964_v36 = vrot.slane %v1963_v37, 1 }
 0x1c7   :  { %v1945_v17 = vsub.f32 %v1943_v22, %v1935_v7 }
 0x1c8   :  { %v1946_v20 = vmul.f32 %v2453_v55, %v1944_v45  ;;  %v1965_v24 = vadd.f32 %v1964_v36, %v1963_v37 }
 0x1c9   :  { %v1947_v5 = vmul.f32 %v2454_v15, %v1945_v17 }
 0x1ca   :  { %v1948_v6 = vadd.f32 %v1946_v20, %v1501_v21  ;;  %2143 = vpush %v1965_v24 }
 0x1cb   :  { %v1949_v58 = vadd.f32 %v1947_v5, %v1502_v46 }
 0x1cd   :  { %v1972_v13 = vadd.f32 %v1949_v58, %v1948_v6 }
 0x1cf   :  { %1973 = vadd.xlane.f32.xlu0 %v1972_v13 }
 0x1fb   :  { %s2144_s1 = spop %2143 }
 0x1fc   :  { %v1967_v42 = vstv %s2144_s1 }
 0x1fd   :  { %1969 = vst.msk [vmem:[#allocation9] sm:$0x1] %vm1968_vm0, %v1967_v42 }
 0x1fe   :  { %2510 = shalt.err (!%p2507_p6)
}
 0x1ff   :  { %s2511_s16 = scalar_lea.hbm %s3820_s2, 16 }
 0x200   :  { %p2512_p7 = scmp.ne.s32.totalorder %s3820_s2, %s2511_s16  ;;  %p2515_p8 = scmp.lt.u32.totalorder %s2511_s16, %s3820_s2 }
 0x202   :  { %p2517_p9 = pnand %p2515_p8, %p2512_p7 }
 0x204   :  { %2520 = shalt.err (!%p2517_p9)
}
 0x205   :  { %1994 = dma.vmem_to_hbm [thread:$0]  %s1992_s11, 16, %s3820_s2, [#allocation6]  }
 0x206   :  { %s2556_s23 = smov [#allocation10]  }
 0x207   :  { %s2001_s24 = sshll.u32 %s2556_s23, 4  ;;  %s2002_s24 = int_to_ptr.vmem [resolvable:$true] %s2001_s24 }
 0x208   :  { %s2521_s27 = scalar_lea.vmem %s2002_s24, 16  ;;  %s2525_s28 = scalar_lea.vmem %s2002_s24, 32 }
 0x209   :  { %p2522_p10 = scmp.ne.s32.totalorder %s2002_s24, %s2521_s27  ;;  %p2526_p11 = scmp.lt.s32.totalorder %s2002_s24, %s2002_s24 }
 0x20a   :  { %p2527_p12 = scmp.lt.s32.totalorder %s2525_s28, %s2521_s27 }
 0x20c   :  { %p2528_p13 = por %p2527_p12, %p2526_p11 }
 0x20e   :  { %p2529_p0 = pnand %p2528_p13, %p2522_p10 }
 0x25c   :  { %v1974_v11 = vpop.xlane.xlu0 %1973 }
 0x25d   :  { %v1975_v43 = vrot.slane %v1974_v11, 4 }
 0x25f   :  { %v1976_v35 = vadd.f32 %v1975_v43, %v1974_v11 }
 0x261   :  { %v1977_v62 = vrot.slane %v1976_v35, 2 }
 0x263   :  { %v1978_v60 = vadd.f32 %v1977_v62, %v1976_v35 }
 0x265   :  { %v1979_v10 = vrot.slane %v1978_v60, 1 }
 0x267   :  { %v1980_v9 = vadd.f32 %v1979_v10, %v1978_v60 }
 0x269   :  { %2145 = vpush %v1980_v9 }
 0x29a   :  { %s2146_s25 = spop %2145 }
 0x29b   :  { %s1982_s26 = smul.f32 0.25, %s2146_s25 }
 0x29d   :  { %v1983_v31 = vstv %s1982_s26 }
 0x29e   :  { %1984 = vst.msk [vmem:[#allocation10] sm:$0x1] %vm1968_vm0, %v1983_v31 }
 0x29f   :  { %2532 = shalt.err (!%p2529_p0)
}
 0x2a0   :  { %s2533_s30 = scalar_lea.hbm %s3821_s3, 16 }
 0x2a1   :  { %p2534_p1 = scmp.ne.s32.totalorder %s3821_s3, %s2533_s30  ;;  %p2537_p2 = scmp.lt.u32.totalorder %s2533_s30, %s3821_s3 }
 0x2a3   :  { %p2539_p3 = pnand %p2537_p2, %p2534_p1 }
 0x2a5   :  { %2542 = shalt.err (!%p2539_p3)
}
 0x2a6   :  { %2004 = dma.vmem_to_hbm [thread:$0]  %s2002_s24, 16, %s3821_s3, [#allocation11]  }
 0x2a7   :  { %2547 = dma.done.wait [#allocation6], 16  }
 0x2a8   :  { %2548 = vsyncadd [#allocation6], 4294967280 }
 0x2a9   :  { %2549 = dma.done.wait [#allocation11], 16  }
 0x2aa   :  { %2550 = vsyncadd [#allocation11], 4294967280 }
 0x2ab   :  { %2011 = vsyncpa [#allocation5], 1 }
 0x2ac   :  { %2012 = vsyncpa [#allocation8], 1 }
 0x2ad   :  { %2013 = vsyncpa [#allocation6], 1 }
 0x2ae   :  { %2014 = vsyncpa [#allocation11], 1 }

</bundles_post_ra>
